<compile_context>
chip_gen: v7x
topology: tpu7x:2x2x1
jax: 0.10.0
libtpu: 0.0.40
codegen_flags: <defaults>
</compile_context>

<pallas_src>
import functools
import numpy as np
import jax
import jax.numpy as jnp
from jax import lax
from jax.experimental import pallas as pl
from jax.experimental.pallas import tpu as pltpu


def _gelu_exact(x):
    # exact GELU (matches F.gelu default, approximate='none'); kept exact to
    # preserve module semantics. tanh-approx (EUP) is cheaper if exactness is
    # ever relaxed.
    return 0.5 * x * (1.0 + lax.erf(x * 0.7071067811865476))


# -----------------------------------------------------------------------------
# Small-channel kernel (C < 128 and Co < 128): one fused im2col MXU matmul per
# batch element, N = 2*Cop (Cop = Co padded to a multiple of 128).
# -----------------------------------------------------------------------------
def _od_small_kernel(x_ref, wcat_ref, out_ref, pad_ref,
                     *, H, W, KH, KW, Cop, TB, LPAD):
    C = x_ref.shape[-1]
    for tb in range(TB):
        # In-kernel zero padding: build the padded image in a VMEM scratch.
        # Interior sits at sublane offset LPAD (=16, aligned for bf16 packing),
        # so the store is an aligned full-tile store; halo stays zero.
        pad_ref[...] = jnp.zeros(pad_ref.shape, pad_ref.dtype)
        pad_ref[1:H + 1, LPAD:LPAD + W, :] = x_ref[tb]

        # im2col: (H*W, KH*KW*C), tap-major then channel — must match the
        # (kh, kw, Cin) flattening of the weights in the wrapper.
        cols = jnp.concatenate(
            [pad_ref[dy:dy + H, LPAD - 1 + dx:LPAD - 1 + dx + W, :].reshape(H * W, C)
             for dy in range(KH) for dx in range(KW)],
            axis=-1)                                                   # (H*W, 9*C) bf16

        # Single MXU matmul: K = 9*C, N = 2*Cop (multiple of 256), f32 accumulation.
        acc = jnp.dot(cols, wcat_ref[tb], preferred_element_type=jnp.float32)

        # Lane-aligned split: dynamic (ODConv, channel+filter attention already
        # folded into the weights) vs static conv.
        od = acc[:, :Cop]
        sta = acc[:, Cop:]
        att = _gelu_exact(od)
        out_ref[tb] = (sta * att).astype(out_ref.dtype)                # full-lane store (Cop % 128 == 0)


# -----------------------------------------------------------------------------
# Large-channel kernel (C >= 128): 9-tap accumulating dots (K = C per tap, no
# (H*W, 9C) im2col blow-up), static weight stays resident across the batch grid.
# -----------------------------------------------------------------------------
def _od_tap_kernel(x_ref, wdyn_ref, wsta_ref, out_ref, pad_ref,
                   *, H, W, KH, KW, Cop, TB, LPAD):
    C = x_ref.shape[-1]
    # TODO(synk): for v7x (64 MiB VMEM) add an H-row grid axis so per-step
    # accumulators stay bounded and both TensorCores get work even at B=1.
    for tb in range(TB):
        pad_ref[...] = jnp.zeros(pad_ref.shape, pad_ref.dtype)
        pad_ref[1:H + 1, LPAD:LPAD + W, :] = x_ref[tb]

        acc_d = jnp.zeros((H * W, Cop), jnp.float32)
        acc_s = jnp.zeros((H * W, Cop), jnp.float32)
        for dy in range(KH):
            for dx in range(KW):
                tap = dy * KW + dx
                patch = pad_ref[dy:dy + H, LPAD - 1 + dx:LPAD - 1 + dx + W, :].reshape(H * W, C)
                acc_d = acc_d + jnp.dot(patch, wdyn_ref[tb, tap * C:(tap + 1) * C, :],
                                        preferred_element_type=jnp.float32)
                acc_s = acc_s + jnp.dot(patch, wsta_ref[tap * C:(tap + 1) * C, :],
                                        preferred_element_type=jnp.float32)

        att = _gelu_exact(acc_d)
        out_ref[tb] = (acc_s * att).astype(out_ref.dtype)


# -----------------------------------------------------------------------------
# Attention branch (tiny pooled 1x1-conv MLP heads) — plain JAX glue, f32.
# -----------------------------------------------------------------------------
def _attention_branch(x_nchw, p, temperature):
    B = x_nchw.shape[0]
    pooled = jnp.mean(x_nchw, axis=(2, 3))                    # AdaptiveAvgPool2d(1) -> (B, C)
    h = pooled @ p["fc_w"].T                                  # 1x1 conv, no bias -> (B, A)
    # TODO(synk): BatchNorm2d uses running (eval-mode) stats; PyTorch train mode
    # would use batch statistics.
    h = (h - p["bn_mean"]) / jnp.sqrt(p["bn_var"] + 1e-5)
    h = h * p["bn_gamma"] + p["bn_beta"]
    h = jax.nn.relu(h)

    ch_att = jax.nn.sigmoid((h @ p["channel_w"].T + p["channel_b"]) / temperature)   # (B, C)
    fil_att = jax.nn.sigmoid((h @ p["filter_w"].T + p["filter_b"]) / temperature)    # (B, Co)
    sp_att = jax.nn.sigmoid((h @ p["spatial_w"].T + p["spatial_b"]) / temperature)   # (B, 9)
    sp_att = sp_att.reshape(B, 3, 3)
    ker_att = jax.nn.softmax((h @ p["kernel_w"].T + p["kernel_b"]) / temperature,
                             axis=1)                                                  # (B, K)
    return ch_att, fil_att, sp_att, ker_att


# -----------------------------------------------------------------------------
# Full forward: od_attention(x) = conv3x3(x) * gelu(ODConv2d(x))
# -----------------------------------------------------------------------------
def od_attention_forward(x_nchw, params, temperature=1.0):
    B, C, H, W = x_nchw.shape
    KH = KW = 3
    Co = params["conv_w"].shape[0]
    LANE = 128
    Cop = Co if Co % LANE == 0 else ((Co + LANE - 1) // LANE) * LANE   # lane-dense output / N mult of 256
    LPAD = 16                                                          # bf16-pack-aligned interior offset

    ch_att, fil_att, sp_att, ker_att = _attention_branch(x_nchw, params, temperature)

    # Aggregate dynamic weight (tiny) and FOLD channel + filter attention into it
    # (conv is linear in per-input-channel and per-output-channel scaling).
    # od_weight: (K, Co, Ci, kh, kw) -> HWIO (K, kh, kw, Ci, Co)
    w_hwio = jnp.transpose(params["od_weight"], (0, 3, 4, 2, 1))
    agg_w = jnp.einsum("bk,khwio->bhwio", ker_att, w_hwio)       # kernel attention
    agg_w = agg_w * sp_att[:, :, :, None, None]                  # spatial attention
    agg_w = agg_w * ch_att[:, None, None, :, None]               # channel attention (input axis)
    agg_w = agg_w * fil_att[:, None, None, None, :]              # filter attention (output axis)
    w_dyn = agg_w.reshape(B, KH * KW * C, Co)

    # Static conv weight: OIHW -> HWIO -> (9*C, Co).
    w_sta = jnp.transpose(params["conv_w"], (2, 3, 1, 0)).reshape(KH * KW * C, Co)

    if Cop != Co:                                                # zero-pad output channels to 128 lanes
        w_dyn = jnp.pad(w_dyn, ((0, 0), (0, 0), (0, Cop - Co)))
        w_sta = jnp.pad(w_sta, ((0, 0), (0, Cop - Co)))
    w_dyn = w_dyn.astype(jnp.bfloat16)
    w_sta = w_sta.astype(jnp.bfloat16)

    # bf16 NHWC activations for the MXU path (single fused transpose+cast).
    x_nhwc = jnp.transpose(x_nchw, (0, 2, 3, 1)).astype(jnp.bfloat16)

    small = (C < 128) and (Co < 128)
    TB = B if (small and B <= 4) else 1                          # amortise per-grid-step overhead
    if B % TB != 0:
        TB = 1
    grid = (B // TB,)

    flops = 2 * B * H * W * (KH * KW * C) * (2 * Cop)
    bytes_accessed = (x_nhwc.size * 2
                      + (B + 1) * KH * KW * C * Cop * 2
                      + B * H * W * Cop * 4)
    cost = pl.CostEstimate(flops=flops, transcendentals=B * H * W * Cop,
                           bytes_accessed=bytes_accessed)

    # Rough per-step VMEM need (double-buffered blocks + pad scratch + f32 accs).
    blk_bytes = (TB * H * W * C * 2 + TB * KH * KW * C * 2 * Cop * 2 + TB * H * W * Cop * 4)
    est_vmem = 2 * blk_bytes + (H + 2) * (W + 2 * LPAD) * C * 2 \
        + 2 * H * W * Cop * 4 + H * W * KH * KW * C * 2
    cp_kwargs = dict(dimension_semantics=("parallel",))
    if est_vmem > 32 * 1024 * 1024:
        # TODO(synk): on v7x (64 MiB VMEM) tile H into row slabs instead of only
        # raising the scoped limit.
        cp_kwargs["vmem_limit_bytes"] = min(int(est_vmem * 1.25), 110 * 1024 * 1024)
    compiler_params = pltpu.CompilerParams(**cp_kwargs)

    out_shape = jax.ShapeDtypeStruct((B, H * W, Cop), x_nchw.dtype)
    scratch = [pltpu.VMEM((H + 2, W + 2 * LPAD, C), jnp.bfloat16)]   # in-kernel pad buffer

    if small:
        # Small Co: pre-concatenate [w_dyn | w_sta] in the wrapper so the kernel
        # runs ONE fused N=2*Cop matmul and never concatenates weights per step.
        w_cat = jnp.concatenate(
            [w_dyn, jnp.broadcast_to(w_sta[None], (B,) + w_sta.shape)], axis=-1)
        kernel = functools.partial(_od_small_kernel, H=H, W=W, KH=KH, KW=KW,
                                   Cop=Cop, TB=TB, LPAD=LPAD)
        out_flat = pl.pallas_call(
            kernel,
            out_shape=out_shape,
            grid_spec=pltpu.PrefetchScalarGridSpec(
                num_scalar_prefetch=0,
                grid=grid,
                in_specs=[
                    pl.BlockSpec((TB, H, W, C), lambda b: (b, 0, 0, 0)),        # unpadded input (bf16)
                    pl.BlockSpec((TB, KH * KW * C, 2 * Cop), lambda b: (b, 0, 0)),  # [dyn|static] weights
                ],
                out_specs=pl.BlockSpec((TB, H * W, Cop), lambda b: (b, 0, 0)),
                scratch_shapes=scratch),
            compiler_params=compiler_params,
            cost_estimate=cost,
        )(x_nhwc, w_cat)
    else:
        # Large C: 9-tap accumulating dots; static weight resident across the grid.
        kernel = functools.partial(_od_tap_kernel, H=H, W=W, KH=KH, KW=KW,
                                   Cop=Cop, TB=TB, LPAD=LPAD)
        out_flat = pl.pallas_call(
            kernel,
            out_shape=out_shape,
            grid_spec=pltpu.PrefetchScalarGridSpec(
                num_scalar_prefetch=0,
                grid=grid,
                in_specs=[
                    pl.BlockSpec((TB, H, W, C), lambda b: (b, 0, 0, 0)),
                    pl.BlockSpec((TB, KH * KW * C, Cop), lambda b: (b, 0, 0)),   # dyn weight (per batch)
                    pl.BlockSpec((KH * KW * C, Cop), lambda b: (0, 0)),          # static weight (resident)
                ],
                out_specs=pl.BlockSpec((TB, H * W, Cop), lambda b: (b, 0, 0)),
                scratch_shapes=scratch),
            compiler_params=compiler_params,
            cost_estimate=cost,
        )(x_nhwc, w_dyn, w_sta)

    out = out_flat[:, :, :Co] if Cop != Co else out_flat
    out = out.reshape(B, H, W, Co)
    return jnp.transpose(out, (0, 3, 1, 2))                      # back to NCHW


# -----------------------------------------------------------------------------
# Deterministic parameter init (mirrors the module's __init__ shapes).
# -----------------------------------------------------------------------------
def init_params(key, C, kernel_size=3, kernel_num=4, reduction=0.0625, min_channel=16):
    A = max(int(C * reduction), min_channel)
    ks = jax.random.split(key, 7)

    def kaiming(k, shape, fan_out):
        return np.sqrt(2.0 / fan_out).astype(np.float32) * jax.random.normal(k, shape, jnp.float32)

    kk = kernel_size * kernel_size
    return {
        "fc_w": kaiming(ks[0], (A, C), fan_out=A),                   # Conv2d(C, A, 1, bias=False)
        "bn_gamma": jnp.ones((A,), jnp.float32),
        "bn_beta": jnp.zeros((A,), jnp.float32),
        "bn_mean": jnp.zeros((A,), jnp.float32),
        "bn_var": jnp.ones((A,), jnp.float32),
        "channel_w": kaiming(ks[1], (C, A), fan_out=C),
        "channel_b": jnp.zeros((C,), jnp.float32),
        "filter_w": kaiming(ks[2], (C, A), fan_out=C),
        "filter_b": jnp.zeros((C,), jnp.float32),
        "spatial_w": kaiming(ks[3], (kk, A), fan_out=kk),
        "spatial_b": jnp.zeros((kk,), jnp.float32),
        "kernel_w": kaiming(ks[4], (kernel_num, A), fan_out=kernel_num),
        "kernel_b": jnp.zeros((kernel_num,), jnp.float32),
        "od_weight": kaiming(ks[5], (kernel_num, C, C, kernel_size, kernel_size),
                             fan_out=C * kk),
        "conv_w": kaiming(ks[6], (C, C, kernel_size, kernel_size), fan_out=C * kk),
    }


# -----------------------------------------------------------------------------
# Pure-JAX f32 reference (mirrors the PyTorch forward) for numerical verification.
# -----------------------------------------------------------------------------
def ref_forward(x, p, temperature=1.0):
    ch, fil, sp, ker = _attention_branch(x, p, temperature)
    agg = jnp.einsum("bk,koihw->boihw", ker, p["od_weight"])
    agg = agg * sp[:, None, None, :, :]                       # (B, Co, Ci, 3, 3)
    xs = x * ch[:, :, None, None]

    def conv_one(xb, wb):
        return lax.conv_general_dilated(
            xb[None], wb, (1, 1), ((1, 1), (1, 1)),
            dimension_numbers=("NCHW", "OIHW", "NCHW"),
            precision=lax.Precision.HIGHEST)[0]

    od = jax.vmap(conv_one)(xs, agg)                          # (B, Co, H, W)
    od = od * fil[:, :, None, None]
    out = lax.conv_general_dilated(
        x, p["conv_w"], (1, 1), ((1, 1), (1, 1)),
        dimension_numbers=("NCHW", "OIHW", "NCHW"),
        precision=lax.Precision.HIGHEST)
    gelu = 0.5 * od * (1.0 + lax.erf(od * 0.7071067811865476))
    return out * gelu


if __name__ == "__main__":
    key = jax.random.PRNGKey(0)
    kx, kp = jax.random.split(key)
    B, C, H, W = 2, 8, 16, 16
    x = jax.random.normal(kx, (B, C, H, W), jnp.float32)
    params = init_params(kp, C)

    out = jax.jit(lambda xx: od_attention_forward(xx, params))(x)
    out = jax.block_until_ready(out)

    ref = ref_forward(x, params)
    # Tolerance reflects bf16 activations/weights on the MXU path (f32 accumulation).
    np.testing.assert_allclose(np.asarray(out), np.asarray(ref), atol=2e-2, rtol=2e-2)
    print("KERNEL_OK")
</pallas_src>

<mosaic_0001>
module attributes {stable_mosaic.version = 11 : i64} {
  func.func @_od_small_kernel(%arg0: i32, %arg1: memref<2x16x16x8xbf16, #tpu.memory_space<vmem>>, %arg2: memref<2x72x256xbf16, #tpu.memory_space<vmem>>, %arg3: memref<2x256x128xf32, #tpu.memory_space<vmem>>, %arg4: memref<18x48x8xbf16, #tpu.memory_space<vmem>>) attributes {dimension_semantics = [#tpu.dimension_semantics<parallel>], iteration_bounds = array<i64: 1>, scalar_prefetch = 0 : i64, scratch_operands = 1 : i64, tpu.core_type = #tpu.core_type<tc>, window_params = [{transform_indices = @transform_0, window_bounds = array<i64: 2, 16, 16, 8>}, {transform_indices = @transform_1, window_bounds = array<i64: 2, 72, 256>}, {transform_indices = @transform_2, window_bounds = array<i64: 2, 256, 128>}]} {
    %cst = arith.constant 0.000000e+00 : bf16
    %0 = vector.broadcast %cst : bf16 to vector<18x48x8xbf16>
    %c0 = arith.constant 0 : index
    %c0_0 = arith.constant 0 : index
    %c0_1 = arith.constant 0 : index
    %1 = vector.load %arg4[%c0, %c0_0, %c0_1] : memref<18x48x8xbf16, #tpu.memory_space<vmem>>, vector<18x48x8xbf16>
    tpu.vector_store %arg4[%c0, %c0_0, %c0_1], %0 {strides = array<i32>} : memref<18x48x8xbf16, #tpu.memory_space<vmem>>, vector<18x48x8xbf16>,
    %c0_2 = arith.constant 0 : index
    %c0_3 = arith.constant 0 : index
    %c0_4 = arith.constant 0 : index
    %c0_5 = arith.constant 0 : index
    %2 = vector.load %arg1[%c0_2, %c0_3, %c0_4, %c0_5] : memref<2x16x16x8xbf16, #tpu.memory_space<vmem>>, vector<1x16x16x8xbf16>
    %3 = vector.shape_cast %2 : vector<1x16x16x8xbf16> to vector<16x16x8xbf16>
    %c1 = arith.constant 1 : index
    %c16 = arith.constant 16 : index
    %c0_6 = arith.constant 0 : index
    %4 = vector.load %arg4[%c1, %c16, %c0_6] : memref<18x48x8xbf16, #tpu.memory_space<vmem>>, vector<16x16x8xbf16>
    tpu.vector_store %arg4[%c1, %c16, %c0_6], %3 {strides = array<i32>} : memref<18x48x8xbf16, #tpu.memory_space<vmem>>, vector<16x16x8xbf16>,
    %c0_7 = arith.constant 0 : index
    %c15 = arith.constant 15 : index
    %c0_8 = arith.constant 0 : index
    %5 = vector.load %arg4[%c0_7, %c15, %c0_8] : memref<18x48x8xbf16, #tpu.memory_space<vmem>>, vector<16x16x8xbf16>
    %6 = vector.shape_cast %5 : vector<16x16x8xbf16> to vector<256x8xbf16>
    %c0_9 = arith.constant 0 : index
    %c16_10 = arith.constant 16 : index
    %c0_11 = arith.constant 0 : index
    %7 = vector.load %arg4[%c0_9, %c16_10, %c0_11] : memref<18x48x8xbf16, #tpu.memory_space<vmem>>, vector<16x16x8xbf16>
    %8 = vector.shape_cast %7 : vector<16x16x8xbf16> to vector<256x8xbf16>
    %c0_12 = arith.constant 0 : index
    %c17 = arith.constant 17 : index
    %c0_13 = arith.constant 0 : index
    %9 = vector.load %arg4[%c0_12, %c17, %c0_13] : memref<18x48x8xbf16, #tpu.memory_space<vmem>>, vector<16x16x8xbf16>
    %10 = vector.shape_cast %9 : vector<16x16x8xbf16> to vector<256x8xbf16>
    %c1_14 = arith.constant 1 : index
    %c15_15 = arith.constant 15 : index
    %c0_16 = arith.constant 0 : index
    %11 = vector.load %arg4[%c1_14, %c15_15, %c0_16] : memref<18x48x8xbf16, #tpu.memory_space<vmem>>, vector<16x16x8xbf16>
    %12 = vector.shape_cast %11 : vector<16x16x8xbf16> to vector<256x8xbf16>
    %c1_17 = arith.constant 1 : index
    %c16_18 = arith.constant 16 : index
    %c0_19 = arith.constant 0 : index
    %13 = vector.load %arg4[%c1_17, %c16_18, %c0_19] : memref<18x48x8xbf16, #tpu.memory_space<vmem>>, vector<16x16x8xbf16>
    %14 = vector.shape_cast %13 : vector<16x16x8xbf16> to vector<256x8xbf16>
    %c1_20 = arith.constant 1 : index
    %c17_21 = arith.constant 17 : index
    %c0_22 = arith.constant 0 : index
    %15 = vector.load %arg4[%c1_20, %c17_21, %c0_22] : memref<18x48x8xbf16, #tpu.memory_space<vmem>>, vector<16x16x8xbf16>
    %16 = vector.shape_cast %15 : vector<16x16x8xbf16> to vector<256x8xbf16>
    %c2 = arith.constant 2 : index
    %c15_23 = arith.constant 15 : index
    %c0_24 = arith.constant 0 : index
    %17 = vector.load %arg4[%c2, %c15_23, %c0_24] : memref<18x48x8xbf16, #tpu.memory_space<vmem>>, vector<16x16x8xbf16>
    %18 = vector.shape_cast %17 : vector<16x16x8xbf16> to vector<256x8xbf16>
    %c2_25 = arith.constant 2 : index
    %c16_26 = arith.constant 16 : index
    %c0_27 = arith.constant 0 : index
    %19 = vector.load %arg4[%c2_25, %c16_26, %c0_27] : memref<18x48x8xbf16, #tpu.memory_space<vmem>>, vector<16x16x8xbf16>
    %20 = vector.shape_cast %19 : vector<16x16x8xbf16> to vector<256x8xbf16>
    %c2_28 = arith.constant 2 : index
    %c17_29 = arith.constant 17 : index
    %c0_30 = arith.constant 0 : index
    %21 = vector.load %arg4[%c2_28, %c17_29, %c0_30] : memref<18x48x8xbf16, #tpu.memory_space<vmem>>, vector<16x16x8xbf16>
    %22 = vector.shape_cast %21 : vector<16x16x8xbf16> to vector<256x8xbf16>
    %23 = tpu.concatenate %6, %8, %10, %12, %14, %16, %18, %20, %22 in 1 : vector<256x8xbf16>, vector<256x8xbf16>, vector<256x8xbf16>, vector<256x8xbf16>, vector<256x8xbf16>, vector<256x8xbf16>, vector<256x8xbf16>, vector<256x8xbf16>, vector<256x8xbf16> -> vector<256x72xbf16>
    %c0_31 = arith.constant 0 : index
    %c0_32 = arith.constant 0 : index
    %c0_33 = arith.constant 0 : index
    %24 = vector.load %arg2[%c0_31, %c0_32, %c0_33] : memref<2x72x256xbf16, #tpu.memory_space<vmem>>, vector<1x72x256xbf16>
    %25 = vector.shape_cast %24 : vector<1x72x256xbf16> to vector<72x256xbf16>
    %cst_34 = arith.constant dense<0.000000e+00> : vector<256x256xf32>
    %26 = tpu.matmul %23, %25, %cst_34 {dimension_numbers = #tpu.dot_dimension_numbers<[1], [0], [0], [1], [0, 0, 1, 1], [], []>} : vector<256x72xbf16>, vector<72x256xbf16>, vector<256x256xf32> -> vector<256x256xf32>
    %27 = vector.extract_strided_slice %26 {offsets = [0, 0], sizes = [256, 128], strides = [1, 1]} : vector<256x256xf32> to vector<256x128xf32>
    %28 = vector.extract_strided_slice %26 {offsets = [0, 128], sizes = [256, 128], strides = [1, 1]} : vector<256x256xf32> to vector<256x128xf32>
    %cst_35 = arith.constant 5.000000e-01 : f32
    %29 = vector.broadcast %cst_35 : f32 to vector<256x128xf32>
    %30 = arith.mulf %29, %27 : vector<256x128xf32>
    %cst_36 = arith.constant 0.707106769 : f32
    %31 = vector.broadcast %cst_36 : f32 to vector<256x128xf32>
    %32 = arith.mulf %27, %31 : vector<256x128xf32>
    %33 = math.erf %32 : vector<256x128xf32>
    %cst_37 = arith.constant 1.000000e+00 : f32
    %34 = vector.broadcast %cst_37 : f32 to vector<256x128xf32>
    %35 = arith.addf %34, %33 : vector<256x128xf32>
    %36 = arith.mulf %30, %35 : vector<256x128xf32>
    %37 = arith.mulf %28, %36 : vector<256x128xf32>
    %c0_38 = arith.constant 0 : index
    %c0_39 = arith.constant 0 : index
    %c0_40 = arith.constant 0 : index
    %38 = vector.load %arg3[%c0_38, %c0_39, %c0_40] : memref<2x256x128xf32, #tpu.memory_space<vmem>>, vector<1x256x128xf32>
    %39 = vector.shape_cast %38 : vector<1x256x128xf32> to vector<256x128xf32>
    %40 = vector.shape_cast %37 : vector<256x128xf32> to vector<1x256x128xf32>
    tpu.vector_store %arg3[%c0_38, %c0_39, %c0_40], %40 {strides = array<i32>} : memref<2x256x128xf32, #tpu.memory_space<vmem>>, vector<1x256x128xf32>,
    %cst_41 = arith.constant 0.000000e+00 : bf16
    %41 = vector.broadcast %cst_41 : bf16 to vector<18x48x8xbf16>
    %c0_42 = arith.constant 0 : index
    %c0_43 = arith.constant 0 : index
    %c0_44 = arith.constant 0 : index
    %42 = vector.load %arg4[%c0_42, %c0_43, %c0_44] : memref<18x48x8xbf16, #tpu.memory_space<vmem>>, vector<18x48x8xbf16>
    tpu.vector_store %arg4[%c0_42, %c0_43, %c0_44], %41 {strides = array<i32>} : memref<18x48x8xbf16, #tpu.memory_space<vmem>>, vector<18x48x8xbf16>,
    %c1_45 = arith.constant 1 : index
    %c0_46 = arith.constant 0 : index
    %c0_47 = arith.constant 0 : index
    %c0_48 = arith.constant 0 : index
    %43 = vector.load %arg1[%c1_45, %c0_46, %c0_47, %c0_48] : memref<2x16x16x8xbf16, #tpu.memory_space<vmem>>, vector<1x16x16x8xbf16>
    %44 = vector.shape_cast %43 : vector<1x16x16x8xbf16> to vector<16x16x8xbf16>
    %c1_49 = arith.constant 1 : index
    %c16_50 = arith.constant 16 : index
    %c0_51 = arith.constant 0 : index
    %45 = vector.load %arg4[%c1_49, %c16_50, %c0_51] : memref<18x48x8xbf16, #tpu.memory_space<vmem>>, vector<16x16x8xbf16>
    tpu.vector_store %arg4[%c1_49, %c16_50, %c0_51], %44 {strides = array<i32>} : memref<18x48x8xbf16, #tpu.memory_space<vmem>>, vector<16x16x8xbf16>,
    %c0_52 = arith.constant 0 : index
    %c15_53 = arith.constant 15 : index
    %c0_54 = arith.constant 0 : index
    %46 = vector.load %arg4[%c0_52, %c15_53, %c0_54] : memref<18x48x8xbf16, #tpu.memory_space<vmem>>, vector<16x16x8xbf16>
    %47 = vector.shape_cast %46 : vector<16x16x8xbf16> to vector<256x8xbf16>
    %c0_55 = arith.constant 0 : index
    %c16_56 = arith.constant 16 : index
    %c0_57 = arith.constant 0 : index
    %48 = vector.load %arg4[%c0_55, %c16_56, %c0_57] : memref<18x48x8xbf16, #tpu.memory_space<vmem>>, vector<16x16x8xbf16>
    %49 = vector.shape_cast %48 : vector<16x16x8xbf16> to vector<256x8xbf16>
    %c0_58 = arith.constant 0 : index
    %c17_59 = arith.constant 17 : index
    %c0_60 = arith.constant 0 : index
    %50 = vector.load %arg4[%c0_58, %c17_59, %c0_60] : memref<18x48x8xbf16, #tpu.memory_space<vmem>>, vector<16x16x8xbf16>
    %51 = vector.shape_cast %50 : vector<16x16x8xbf16> to vector<256x8xbf16>
    %c1_61 = arith.constant 1 : index
    %c15_62 = arith.constant 15 : index
    %c0_63 = arith.constant 0 : index
    %52 = vector.load %arg4[%c1_61, %c15_62, %c0_63] : memref<18x48x8xbf16, #tpu.memory_space<vmem>>, vector<16x16x8xbf16>
    %53 = vector.shape_cast %52 : vector<16x16x8xbf16> to vector<256x8xbf16>
    %c1_64 = arith.constant 1 : index
    %c16_65 = arith.constant 16 : index
    %c0_66 = arith.constant 0 : index
    %54 = vector.load %arg4[%c1_64, %c16_65, %c0_66] : memref<18x48x8xbf16, #tpu.memory_space<vmem>>, vector<16x16x8xbf16>
    %55 = vector.shape_cast %54 : vector<16x16x8xbf16> to vector<256x8xbf16>
    %c1_67 = arith.constant 1 : index
    %c17_68 = arith.constant 17 : index
    %c0_69 = arith.constant 0 : index
    %56 = vector.load %arg4[%c1_67, %c17_68, %c0_69] : memref<18x48x8xbf16, #tpu.memory_space<vmem>>, vector<16x16x8xbf16>
    %57 = vector.shape_cast %56 : vector<16x16x8xbf16> to vector<256x8xbf16>
    %c2_70 = arith.constant 2 : index
    %c15_71 = arith.constant 15 : index
    %c0_72 = arith.constant 0 : index
    %58 = vector.load %arg4[%c2_70, %c15_71, %c0_72] : memref<18x48x8xbf16, #tpu.memory_space<vmem>>, vector<16x16x8xbf16>
    %59 = vector.shape_cast %58 : vector<16x16x8xbf16> to vector<256x8xbf16>
    %c2_73 = arith.constant 2 : index
    %c16_74 = arith.constant 16 : index
    %c0_75 = arith.constant 0 : index
    %60 = vector.load %arg4[%c2_73, %c16_74, %c0_75] : memref<18x48x8xbf16, #tpu.memory_space<vmem>>, vector<16x16x8xbf16>
    %61 = vector.shape_cast %60 : vector<16x16x8xbf16> to vector<256x8xbf16>
    %c2_76 = arith.constant 2 : index
    %c17_77 = arith.constant 17 : index
    %c0_78 = arith.constant 0 : index
    %62 = vector.load %arg4[%c2_76, %c17_77, %c0_78] : memref<18x48x8xbf16, #tpu.memory_space<vmem>>, vector<16x16x8xbf16>
    %63 = vector.shape_cast %62 : vector<16x16x8xbf16> to vector<256x8xbf16>
    %64 = tpu.concatenate %47, %49, %51, %53, %55, %57, %59, %61, %63 in 1 : vector<256x8xbf16>, vector<256x8xbf16>, vector<256x8xbf16>, vector<256x8xbf16>, vector<256x8xbf16>, vector<256x8xbf16>, vector<256x8xbf16>, vector<256x8xbf16>, vector<256x8xbf16> -> vector<256x72xbf16>
    %c1_79 = arith.constant 1 : index
    %c0_80 = arith.constant 0 : index
    %c0_81 = arith.constant 0 : index
    %65 = vector.load %arg2[%c1_79, %c0_80, %c0_81] : memref<2x72x256xbf16, #tpu.memory_space<vmem>>, vector<1x72x256xbf16>
    %66 = vector.shape_cast %65 : vector<1x72x256xbf16> to vector<72x256xbf16>
    %cst_82 = arith.constant dense<0.000000e+00> : vector<256x256xf32>
    %67 = tpu.matmul %64, %66, %cst_82 {dimension_numbers = #tpu.dot_dimension_numbers<[1], [0], [0], [1], [0, 0, 1, 1], [], []>} : vector<256x72xbf16>, vector<72x256xbf16>, vector<256x256xf32> -> vector<256x256xf32>
    %68 = vector.extract_strided_slice %67 {offsets = [0, 0], sizes = [256, 128], strides = [1, 1]} : vector<256x256xf32> to vector<256x128xf32>
    %69 = vector.extract_strided_slice %67 {offsets = [0, 128], sizes = [256, 128], strides = [1, 1]} : vector<256x256xf32> to vector<256x128xf32>
    %cst_83 = arith.constant 5.000000e-01 : f32
    %70 = vector.broadcast %cst_83 : f32 to vector<256x128xf32>
    %71 = arith.mulf %70, %68 : vector<256x128xf32>
    %cst_84 = arith.constant 0.707106769 : f32
    %72 = vector.broadcast %cst_84 : f32 to vector<256x128xf32>
    %73 = arith.mulf %68, %72 : vector<256x128xf32>
    %74 = math.erf %73 : vector<256x128xf32>
    %cst_85 = arith.constant 1.000000e+00 : f32
    %75 = vector.broadcast %cst_85 : f32 to vector<256x128xf32>
    %76 = arith.addf %75, %74 : vector<256x128xf32>
    %77 = arith.mulf %71, %76 : vector<256x128xf32>
    %78 = arith.mulf %69, %77 : vector<256x128xf32>
    %c1_86 = arith.constant 1 : index
    %c0_87 = arith.constant 0 : index
    %c0_88 = arith.constant 0 : index
    %79 = vector.load %arg3[%c1_86, %c0_87, %c0_88] : memref<2x256x128xf32, #tpu.memory_space<vmem>>, vector<1x256x128xf32>
    %80 = vector.shape_cast %79 : vector<1x256x128xf32> to vector<256x128xf32>
    %81 = vector.shape_cast %78 : vector<256x128xf32> to vector<1x256x128xf32>
    tpu.vector_store %arg3[%c1_86, %c0_87, %c0_88], %81 {strides = array<i32>} : memref<2x256x128xf32, #tpu.memory_space<vmem>>, vector<1x256x128xf32>,
    return
  }
  func.func @transform_0(%arg0: i32) -> (i32, i32, i32, i32) {
    %c0_i32 = arith.constant 0 : i32
    %c0_i32_0 = arith.constant 0 : i32
    %c0_i32_1 = arith.constant 0 : i32
    %c0_i32_2 = arith.constant 0 : i32
    return %arg0, %c0_i32, %c0_i32_0, %c0_i32_1 : i32, i32, i32, i32
  }
  func.func @transform_1(%arg0: i32) -> (i32, i32, i32) {
    %c0_i32 = arith.constant 0 : i32
    %c0_i32_0 = arith.constant 0 : i32
    %c0_i32_1 = arith.constant 0 : i32
    return %arg0, %c0_i32, %c0_i32_0 : i32, i32, i32
  }
  func.func @transform_2(%arg0: i32) -> (i32, i32, i32) {
    %c0_i32 = arith.constant 0 : i32
    %c0_i32_0 = arith.constant 0 : i32
    %c0_i32_1 = arith.constant 0 : i32
    return %arg0, %c0_i32, %c0_i32_0 : i32, i32, i32
  }
}

</mosaic_0001>

<bundles_post_ra>
// kernel: mul.13
= control target key start
LH: loop header
LB: loop body
LE: loop exit
PB: predicated region body
PF: predicated region fallthrough
CT: control target
= control target key end

     0   :  { %vm7_vm0 = vcmask 23552   ;;  %s36_s8 = smov 122   ;;  %s56_s0 = inlined_call_operand.vmem [shape: f32[2,9], index: 0, kind: input, shape index: {}]   ;;  %s57_s1 = inlined_call_operand.vmem [shape: f32[2,3,3], index: 1, kind: output, shape index: {}]  }
   0x1   :  { %v4_v0 = vld [vmem:[%s56_s0] sm:$0x3]  ;;  %s35_s0 = smov 125  }
   0x2   :  { %5 = vst [vmem:[#allocation1] sm:$0x3] %v4_v0 }
   0x9   :  { %v9_v1 = vld [vmem:[#allocation1] sm:$0x3]  }
   0xa   :  { %v6_v2 = vld [vmem:[#allocation1] sm:$0x3]   ;;  %10 = vrot.lane.b32.xlu0 %v9_v1, %s35_s0 }
   0xb   :  { %8 = vst.msk [vmem:[#allocation0] ss:$8 sm:$0x3] %vm7_vm0, %v6_v2   ;;  %v15_v3 = vld [vmem:[#allocation1] sm:$0x3]  }
   0xe   :  { %16 = vrot.lane.b32.xlu0 %v15_v3, %s36_s8 }
  0x7c   :  { %v11_v4 = vpop.permute.xlu0 %10  }
  0x7d   :  { %14 = vst.msk [vmem:[#allocation0 + $0x1] ss:$8 sm:$0x3] %vm7_vm0, %v11_v4  }
  0x80   :  { %v17_v5 = vpop.permute.xlu0 %16  }
  0x81   :  { %20 = vst.msk [vmem:[#allocation0 + $0x2] ss:$8 sm:$0x3] %vm7_vm0, %v17_v5  }
  0x88   :  { %v24_v6 = vld [vmem:[#allocation0] sm:$0xf]  ;;  %v28_v7 = vld [vmem:[#allocation0 + $0x8] sm:$0xf] }
  0x89   :  { %26 = vst [vmem:[%s57_s1] sm:$0xf] %v24_v6  ;;  %32 = vst [vmem:[%s57_s1 + $0x4] sm:$0xf] %v28_v7 }

// kernel: _lambda_.1
= control target key start
LH: loop header
LB: loop body
LE: loop exit
PB: predicated region body
PF: predicated region fallthrough
CT: control target
= control target key end

     0   :  { %vm12_vm0 = vcmask 64512   ;;  %v7644_v0 = vmov 0   ;;  %s5066_s23 = smov 8   ;;  %vm453_vm1 = vsmask.f32 7424  ;;  %s5067_s29 = smov 16   ;;  %s7616_s0 = inlined_call_operand.vmem [shape: bf16[2,16,16,8], index: 0, kind: input, shape index: {}]   ;;  %s7617_s1 = inlined_call_operand.vmem [shape: bf16[2,72,256], index: 1, kind: input, shape index: {}]   ;;  %s7618_s2 = inlined_call_operand.vmem [shape: f32[2,256,128], index: 2, kind: output, shape index: {}]  }
   0x1   :  { %14 = vst.msk [vmem:[#allocation2 + $0x8] sm:$0xff] %vm12_vm0, %v7644_v0  ;;  %13 = vst.msk [vmem:[#allocation2] sm:$0xff] %vm12_vm0, %v7644_v0  ;;  %v4879_v1 = vld [vmem:[%s7616_s0 + $0x8] sm:$0xff]   ;;  %1980 = vmatprep.mubr.bf16.mxu0 %v7644_v0  ;;  %4321 = vmatprep.mubr.bf16.mxu1 %v7644_v0  ;;  %v4880_v2 = vld [vmem:[%s7616_s0] sm:$0xff]   ;;  %vm244_vm2 = vsmask.f32 256 }
   0x2   :  { %15 = vst.msk [vmem:[#allocation2 + $0x10] sm:$0xff] %vm12_vm0, %v7644_v0  ;;  %16 = vst.msk [vmem:[#allocation2 + $0x18] sm:$0xff] %vm12_vm0, %v7644_v0  ;;  %v4882_v3 = vld [vmem:[%s7616_s0 + $0x10] sm:$0xff]   ;;  %v4883_v4 = vld [vmem:[%s7616_s0 + $0x18] sm:$0xff]   ;;  %s5068_s16 = smov 24   ;;  %s5069_s28 = smov 32  }
   0x3   :  { %17 = vst.msk [vmem:[#allocation2 + $0x20] sm:$0xff] %vm12_vm0, %v7644_v0  ;;  %18 = vst.msk [vmem:[#allocation2 + $0x28] sm:$0xff] %vm12_vm0, %v7644_v0  ;;  %v4884_v5 = vld [vmem:[%s7616_s0 + $0x20] sm:$0xff]   ;;  %v4885_v7 = vld [vmem:[%s7616_s0 + $0x28] sm:$0xff]   ;;  %s5070_s6 = smov 40   ;;  %s5071_s15 = smov 48  }
   0x4   :  { %19 = vst.msk [vmem:[#allocation2 + $0x30] sm:$0xff] %vm12_vm0, %v7644_v0  ;;  %20 = vst.msk [vmem:[#allocation2 + $0x38] sm:$0xff] %vm12_vm0, %v7644_v0  ;;  %v4881_v6 = vld [vmem:[%s7616_s0 + $0x80] sm:$0xff]   ;;  %v4886_v10 = vld [vmem:[%s7616_s0 + $0x30] sm:$0xff]   ;;  %s5072_s24 = smov 56   ;;  %s5073_s3 = smov 64  }
   0x5   :  { %21 = vst.msk [vmem:[#allocation2 + $0x40] sm:$0xff] %vm12_vm0, %v7644_v0  ;;  %22 = vst.msk [vmem:[#allocation2 + $0x48] sm:$0xff] %vm12_vm0, %v7644_v0  ;;  %v4887_v11 = vld [vmem:[%s7616_s0 + $0x38] sm:$0xff]   ;;  %v4888_v16 = vld [vmem:[%s7616_s0 + $0x40] sm:$0xff]   ;;  %vm1941_vm3 = vcmask 1043456   ;;  %vm1623_vm4 = vcmask 130048  }
   0x6   :  { %23 = vst.msk [vmem:[#allocation2 + $0x50] sm:$0xff] %vm12_vm0, %v7644_v0  ;;  %24 = vst.msk [vmem:[#allocation2 + $0x58] sm:$0xff] %vm12_vm0, %v7644_v0  ;;  %v4889_v17 = vld [vmem:[%s7616_s0 + $0x48] sm:$0xff]   ;;  %v4890_v25 = vld [vmem:[%s7616_s0 + $0x50] sm:$0xff]   ;;  %vm1656_vm5 = vcmask 195584   ;;  %vm1689_vm6 = vcmask 261120  }
   0x7   :  { %25 = vst.msk [vmem:[#allocation2 + $0x60] sm:$0xff] %vm12_vm0, %v7644_v0  ;;  %26 = vst.msk [vmem:[#allocation2 + $0x68] sm:$0xff] %vm12_vm0, %v7644_v0  ;;  %v4891_v30 = vld [vmem:[%s7616_s0 + $0x58] sm:$0xff]   ;;  %v4892_v35 = vld [vmem:[%s7616_s0 + $0x60] sm:$0xff]   ;;  %vm1722_vm7 = vcmask 326656   ;;  %vm1755_vm8 = vcmask 392192  }
   0x8   :  { %27 = vst.msk [vmem:[#allocation2 + $0x70] sm:$0xff] %vm12_vm0, %v7644_v0  ;;  %28 = vst.msk [vmem:[#allocation2 + $0x78] sm:$0xff] %vm12_vm0, %v7644_v0  ;;  %v5224_v8 = vld [vmem:[#allocation2 + $0x8] sm:$0xff]  ;;  %v4894_v37 = vld [vmem:[%s7616_s0 + $0x70] sm:$0xff]   ;;  %vm1788_vm9 = vcmask 457728   ;;  %vm1821_vm10 = vcmask 523264  }
   0x9   :  { %29 = vst.msk [vmem:[#allocation2 + $0x80] sm:$0xff] %vm12_vm0, %v7644_v0  ;;  %30 = vst.msk [vmem:[#allocation2 + $0x88] sm:$0xff] %vm12_vm0, %v7644_v0  ;;  %1287 = vrot.lane.b32.xlu0 %v5224_v8, %s5066_s23  ;;  %v250_v9 = vshrl.u32 %v5224_v8, 16  ;;  %v253_v14 = vshll.u32 %v5224_v8, 16  ;;  %v4893_v36 = vld [vmem:[%s7616_s0 + $0x68] sm:$0xff]   ;;  %v4896_v44 = vld [vmem:[%s7616_s0 + $0xb0] sm:$0xff]  }
   0xa   :  { %31 = vst.msk [vmem:[#allocation2 + $0x90] sm:$0xff] %vm12_vm0, %v7644_v0  ;;  %32 = vst.msk [vmem:[#allocation2 + $0x98] sm:$0xff] %vm12_vm0, %v7644_v0  ;;  %v437_v40 = vld [vmem:[#allocation2 + $0x10] sm:$0x1]  ;;  %v4895_v42 = vld [vmem:[%s7616_s0 + $0xa8] sm:$0xff]   ;;  %vm1908_vm11 = vcmask 588800  }
   0xb   :  { %33 = vst.msk [vmem:[#allocation2 + $0xa0] sm:$0xff] %vm12_vm0, %v7644_v0  ;;  %34 = vst.msk [vmem:[#allocation2 + $0xa8] sm:$0xff] %vm12_vm0, %v7644_v0  ;;  %v252_v13 = vrot.slane %v250_v9, 7  ;;  %v438_v48 = vld [vmem:[#allocation2 + $0x28] sm:$0x1]  ;;  %v4897_v49 = vld [vmem:[%s7616_s0 + $0xb8] sm:$0xff]  }
   0xc   :  { %35 = vst.msk [vmem:[#allocation2 + $0xb0] sm:$0xff] %vm12_vm0, %v7644_v0  ;;  %36 = vst.msk [vmem:[#allocation2 + $0xb8] sm:$0xff] %vm12_vm0, %v7644_v0  ;;  %v454_v50 = vrot.slane %v253_v14, 1  ;;  %v457_v51 = vshll.u32 %v437_v40, 16  ;;  %v439_v52 = vld [vmem:[#allocation2 + $0x40] sm:$0x1] }
   0xd   :  { %37 = vst.msk [vmem:[#allocation2 + $0xc0] sm:$0xff] %vm12_vm0, %v7644_v0  ;;  %38 = vst.msk [vmem:[#allocation2 + $0xc8] sm:$0xff] %vm12_vm0, %v7644_v0  ;;  %v5268_v20 = vor.u32 %v253_v14, %v252_v13  ;;  %v4898_v53 = vld [vmem:[%s7616_s0 + $0xc0] sm:$0xff]   ;;  %v464_v57 = vshll.u32 %v438_v48, 16  ;;  %v471_v61 = vshll.u32 %v439_v52, 16  ;;  %v4900_v8 = vld [vmem:[%s7616_s0 + $0xd0] sm:$0xff]  }
   0xe   :  { %39 = vst.msk [vmem:[#allocation2 + $0xd0] sm:$0xff] %vm12_vm0, %v7644_v0  ;;  %40 = vst.msk [vmem:[#allocation2 + $0xd8] sm:$0xff] %vm12_vm0, %v7644_v0  ;;  %v440_v62 = vld [vmem:[#allocation2 + $0x58] sm:$0x1]  ;;  %v5439_v40 = vld [vmem:[#allocation2 + $0x18] sm:$0x80] }
   0xf   :  { %41 = vst.msk [vmem:[#allocation2 + $0xe0] sm:$0xff] %vm12_vm0, %v7644_v0  ;;  %42 = vst.msk [vmem:[#allocation2 + $0xe8] sm:$0xff] %vm12_vm0, %v7644_v0  ;;  %v478_v14 = vshll.u32 %v440_v62, 16  ;;  %v4902_v62 = vld [vmem:[%s7616_s0 + $0xe0] sm:$0xff]  }
  0x10   :  { %43 = vst.msk [vmem:[#allocation2 + $0xf0] sm:$0xff] %vm12_vm0, %v7644_v0  ;;  %44 = vst.msk [vmem:[#allocation2 + $0xf8] sm:$0xff] %vm12_vm0, %v7644_v0 }
  0x11   :  { %45 = vst.msk [vmem:[#allocation2 + $0x100] sm:$0xff] %vm12_vm0, %v7644_v0  ;;  %46 = vst.msk [vmem:[#allocation2 + $0x108] sm:$0xff] %vm12_vm0, %v7644_v0  ;;  %v480_v52 = vrot.slane %v478_v14, 1 }
  0x12   :  { %47 = vst.msk [vmem:[#allocation2 + $0x110] sm:$0xff] %vm12_vm0, %v7644_v0  ;;  %48 = vst.msk [vmem:[#allocation2 + $0x118] sm:$0xff] %vm12_vm0, %v7644_v0 }
  0x13   :  { %49 = vst.msk [vmem:[#allocation2 + $0x120] sm:$0xff] %vm12_vm0, %v7644_v0  ;;  %50 = vst.msk [vmem:[#allocation2 + $0x128] sm:$0xff] %vm12_vm0, %v7644_v0 }
  0x14   :  { %51 = vst.msk [vmem:[#allocation2 + $0x130] sm:$0xff] %vm12_vm0, %v7644_v0  ;;  %52 = vst.msk [vmem:[#allocation2 + $0x138] sm:$0xff] %vm12_vm0, %v7644_v0 }
  0x15   :  { %53 = vst.msk [vmem:[#allocation2 + $0x140] sm:$0xff] %vm12_vm0, %v7644_v0  ;;  %54 = vst.msk [vmem:[#allocation2 + $0x148] sm:$0xff] %vm12_vm0, %v7644_v0 }
  0x16   :  { %55 = vst.msk [vmem:[#allocation2 + $0x150] sm:$0xff] %vm12_vm0, %v7644_v0  ;;  %56 = vst.msk [vmem:[#allocation2 + $0x158] sm:$0xff] %vm12_vm0, %v7644_v0 }
  0x17   :  { %57 = vst.msk [vmem:[#allocation2 + $0x160] sm:$0xff] %vm12_vm0, %v7644_v0  ;;  %58 = vst.msk [vmem:[#allocation2 + $0x168] sm:$0xff] %vm12_vm0, %v7644_v0 }
  0x18   :  { %59 = vst.msk [vmem:[#allocation2 + $0x170] sm:$0xff] %vm12_vm0, %v7644_v0  ;;  %60 = vst.msk [vmem:[#allocation2 + $0x178] sm:$0xff] %vm12_vm0, %v7644_v0 }
  0x19   :  { %61 = vst.msk [vmem:[#allocation2 + $0x180] sm:$0xff] %vm12_vm0, %v7644_v0  ;;  %62 = vst.msk [vmem:[#allocation2 + $0x188] sm:$0xff] %vm12_vm0, %v7644_v0 }
  0x1a   :  { %63 = vst.msk [vmem:[#allocation2 + $0x190] sm:$0xff] %vm12_vm0, %v7644_v0  ;;  %64 = vst.msk [vmem:[#allocation2 + $0x198] sm:$0xff] %vm12_vm0, %v7644_v0 }
  0x1b   :  { %65 = vst.msk [vmem:[#allocation2 + $0x1a0] sm:$0xff] %vm12_vm0, %v7644_v0  ;;  %66 = vst.msk [vmem:[#allocation2 + $0x1a8] sm:$0xff] %vm12_vm0, %v7644_v0 }
  0x1c   :  { %197 = vst.msk [vmem:[#allocation2 + $0x38] sm:$0xff] %vm12_vm0, %v4879_v1  ;;  %196 = vst.msk [vmem:[#allocation2 + $0x20] sm:$0xff] %vm12_vm0, %v4880_v2  ;;  %v455_v1 = vor.u32 %v454_v50, %v250_v9  ;;  %v459_v2 = vrot.slane %v457_v51, 1 }
  0x1d   :  { %198 = vst.msk [vmem:[#allocation2 + $0x50] sm:$0xff] %vm12_vm0, %v4882_v3  ;;  %199 = vst.msk [vmem:[#allocation2 + $0x68] sm:$0xff] %vm12_vm0, %v4883_v4  ;;  %v4899_v4 = vld [vmem:[%s7616_s0 + $0xc8] sm:$0xff]  }
  0x1e   :  { %200 = vst.msk [vmem:[#allocation2 + $0x80] sm:$0xff] %vm12_vm0, %v4884_v5  ;;  %2366 = vst.msk [vmem:[#allocation2 + $0x8] sm:$0xff] %vm12_vm0, %v7644_v0 }
  0x1f   :  { %201 = vst.msk [vmem:[#allocation2 + $0x98] sm:$0xff] %vm12_vm0, %v4885_v7  ;;  %202 = vst.msk [vmem:[#allocation2 + $0xb0] sm:$0xff] %vm12_vm0, %v4886_v10  ;;  %v441_v10 = vld [vmem:[#allocation2 + $0x70] sm:$0x1] }
  0x20   :  { %203 = vst.msk [vmem:[#allocation2 + $0xc8] sm:$0xff] %vm12_vm0, %v4887_v11  ;;  %204 = vst.msk [vmem:[#allocation2 + $0xe0] sm:$0xff] %vm12_vm0, %v4888_v16  ;;  %v466_v11 = vrot.slane %v464_v57, 1  ;;  %v442_v16 = vld [vmem:[#allocation2 + $0x88] sm:$0x1] }
  0x21   :  { %205 = vst.msk [vmem:[#allocation2 + $0xf8] sm:$0xff] %vm12_vm0, %v4889_v17  ;;  %206 = vst.msk [vmem:[#allocation2 + $0x110] sm:$0xff] %vm12_vm0, %v4890_v25  ;;  %v4901_v17 = vld [vmem:[%s7616_s0 + $0xd8] sm:$0xff]   ;;  %v492_v48 = vshll.u32 %v442_v16, 16 }
  0x22   :  { %207 = vst.msk [vmem:[#allocation2 + $0x128] sm:$0xff] %vm12_vm0, %v4891_v30  ;;  %208 = vst.msk [vmem:[#allocation2 + $0x140] sm:$0xff] %vm12_vm0, %v4892_v35 }
  0x23   :  { %v5239_v12 = vld [vmem:[#allocation2 + $0x38] sm:$0xff]  ;;  %v5246_v15 = vld [vmem:[#allocation2 + $0x20] sm:$0xff]  ;;  %209 = vst.msk [vmem:[#allocation2 + $0x158] sm:$0xff] %vm12_vm0, %v4893_v36  ;;  %210 = vst.msk [vmem:[#allocation2 + $0x170] sm:$0xff] %vm12_vm0, %v4894_v37  ;;  %v485_v36 = vshll.u32 %v441_v10, 16 }
  0x24   :  { %1291 = vrot.lane.b32.xlu1 %v5239_v12, %s5066_s23  ;;  %2372 = vst.msk [vmem:[#allocation2 + $0x38] sm:$0xff] %vm12_vm0, %v7644_v0  ;;  %2369 = vst.msk [vmem:[#allocation2 + $0x20] sm:$0xff] %vm12_vm0, %v7644_v0  ;;  %v274_v18 = vshrl.u32 %v5239_v12, 16  ;;  %1289 = vrot.lane.b32.xlu0 %v5246_v15, %s5066_s23  ;;  %v5264_v19 = vld [vmem:[#allocation2 + $0x50] sm:$0xff]  ;;  %v262_v21 = vshrl.u32 %v5246_v15, 16  ;;  %v5271_v22 = vld [vmem:[#allocation2 + $0x68] sm:$0xff] }
  0x25   :  { %2548 = vst.msk [vmem:[#allocation2 + $0x20] sm:$0xff] %vm12_vm0, %v4881_v6  ;;  %v277_v24 = vshll.u32 %v5239_v12, 16  ;;  %v265_v27 = vshll.u32 %v5246_v15, 16  ;;  %v5286_v28 = vld [vmem:[#allocation2 + $0x80] sm:$0xff]  ;;  %2367 = vst.msk [vmem:[#allocation2 + $0x10] sm:$0xff] %vm12_vm0, %v7644_v0  ;;  %v286_v54 = vshrl.u32 %v5264_v19, 16 }
  0x26   :  { %v276_v23 = vrot.slane %v274_v18, 7  ;;  %v264_v26 = vrot.slane %v262_v21, 7  ;;  %v5288_v29 = vld [vmem:[#allocation2 + $0x98] sm:$0xff]  ;;  %v5302_v32 = vld [vmem:[#allocation2 + $0xb0] sm:$0xff]  ;;  %v289_v55 = vshll.u32 %v5264_v19, 16  ;;  %v298_v59 = vshrl.u32 %v5271_v22, 16 }
  0x27   :  { %2384 = vst.msk [vmem:[#allocation2 + $0x98] sm:$0xff] %vm12_vm0, %v7644_v0  ;;  %v5304_v33 = vld [vmem:[#allocation2 + $0xc8] sm:$0xff]  ;;  %2387 = vst.msk [vmem:[#allocation2 + $0xb0] sm:$0xff] %vm12_vm0, %v7644_v0  ;;  %v5326_v38 = vld [vmem:[#allocation2 + $0xe0] sm:$0xff]  ;;  %v461_v56 = vrot.slane %v265_v27, 1  ;;  %v5389_v58 = vrot.slane %v286_v54, 7 }
  0x28   :  { %1293 = vrot.lane.b32.xlu1 %v5264_v19, %s5066_s23  ;;  %1295 = vrot.lane.b32.xlu0 %v5271_v22, %s5066_s23  ;;  %v5300_v31 = vor.u32 %v277_v24, %v276_v23  ;;  %v5306_v34 = vor.u32 %v265_v27, %v264_v26  ;;  %2390 = vst.msk [vmem:[#allocation2 + $0xc8] sm:$0xff] %vm12_vm0, %v7644_v0  ;;  %7691 = vst [vmem:[#allocation3_spill] sm:$0xff] %v5326_v38  ;;  %v5328_v39 = vld [vmem:[#allocation2 + $0xf8] sm:$0xff]  ;;  %v5339_v41 = vld [vmem:[#allocation2 + $0x110] sm:$0xff]  ;;  %v7633_v60 = vshll.u32 %v5271_v22, 16 }
  0x29   :  { %7692 = vst [vmem:[#allocation4_spill] sm:$0xff] %v5328_v39  ;;  %2393 = vst.msk [vmem:[#allocation2 + $0xe0] sm:$0xff] %vm12_vm0, %v7644_v0  ;;  %v5350_v43 = vld [vmem:[#allocation2 + $0x128] sm:$0xff]  ;;  %v5360_v45 = vld [vmem:[#allocation2 + $0x140] sm:$0xff]  ;;  %v310_v63 = vshrl.u32 %v5286_v28, 16  ;;  %v468_v3 = vrot.slane %v277_v24, 1  ;;  %v5414_v9 = vor.u32 %v461_v56, %v262_v21  ;;  %v460_v27 = vsel %vm453_vm1, %v455_v1, %v459_v2 }
  0x2a   :  { %2396 = vst.msk [vmem:[#allocation2 + $0xf8] sm:$0xff] %vm12_vm0, %v7644_v0  ;;  %7693 = vst [vmem:[#allocation5_spill] sm:$0xff] %v5339_v41  ;;  %v5362_v46 = vld [vmem:[#allocation2 + $0x158] sm:$0xff]  ;;  %v5367_v47 = vld [vmem:[#allocation2 + $0x170] sm:$0xff]  ;;  %v5403_v5 = vrot.slane %v298_v59, 7  ;;  %v7627_v6 = vshll.u32 %v5286_v28, 16 }
  0x2b   :  { %2399 = vst.msk [vmem:[#allocation2 + $0x110] sm:$0xff] %vm12_vm0, %v7644_v0  ;;  %7694 = vst [vmem:[#allocation6_spill] sm:$0xff] %v5350_v43  ;;  %v322_v7 = vshrl.u32 %v5288_v29, 16  ;;  %v475_v13 = vrot.slane %v289_v55, 1  ;;  %v5422_v23 = vrot.slane %v310_v63, 7  ;;  %v7624_v25 = vshll.u32 %v5288_v29, 16 }
  0x2c   :  { %1297 = vrot.lane.b32.xlu1 %v5286_v28, %s5066_s23  ;;  %1299 = vrot.lane.b32.xlu0 %v5288_v29, %s5066_s23  ;;  %2553 = vst.msk [vmem:[#allocation2 + $0x98] sm:$0xff] %vm12_vm0, %v4895_v42  ;;  %2402 = vst.msk [vmem:[#allocation2 + $0x128] sm:$0xff] %vm12_vm0, %v7644_v0  ;;  %v473_v21 = vrot.slane %v471_v61, 1  ;;  %v5429_v26 = vld [vmem:[#allocation2 + $0x18] sm:$0x80]  ;;  %v5435_v30 = vor.u32 %v468_v3, %v274_v18  ;;  %v482_v35 = vrot.slane %v7633_v60, 1 }
  0x2d   :  { %7695 = vst [vmem:[#allocation7_spill] sm:$0xff] %v5360_v45  ;;  %7696 = vst [vmem:[#allocation8_spill] sm:$0xff] %v5362_v46  ;;  %v5424_v24 = vrot.slane %v322_v7, 7  ;;  %v443_v37 = vld [vmem:[#allocation2 + $0xa0] sm:$0x1]  ;;  %v334_v42 = vshrl.u32 %v5302_v32, 16  ;;  %v467_v50 = vsel %vm453_vm1, %v5414_v9, %v466_v11  ;;  %v5453_v51 = vor.u32 %v475_v13, %v286_v54 }
  0x2e   :  { %2554 = vst.msk [vmem:[#allocation2 + $0xb0] sm:$0xff] %vm12_vm0, %v4896_v44  ;;  %7697 = vst [vmem:[#allocation9_spill] sm:$0xff] %v5367_v47  ;;  %v7621_v44 = vshll.u32 %v5302_v32, 16  ;;  %v489_v18 = vrot.slane %v7627_v6, 1  ;;  %v496_v56 = vrot.slane %v7624_v25, 1  ;;  %v499_v57 = vshll.u32 %v443_v37, 16 }
  0x2f   :  { %2405 = vst.msk [vmem:[#allocation2 + $0x140] sm:$0xff] %vm12_vm0, %v7644_v0  ;;  %2408 = vst.msk [vmem:[#allocation2 + $0x158] sm:$0xff] %vm12_vm0, %v7644_v0  ;;  %v444_v61 = vld [vmem:[#allocation2 + $0xb8] sm:$0x1]  ;;  %v7625_v1 = vshrl.u32 %v5326_v38, 16  ;;  %v474_v54 = vsel %vm453_vm1, %v5435_v30, %v473_v21  ;;  %v5465_v2 = vor.u32 %v482_v35, %v298_v59  ;;  %v487_v3 = vrot.slane %v485_v36, 1 }
  0x30   :  { %1301 = vrot.lane.b32.xlu1 %v5302_v32, %s5066_s23  ;;  %1303 = vrot.lane.b32.xlu0 %v5304_v33, %s5066_s23  ;;  %2411 = vst.msk [vmem:[#allocation2 + $0x170] sm:$0xff] %vm12_vm0, %v7644_v0  ;;  %2555 = vst.msk [vmem:[#allocation2 + $0xc8] sm:$0xff] %vm12_vm0, %v4897_v49  ;;  %v7634_v49 = vshrl.u32 %v5304_v33, 16  ;;  %v5469_v10 = vor.u32 %v489_v18, %v310_v63  ;;  %v445_v11 = vld [vmem:[#allocation2 + $0xd0] sm:$0x1]  ;;  %v7628_v13 = vshrl.u32 %v5328_v39, 16 }
  0x31   :  { %2556 = vst.msk [vmem:[#allocation2 + $0xe0] sm:$0xff] %vm12_vm0, %v4898_v53  ;;  %2557 = vst.msk [vmem:[#allocation2 + $0xf8] sm:$0xff] %vm12_vm0, %v4899_v4  ;;  %v7619_v53 = vshll.u32 %v5304_v33, 16  ;;  %v7620_v4 = vshll.u32 %v5326_v38, 16  ;;  %v481_v14 = vsel %vm453_vm1, %v5453_v51, %v480_v52  ;;  %v503_v59 = vrot.slane %v7621_v44, 1  ;;  %v4904_v37 = vld [vmem:[%s7616_s0 + $0xf0] sm:$0xff]  }
  0x32   :  { %2558 = vst.msk [vmem:[#allocation2 + $0x110] sm:$0xff] %vm12_vm0, %v4900_v8  ;;  %2559 = vst.msk [vmem:[#allocation2 + $0x128] sm:$0xff] %vm12_vm0, %v4901_v17  ;;  %v494_v8 = vrot.slane %v492_v48, 1  ;;  %v506_v16 = vshll.u32 %v444_v61, 16  ;;  %v4903_v17 = vld [vmem:[%s7616_s0 + $0xe8] sm:$0xff]   ;;  %v7622_v63 = vshll.u32 %v5328_v39, 16  ;;  %v5482_v21 = vor.u32 %v496_v56, %v322_v7 }
  0x33   :  { %2368 = vst.msk [vmem:[#allocation2 + $0x18] sm:$0xff] %vm12_vm0, %v7644_v0  ;;  %2560 = vst.msk [vmem:[#allocation2 + $0x140] sm:$0xff] %vm12_vm0, %v4902_v62  ;;  %v510_v35 = vrot.slane %v7619_v53, 1  ;;  %v446_v36 = vld [vmem:[#allocation2 + $0xe8] sm:$0x1]  ;;  %v7623_v18 = vshll.u32 %v5339_v41, 16  ;;  %v488_v48 = vsel %vm453_vm1, %v5465_v2, %v487_v3  ;;  %v5501_v62 = vor.u32 %v503_v59, %v334_v42 }
  0x34   :  { %1305 = vrot.lane.b32.xlu1 %v5326_v38, %s5066_s23  ;;  %1307 = vrot.lane.b32.xlu0 %v5328_v39, %s5066_s23  ;;  %7698 = vst [vmem:[#allocation10_spill] sm:$0xff] %v5482_v21  ;;  %2561 = vst.msk [vmem:[#allocation2 + $0x158] sm:$0xff] %vm12_vm0, %v4903_v17  ;;  %v7630_v7 = vshrl.u32 %v5339_v41, 16  ;;  %v7631_v52 = vshrl.u32 %v5350_v43, 16  ;;  %v495_v56 = vsel %vm453_vm1, %v5469_v10, %v494_v8  ;;  %v448_v61 = vld [vmem:[#allocation2 + $0x118] sm:$0x1] }
  0x35   :  { %2562 = vst.msk [vmem:[#allocation2 + $0x170] sm:$0xff] %vm12_vm0, %v4904_v37  ;;  %7699 = vst [vmem:[#allocation11_spill] sm:$0xff] %v5501_v62  ;;  %v517_v3 = vrot.slane %v7620_v4, 1  ;;  %v7626_v17 = vshll.u32 %v5350_v43, 16  ;;  %v5512_v37 = vor.u32 %v510_v35, %v7634_v49  ;;  %v449_v59 = vld [vmem:[#allocation2 + $0x130] sm:$0x1] }
  0x36   :  { %v5522_v44 = vld [vmem:[#allocation2 + $0x50] sm:$0xff]  ;;  %v7637_v35 = vshrl.u32 %v5360_v45, 16  ;;  %v451_v25 = vld [vmem:[#allocation2 + $0x160] sm:$0x1]  ;;  %v7639_v6 = vshrl.u32 %v5362_v46, 16 }
  0x37   :  { %7700 = vst [vmem:[#allocation12_spill] sm:$0xff] %v5512_v37  ;;  %2375 = vst.msk [vmem:[#allocation2 + $0x50] sm:$0xff] %vm12_vm0, %v7644_v0 }
  0x38   :  { %1309 = vrot.lane.b32.xlu1 %v5339_v41, %s5066_s23  ;;  %1311 = vrot.lane.b32.xlu0 %v5350_v43, %s5066_s23 }
  0x3c   :  { %1313 = vrot.lane.b32.xlu1 %v5360_v45, %s5066_s23  ;;  %1315 = vrot.lane.b32.xlu0 %v5362_v46, %s5066_s23 }
  0x40   :  { %1317 = vrot.lane.b32.xlu1 %v5367_v47, %s5066_s23  ;;  %1319 = vrot.lane.b32.xlu0 %v460_v27, %s5067_s29  ;;  %v501_v27 = vrot.slane %v499_v57, 1  ;;  %v447_v57 = vld [vmem:[#allocation2 + $0x100] sm:$0x1] }
  0x41   :  { %v527_v4 = vshll.u32 %v447_v57, 16  ;;  %v5529_v57 = vor.u32 %v517_v3, %v7625_v1 }
  0x42   :  { %v502_v8 = vsel %vm453_vm1, %v5482_v21, %v501_v27  ;;  %v534_v27 = vshll.u32 %v448_v61, 16  ;;  %v541_v61 = vshll.u32 %v449_v59, 16 }
  0x43   :  { %7701 = vst [vmem:[#allocation13_spill] sm:$0xff] %v5529_v57 }
  0x44   :  { %1321 = vrot.lane.b32.xlu1 %v467_v50, %s5067_s29  ;;  %1323 = vrot.lane.b32.xlu0 %v474_v54, %s5067_s29  ;;  %v513_v50 = vshll.u32 %v445_v11, 16  ;;  %v508_v54 = vrot.slane %v506_v16, 1  ;;  %v520_v11 = vshll.u32 %v446_v36, 16  ;;  %v524_v16 = vrot.slane %v7622_v63, 1 }
  0x45   :  { %v531_v36 = vrot.slane %v7623_v18, 1  ;;  %v450_v18 = vld [vmem:[#allocation2 + $0x148] sm:$0x1]  ;;  %v536_v1 = vrot.slane %v534_v27, 1 }
  0x46   :  { %v515_v53 = vrot.slane %v513_v50, 1  ;;  %v509_v50 = vsel %vm453_vm1, %v5501_v62, %v508_v54  ;;  %v522_v63 = vrot.slane %v520_v11, 1  ;;  %v7632_v54 = vshll.u32 %v5362_v46, 16  ;;  %v5560_v27 = vld [vmem:[#allocation2 + $0x8] sm:$0xff] }
  0x47   :  { %v5542_v11 = vor.u32 %v524_v16, %v7628_v13  ;;  %v452_v13 = vld [vmem:[#allocation2 + $0x178] sm:$0x1]  ;;  %v7638_v49 = vshll.u32 %v5560_v27, 16 }
  0x48   :  { %1325 = vrot.lane.b32.xlu1 %v481_v14, %s5067_s29  ;;  %v7629_v14 = vshll.u32 %v5360_v45, 16  ;;  %1327 = vrot.lane.b32.xlu0 %v488_v48, %s5067_s29  ;;  %v4905_v48 = vld [vmem:[%s7616_s0 + $0x88] sm:$0xff]   ;;  %v516_v3 = vsel %vm453_vm1, %v5512_v37, %v515_v53  ;;  %v7636_v53 = vshll.u32 %v5367_v47, 16  ;;  %v523_v16 = vsel %vm453_vm1, %v5529_v57, %v522_v63 }
  0x49   :  { %2549 = vst.msk [vmem:[#allocation2 + $0x38] sm:$0xff] %vm12_vm0, %v4905_v48  ;;  %7702 = vst [vmem:[#allocation14_spill] sm:$0xff] %v5542_v11  ;;  %v529_v48 = vrot.slane %v527_v4, 1  ;;  %v5605_v63 = vld [vmem:[#allocation2 + $0x68] sm:$0xff] }
  0x4a   :  { %v545_v59 = vrot.slane %v7629_v14, 1  ;;  %v555_v14 = vshll.u32 %v451_v25, 16  ;;  %v570_v25 = vld [vmem:[#allocation2 + $0x48] sm:$0x80]  ;;  %2378 = vst.msk [vmem:[#allocation2 + $0x68] sm:$0xff] %vm12_vm0, %v7644_v0 }
  0x4b   :  { %v578_v37 = vld [vmem:[#allocation2 + $0xa8] sm:$0x80] }
  0x4c   :  { %1329 = vrot.lane.b32.xlu1 %v495_v56, %s5067_s29  ;;  %1331 = vrot.lane.b32.xlu0 %v502_v8, %s5067_s29  ;;  %v538_v56 = vrot.slane %v7626_v17, 1  ;;  %v5547_v8 = vor.u32 %v531_v36, %v7630_v7  ;;  %v548_v17 = vshll.u32 %v450_v18, 16  ;;  %v543_v36 = vrot.slane %v541_v61, 1 }
  0x4d   :  { %v530_v18 = vsel %vm453_vm1, %v5542_v11, %v529_v48  ;;  %v7635_v7 = vshrl.u32 %v5560_v27, 16  ;;  %v5573_v61 = vor.u32 %v545_v59, %v7637_v35  ;;  %v559_v48 = vrot.slane %v7636_v53, 1  ;;  %v5587_v59 = vld [vmem:[#allocation2 + $0x28] sm:$0x1]  ;;  %v5597_v35 = vld [vmem:[#allocation2 + $0x78] sm:$0x80] }
  0x4e   :  { %7703 = vst [vmem:[#allocation15_spill] sm:$0xff] %v5547_v8  ;;  %v5558_v4 = vor.u32 %v538_v56, %v7631_v52  ;;  %v537_v56 = vsel %vm453_vm1, %v5547_v8, %v536_v1  ;;  %v568_v52 = vld [vmem:[#allocation2 + $0x30] sm:$0x80]  ;;  %v557_v53 = vrot.slane %v555_v14, 1  ;;  %2370 = vst.msk [vmem:[#allocation2 + $0x28] sm:$0xff] %vm12_vm0, %v7644_v0  ;;  %v5611_v14 = vor.u32 %v289_v55, %v5389_v58  ;;  %v4907_v55 = vld [vmem:[%s7616_s0 + $0x98] sm:$0xff]  }
  0x4f   :  { %7705 = vst [vmem:[#allocation17_spill] sm:$0xff] %v5573_v61  ;;  %v2603_v60 = vrot.slane %v7635_v7, 7  ;;  %v7710_v58 = vshrl.u32 %v5304_v33, 16  ;;  %v7712_v11 = vshll.u32 %v5286_v28, 16  ;;  %2551 = vst.msk [vmem:[#allocation2 + $0x68] sm:$0xff] %vm12_vm0, %v4907_v55  ;;  %v4908_v55 = vld [vmem:[%s7616_s0 + $0xa0] sm:$0xff]  }
  0x50   :  { %1333 = vrot.lane.b32.xlu1 %v509_v50, %s5067_s29  ;;  %1335 = vrot.lane.b32.xlu0 %v516_v3, %s5067_s29  ;;  %7704 = vst [vmem:[#allocation16_spill] sm:$0xff] %v5558_v4  ;;  %v552_v50 = vrot.slane %v7632_v54, 1  ;;  %v550_v3 = vrot.slane %v548_v17, 1  ;;  %v562_v54 = vshll.u32 %v452_v13, 16  ;;  %v544_v1 = vsel %vm453_vm1, %v5558_v4, %v543_v36  ;;  %v572_v17 = vld [vmem:[#allocation2 + $0x60] sm:$0x80] }
  0x51   :  { %v4906_v13 = vld [vmem:[%s7616_s0 + $0x90] sm:$0xff]   ;;  %v5644_v57 = vor.u32 %v7712_v11, %v5422_v23  ;;  %v7714_v23 = vshll.u32 %v5288_v29, 16 }
  0x52   :  { %v5594_v7 = vor.u32 %v552_v50, %v7639_v6  ;;  %v216_v36 = vld [vmem:[#allocation2 + $0x30] sm:$0x80]  ;;  %2550 = vst.msk [vmem:[#allocation2 + $0x50] sm:$0xff] %vm12_vm0, %v4906_v13  ;;  %v7708_v50 = vshrl.u32 %v5367_v47, 16  ;;  %v611_v6 = vshrl.u32 %v568_v52, 16  ;;  %v348_v13 = vrot.slane %v7710_v58, 7 }
  0x53   :  { %v5624_v4 = vld [vmem:[#allocation2 + $0x90] sm:$0x80]  ;;  %v5660_v11 = vor.u32 %v7714_v23, %v5424_v24 }
  0x54   :  { %1337 = vrot.lane.b32.xlu1 %v523_v16, %s5067_s29  ;;  %v5582_v16 = vrot.slane %v334_v42, 7  ;;  %1339 = vrot.lane.b32.xlu0 %v530_v18, %s5067_s29  ;;  %7706 = vst [vmem:[#allocation18_spill] sm:$0xff] %v5594_v7  ;;  %v599_v42 = vshrl.u32 %v5439_v40, 16  ;;  %v5601_v18 = vor.u32 %v7638_v49, %v2603_v60  ;;  %v5613_v40 = vld [vmem:[#allocation2 + $0x30] sm:$0x80]  ;;  %v551_v60 = vsel %vm453_vm1, %v5573_v61, %v550_v3 }
  0x55   :  { %v5622_v49 = vor.u32 %v559_v48, %v7708_v50  ;;  %2371 = vst.msk [vmem:[#allocation2 + $0x30] sm:$0xff] %vm12_vm0, %v7644_v0  ;;  %v623_v3 = vshrl.u32 %v570_v25, 16  ;;  %v635_v61 = vshrl.u32 %v572_v17, 16  ;;  %v212_v48 = vld [vmem:[#allocation2] sm:$0x80]  ;;  %v558_v0 = vsel %vm453_vm1, %v5594_v7, %v557_v53 }
  0x56   :  { %7707 = vst [vmem:[#allocation19_spill] sm:$0xff] %v5601_v18  ;;  %v5637_v50 = vld [vmem:[#allocation2 + $0x80] sm:$0xff]  ;;  %v601_v8 = vrot.slane %v599_v42, 7  ;;  %v246_v58 = vshrl.u32 %v212_v48, 16  ;;  %v270_v53 = vshrl.u32 %v216_v36, 16  ;;  %v659_v23 = vshrl.u32 %v5624_v4, 16 }
  0x57   :  { %7709 = vst [vmem:[#allocation20_spill] sm:$0xff] %v5622_v49  ;;  %v5648_v25 = vld [vmem:[#allocation2 + $0x40] sm:$0x1]  ;;  %v218_v42 = vld [vmem:[#allocation2 + $0x48] sm:$0x80]  ;;  %v625_v24 = vrot.slane %v623_v3, 7 }
  0x58   :  { %1341 = vrot.lane.b32.xlu1 %v537_v56, %s5067_s29  ;;  %v564_v56 = vrot.slane %v562_v54, 1  ;;  %1343 = vrot.lane.b32.xlu0 %v544_v1, %s5067_s29  ;;  %v7711_v54 = vshll.u32 %v5271_v22, 16  ;;  %v7713_v1 = vmov 0   ;;  %v5650_v17 = vld [vmem:[#allocation2 + $0x40] sm:$0x1]  ;;  %v248_v48 = vrot.slane %v246_v58, 7 }
  0x59   :  { %2365 = vst.msk [vmem:[#allocation2] sm:$0xff] %vm12_vm0, %v7713_v1  ;;  %2381 = vst.msk [vmem:[#allocation2 + $0x80] sm:$0xff] %vm12_vm0, %v7713_v1  ;;  %v220_v7 = vld [vmem:[#allocation2 + $0x60] sm:$0x80]  ;;  %v272_v36 = vrot.slane %v270_v53, 7  ;;  %v282_v62 = vshrl.u32 %v218_v42, 16  ;;  %v609_v18 = vsel %vm244_vm2, %v601_v8, %v5306_v34 }
  0x5a   :  { %v644_v52 = vor.u32 %v7711_v54, %v5403_v5  ;;  %v647_v5 = vshrl.u32 %v5597_v35, 16  ;;  %2373 = vst.msk [vmem:[#allocation2 + $0x40] sm:$0xff] %vm12_vm0, %v7713_v1  ;;  %v565_v54 = vsel %vm453_vm1, %v5622_v49, %v564_v56  ;;  %v258_v35 = vshrl.u32 %v5429_v26, 16  ;;  %2552 = vst.msk [vmem:[#allocation2 + $0x80] sm:$0xff] %vm12_vm0, %v4908_v55  ;;  %v222_v56 = vld [vmem:[#allocation2 + $0x78] sm:$0x80] }
  0x5b   :  { %v637_v21 = vrot.slane %v635_v61, 7  ;;  %v284_v4 = vrot.slane %v282_v62, 7  ;;  %v294_v3 = vshrl.u32 %v220_v7, 16  ;;  %v671_v53 = vshrl.u32 %v578_v37, 16  ;;  %v584_v49 = vld [vmem:[#allocation2 + $0xf0] sm:$0x80] }
  0x5c   :  { %1345 = vrot.lane.b32.xlu1 %v551_v60, %s5067_s29  ;;  %v613_v60 = vrot.slane %v611_v6, 7  ;;  %1347 = vrot.lane.b32.xlu0 %v558_v0, %s5067_s29  ;;  %v5677_v6 = vsel %vm244_vm2, %v248_v48, %v5268_v20  ;;  %v260_v26 = vrot.slane %v258_v35, 7  ;;  %v5682_v0 = vsel %vm244_vm2, %v272_v36, %v5300_v31  ;;  %v580_v20 = vld [vmem:[#allocation2 + $0xc0] sm:$0x80]  ;;  %v582_v36 = vld [vmem:[#allocation2 + $0xd8] sm:$0x80] }
  0x5d   :  { %v7715_v8 = vshll.u32 %v5302_v32, 16  ;;  %v649_v55 = vrot.slane %v647_v5, 7  ;;  %v5698_v7 = vsel %vm244_vm2, %v284_v4, %v5611_v14  ;;  %v296_v62 = vrot.slane %v294_v3, 7  ;;  %v228_v3 = vld [vmem:[#allocation2 + $0xc0] sm:$0x80] }
  0x5e   :  { %v621_v58 = vsel %vm244_vm2, %v613_v60, %v5300_v31  ;;  %v5693_v42 = vsel %vm244_vm2, %v260_v26, %v5306_v34  ;;  %7716 = vst [vmem:[#allocation21_spill] sm:$0xff] %v5698_v7  ;;  %v306_v37 = vshrl.u32 %v222_v56, 16  ;;  %v7717_v60 = vshrl.u32 %v5326_v38, 16 }
  0x5f   :  { %v5689_v61 = vor.u32 %v7715_v8, %v5582_v16  ;;  %v633_v48 = vsel %vm244_vm2, %v625_v24, %v5611_v14  ;;  %v7718_v34 = vshll.u32 %v5304_v33, 16  ;;  %v645_v5 = vsel %vm244_vm2, %v637_v21, %v644_v52 }
  0x60   :  { %1349 = vrot.lane.b32.xlu1 %v565_v54, %s5067_s29  ;;  %1351 = vrot.lane.b32.xlu0 %v609_v18, %s5068_s16  ;;  %v224_v54 = vld [vmem:[#allocation2 + $0x90] sm:$0x80]  ;;  %v360_v16 = vrot.slane %v7717_v60, 7  ;;  %v226_v18 = vld [vmem:[#allocation2 + $0xa8] sm:$0x80]  ;;  %v661_v26 = vrot.slane %v659_v23, 7  ;;  %v5711_v56 = vsel %vm244_vm2, %v296_v62, %v644_v52 }
  0x61   :  { %v5706_v35 = vor.u32 %v7718_v34, %v348_v13  ;;  %7719 = vst [vmem:[#allocation22_spill] sm:$0xff] %v5711_v56  ;;  %v308_v4 = vrot.slane %v306_v37, 7  ;;  %v673_v8 = vrot.slane %v671_v53, 7  ;;  %v683_v60 = vshrl.u32 %v580_v20, 16  ;;  %v5720_v23 = vld [vmem:[#allocation2 + $0x48] sm:$0x80] }
  0x62   :  { %v318_v14 = vshrl.u32 %v224_v54, 16  ;;  %v657_v13 = vsel %vm244_vm2, %v649_v55, %v5644_v57  ;;  %v695_v24 = vshrl.u32 %v582_v36, 16  ;;  %v330_v21 = vshrl.u32 %v226_v18, 16  ;;  %2374 = vst.msk [vmem:[#allocation2 + $0x48] sm:$0xff] %vm12_vm0, %v7713_v1  ;;  %v586_v37 = vld [vmem:[#allocation2 + $0x108] sm:$0x80] }
  0x63   :  { %v342_v62 = vshrl.u32 %v228_v3, 16  ;;  %v7721_v53 = vshrl.u32 %v5328_v39, 16  ;;  %v669_v55 = vsel %vm244_vm2, %v661_v26, %v5660_v11  ;;  %v707_v34 = vshrl.u32 %v584_v49, 16  ;;  %v588_v26 = vld [vmem:[#allocation2 + $0x120] sm:$0x80] }
  0x64   :  { %1353 = vrot.lane.b32.xlu1 %v621_v58, %s5068_s16  ;;  %1355 = vrot.lane.b32.xlu0 %v633_v48, %s5068_s16  ;;  %v5718_v58 = vsel %vm244_vm2, %v308_v4, %v5644_v57  ;;  %v320_v52 = vrot.slane %v318_v14, 7  ;;  %v332_v54 = vrot.slane %v330_v21, 7  ;;  %v816_v57 = vshll.u32 %v5648_v25, 16  ;;  %v5786_v56 = vld [vmem:[#allocation2 + $0x70] sm:$0x1] }
  0x65   :  { %7720 = vst [vmem:[#allocation23_spill] sm:$0xff] %v5718_v58  ;;  %v372_v20 = vrot.slane %v7721_v53, 7  ;;  %v685_v48 = vrot.slane %v683_v60, 7  ;;  %v344_v18 = vrot.slane %v342_v62, 7  ;;  %v7723_v4 = vshrl.u32 %v5339_v41, 16 }
  0x66   :  { %v5732_v36 = vsel %vm244_vm2, %v320_v52, %v5660_v11  ;;  %v5743_v25 = vsel %vm244_vm2, %v332_v54, %v5689_v61  ;;  %v818_v49 = vrot.slane %v816_v57, 1  ;;  %v5745_v60 = vld [vmem:[#allocation2 + $0x58] sm:$0x1]  ;;  %v681_v21 = vsel %vm244_vm2, %v673_v8, %v5689_v61  ;;  %v590_v54 = vld [vmem:[#allocation2 + $0x138] sm:$0x80] }
  0x67   :  { %7722 = vst [vmem:[#allocation24_spill] sm:$0xff] %v5732_v36  ;;  %v384_v3 = vrot.slane %v7723_v4, 7  ;;  %7725 = vst [vmem:[#allocation25_spill] sm:$0xff] %v5743_v25  ;;  %v697_v52 = vrot.slane %v695_v24, 7  ;;  %v719_v62 = vshrl.u32 %v586_v37, 16  ;;  %v693_v24 = vsel %vm244_vm2, %v685_v48, %v5706_v35 }
  0x68   :  { %1357 = vrot.lane.b32.xlu1 %v645_v5, %s5068_s16  ;;  %1359 = vrot.lane.b32.xlu0 %v657_v13, %s5068_s16  ;;  %v7724_v5 = vshll.u32 %v5326_v38, 16  ;;  %v5751_v13 = vsel %vm244_vm2, %v344_v18, %v5706_v35  ;;  %v5753_v53 = vld [vmem:[#allocation2 + $0x58] sm:$0x1]  ;;  %v5760_v57 = vsel %vm453_vm1, %v5435_v30, %v818_v49  ;;  %v5764_v8 = vld [vmem:[#allocation2 + $0x60] sm:$0x80]  ;;  %v709_v37 = vrot.slane %v707_v34, 7 }
  0x69   :  { %7726 = vst [vmem:[#allocation26_spill] sm:$0xff] %v5751_v13  ;;  %2376 = vst.msk [vmem:[#allocation2 + $0x58] sm:$0xff] %vm12_vm0, %v7713_v1  ;;  %v7728_v18 = vshll.u32 %v5328_v39, 16  ;;  %v7731_v13 = vshrl.u32 %v5362_v46, 16  ;;  %v592_v36 = vld [vmem:[#allocation2 + $0x150] sm:$0x80] }
  0x6a   :  { %v5739_v14 = vor.u32 %v7724_v5, %v360_v16  ;;  %v7727_v16 = vshrl.u32 %v5350_v43, 16  ;;  %2377 = vst.msk [vmem:[#allocation2 + $0x60] sm:$0xff] %vm12_vm0, %v7713_v1  ;;  %v721_v34 = vrot.slane %v719_v62, 7  ;;  %v594_v58 = vld [vmem:[#allocation2 + $0x168] sm:$0x80]  ;;  %v971_v38 = vshll.u32 %v5522_v44, 16 }
  0x6b   :  { %v5770_v5 = vor.u32 %v7728_v18, %v372_v20  ;;  %v420_v25 = vrot.slane %v7731_v13, 7  ;;  %v7732_v20 = vshll.u32 %v5339_v41, 16  ;;  %v5794_v62 = vld [vmem:[#allocation2 + $0x70] sm:$0x1]  ;;  %v5796_v41 = vld [vmem:[#allocation2 + $0x78] sm:$0x80] }
  0x6c   :  { %v396_v4 = vrot.slane %v7727_v16, 7  ;;  %1361 = vrot.lane.b32.xlu1 %v669_v55, %s5068_s16  ;;  %v731_v16 = vshrl.u32 %v588_v26, 16  ;;  %v7730_v55 = vshrl.u32 %v5360_v45, 16  ;;  %1363 = vrot.lane.b32.xlu0 %v681_v21, %s5068_s16  ;;  %v705_v48 = vsel %vm244_vm2, %v697_v52, %v5739_v14  ;;  %2379 = vst.msk [vmem:[#allocation2 + $0x70] sm:$0xff] %vm12_vm0, %v7713_v1  ;;  %2380 = vst.msk [vmem:[#allocation2 + $0x78] sm:$0xff] %vm12_vm0, %v7713_v1 }
  0x6d   :  { %7729 = vst [vmem:[#allocation27_spill] sm:$0xff] %v5770_v5  ;;  %v5783_v18 = vor.u32 %v7732_v20, %v384_v3  ;;  %v743_v26 = vshrl.u32 %v590_v54, 16  ;;  %v717_v13 = vsel %vm244_vm2, %v709_v37, %v5770_v5  ;;  %v7734_v21 = vshll.u32 %v5350_v43, 16 }
  0x6e   :  { %v408_v49 = vrot.slane %v7730_v55, 7  ;;  %v733_v55 = vrot.slane %v731_v16, 7  ;;  %v755_v52 = vshrl.u32 %v592_v36, 16  ;;  %v7736_v3 = vshrl.u32 %v5367_v47, 16 }
  0x6f   :  { %7733 = vst [vmem:[#allocation28_spill] sm:$0xff] %v5783_v18  ;;  %v5792_v39 = vor.u32 %v7734_v21, %v396_v4  ;;  %v729_v36 = vsel %vm244_vm2, %v721_v34, %v5783_v18  ;;  %v745_v4 = vrot.slane %v743_v26, 7  ;;  %v7737_v37 = vshll.u32 %v5360_v45, 16  ;;  %v5826_v26 = vld [vmem:[#allocation2 + $0x88] sm:$0x1] }
  0x70   :  { %1365 = vrot.lane.b32.xlu1 %v693_v24, %s5068_s16  ;;  %v432_v54 = vrot.slane %v7736_v3, 7  ;;  %1367 = vrot.lane.b32.xlu0 %v705_v48, %s5068_s16  ;;  %v5801_v24 = vld [vmem:[#allocation2 + $0x20] sm:$0xff]  ;;  %v767_v20 = vshrl.u32 %v594_v58, 16  ;;  %v2788_v48 = vld [vmem:[#allocation2 + $0x10] sm:$0x1]  ;;  %v757_v3 = vrot.slane %v755_v52, 7 }
  0x71   :  { %7735 = vst [vmem:[#allocation29_spill] sm:$0xff] %v5792_v39  ;;  %v5811_v16 = vor.u32 %v7737_v37, %v408_v49  ;;  %v741_v21 = vsel %vm244_vm2, %v733_v55, %v5792_v39  ;;  %v7739_v43 = vshll.u32 %v5362_v46, 16  ;;  %v2953_v7 = vshrl.u32 %v5801_v24, 16  ;;  %v2916_v58 = vld [vmem:[#allocation2 + $0x18] sm:$0x80] }
  0x72   :  { %v7741_v34 = vshll.u32 %v5367_v47, 16  ;;  %v769_v52 = vrot.slane %v767_v20, 7  ;;  %v2807_v37 = vshll.u32 %v2788_v48, 16  ;;  %v7744_v48 = vshrl.u32 %v5560_v27, 16  ;;  %v5849_v46 = vld [vmem:[#allocation2 + $0x90] sm:$0x80] }
  0x73   :  { %7738 = vst [vmem:[#allocation30_spill] sm:$0xff] %v5811_v16  ;;  %v5818_v5 = vor.u32 %v7739_v43, %v420_v25  ;;  %v753_v55 = vsel %vm244_vm2, %v745_v4, %v5811_v16  ;;  %v7743_v43 = vshll.u32 %v5560_v27, 16  ;;  %v2955_v47 = vrot.slane %v2953_v7, 7  ;;  %2383 = vst.msk [vmem:[#allocation2 + $0x90] sm:$0xff] %vm12_vm0, %v7713_v1 }
  0x74   :  { %1369 = vrot.lane.b32.xlu1 %v717_v13, %s5068_s16  ;;  %1371 = vrot.lane.b32.xlu0 %v729_v36, %s5068_s16  ;;  %v5824_v49 = vor.u32 %v7741_v34, %v432_v54  ;;  %v5828_v13 = vld [vmem:[#allocation2 + $0x88] sm:$0x1]  ;;  %v4909_v54 = vld [vmem:[%s7617_s1 + $0x4] ss:$8 sps:$4 sm:$0xff]   ;;  %v2949_v34 = vshrl.u32 %v2916_v58, 16  ;;  %v2956_v4 = vshll.u32 %v5801_v24, 16 }
  0x75   :  { %7740 = vst [vmem:[#allocation31_spill] sm:$0xff] %v5818_v5  ;;  %v2804_v25 = vrot.slane %v7743_v43, 1  ;;  %2382 = vst.msk [vmem:[#allocation2 + $0x88] sm:$0xff] %vm12_vm0, %v7713_v1  ;;  %v765_v36 = vsel %vm244_vm2, %v757_v3, %v5818_v5  ;;  %1948 = vmatprep.subr.bf16.mxu0 %v4909_v54  ;;  %v2809_v43 = vrot.slane %v2807_v37, 1  ;;  %v4911_v58 = vld [vmem:[%s7617_s1 + $0x4c] ss:$8 sps:$4 sm:$0xff]  }
  0x76   :  { %7742 = vst [vmem:[#allocation32_spill] sm:$0xff] %v5824_v49  ;;  %v777_v20 = vsel %vm244_vm2, %v769_v52, %v5824_v49  ;;  %v2951_v45 = vrot.slane %v2949_v34, 7  ;;  %v5851_v3 = vor.u32 %v2956_v4, %v2955_v47  ;;  %v5859_v52 = vld [vmem:[#allocation2 + $0x38] sm:$0xff]  ;;  %v809_v37 = vshll.u32 %v5587_v59, 16  ;;  %4289 = vmatprep.subr.bf16.mxu1 %v4911_v58 }
  0x77   :  { %v3156_v54 = vrot.slane %v2956_v4, 1  ;;  %v3305_v34 = vshrl.u32 %v5859_v52, 16  ;;  %v4917_v59 = vld [vmem:[%s7617_s1 + $0x5c] ss:$8 sps:$4 sm:$0xff]   ;;  %v3308_v4 = vshll.u32 %v5859_v52, 16 }
  0x78   :  { %1373 = vrot.lane.b32.xlu1 %v741_v21, %s5068_s16  ;;  %1375 = vrot.lane.b32.xlu0 %v753_v55, %s5068_s16  ;;  %v2805_v21 = vor.u32 %v2804_v25, %v7744_v48  ;;  %v3140_v55 = vld [vmem:[#allocation2 + $0x28] sm:$0x1]  ;;  %v2959_v47 = vsel %vm244_vm2, %v2951_v45, %v5851_v3  ;;  %v3268_v48 = vld [vmem:[#allocation2 + $0x30] sm:$0x80]  ;;  %v4921_v45 = vld [vmem:[%s7617_s1 + $0x58] ss:$8 sps:$4 sm:$0xff]  }
  0x79   :  { %v5883_v58 = vor.u32 %v3156_v54, %v2953_v7  ;;  %v3307_v49 = vrot.slane %v3305_v34, 7  ;;  %v4922_v7 = vld [vmem:[%s7617_s1 + $0x6c] ss:$8 sps:$4 sm:$0xff]  }
  0x7a   :  { %v2810_v25 = vsel %vm453_vm1, %v2805_v21, %v2809_v43  ;;  %v811_v21 = vrot.slane %v809_v37, 1  ;;  %v5881_v43 = vld [vmem:[#allocation2 + $0xa0] sm:$0x1] }
  0x7b   :  { %v5885_v37 = vld [vmem:[#allocation2 + $0xa0] sm:$0x1] }
  0x7c   :  { %1377 = vrot.lane.b32.xlu1 %v765_v36, %s5068_s16  ;;  %1379 = vrot.lane.b32.xlu0 %v777_v20, %s5068_s16  ;;  %v3159_v36 = vshll.u32 %v3140_v55, 16  ;;  %v4915_v20 = vld [vmem:[%s7617_s1 + $0x48] ss:$8 sps:$4 sm:$0xff]   ;;  %2385 = vst.msk [vmem:[#allocation2 + $0xa0] sm:$0xff] %vm12_vm0, %v7713_v1 }
  0x7d   :  { %4290 = vmatpush1.bf16.msra.mxu1 %v4915_v20  ;;  %v3492_v20 = vld [vmem:[#allocation2 + $0x40] sm:$0x1] }
  0x7e   :  { %4291 = vmatprep.subr.bf16.mxu1 %v4917_v59  ;;  %v3161_v55 = vrot.slane %v3159_v36, 1 }
  0x80   :  { %3636 = vrot.lane.b32.xlu1 %v5560_v27, %s5066_s23  ;;  %3668 = vrot.lane.b32.xlu0 %v2810_v25, %s5067_s29  ;;  %v952_v27 = vshrl.u32 %v5613_v40, 16  ;;  %v3301_v25 = vshrl.u32 %v3268_v48, 16  ;;  %v812_v40 = vsel %vm453_vm1, %v5414_v9, %v811_v21  ;;  %v3162_v54 = vsel %vm453_vm1, %v5883_v58, %v3161_v55  ;;  %v4926_v9 = vld [vmem:[%s7617_s1 + $0x68] ss:$8 sps:$4 sm:$0xff]   ;;  %v4928_v48 = vld [vmem:[%s7617_s1 + $0x7c] ss:$8 sps:$4 sm:$0xff]  }
  0x81   :  { %4292 = vmatpush1.bf16.msra.mxu1 %v4921_v45  ;;  %v1162_v21 = vshll.u32 %v5650_v17, 16  ;;  %v4931_v45 = vld [vmem:[%s7617_s1 + $0x78] ss:$8 sps:$4 sm:$0xff]   ;;  %v3508_v17 = vrot.slane %v3308_v4, 1  ;;  %v3511_v55 = vshll.u32 %v3492_v20, 16 }
  0x82   :  { %v3303_v36 = vrot.slane %v3301_v25, 7  ;;  %4293 = vmatprep.subr.bf16.mxu1 %v4922_v7  ;;  %v2789_v25 = vld [vmem:[#allocation2 + $0x28] sm:$0x1]  ;;  %v2918_v7 = vld [vmem:[#allocation2 + $0x30] sm:$0x80] }
  0x83   :  { %v5937_v20 = vor.u32 %v3508_v17, %v3305_v34  ;;  %v1859_v34 = vld [vmem:[%s7617_s1 + $0x28] sm:$0xff]  ;;  %v5957_v17 = vpop.permute.xlu0 %1287 }
  0x84   :  { %3700 = vrot.lane.b32.xlu1 %v2959_v47, %s5068_s16  ;;  %1399 = vrot.lane.b32.xlu0 %v5246_v15, %s5069_s28  ;;  %v954_v47 = vrot.slane %v952_v27, 7  ;;  %v5900_v15 = vor.u32 %v3308_v4, %v3307_v49  ;;  %v1854_v49 = vld [vmem:[%s7617_s1] sm:$0xff]  ;;  %v1855_v27 = vld [vmem:[%s7617_s1 + $0x8] sm:$0xff]  ;;  %v5933_v4 = vld [vmem:[#allocation2 + $0xb8] sm:$0x1] }
  0x85   :  { %4294 = vmatpush1.bf16.msra.mxu1 %v4926_v9  ;;  %v5928_v9 = vld [vmem:[#allocation2 + $0xa8] sm:$0x80] }
  0x86   :  { %v962_v59 = vsel %vm244_vm2, %v954_v47, %v5300_v31  ;;  %4295 = vmatprep.subr.bf16.mxu1 %v4928_v48  ;;  %v3311_v31 = vsel %vm244_vm2, %v3303_v36, %v5900_v15  ;;  %v1164_v47 = vrot.slane %v1162_v21, 1  ;;  %v2814_v48 = vshll.u32 %v2789_v25, 16  ;;  %2386 = vst.msk [vmem:[#allocation2 + $0xa8] sm:$0xff] %vm12_vm0, %v7713_v1  ;;  %v5935_v36 = vld [vmem:[#allocation2 + $0xb8] sm:$0x1] }
  0x87   :  { %v4916_v21 = vld [vmem:[%s7617_s1 + $0x10] ss:$8 sps:$4 sm:$0xff]   ;;  %2388 = vst.msk [vmem:[#allocation2 + $0xb8] sm:$0xff] %vm12_vm0, %v7713_v1 }
  0x88   :  { %3748 = vrot.lane.b32.xlu1 %v5801_v24, %s5069_s28  ;;  %1431 = vrot.lane.b32.xlu0 %v812_v40, %s5070_s6  ;;  %v4913_v40 = vld [vmem:[%s7617_s1 + $0x14] ss:$8 sps:$4 sm:$0xff]   ;;  %v2816_v25 = vrot.slane %v2814_v48, 1  ;;  %v1862_v48 = vld [vmem:[%s7617_s1 + $0x40] sm:$0xff] }
  0x89   :  { %4296 = vmatpush1.bf16.msra.mxu1 %v4931_v45  ;;  %v1165_v45 = vsel %vm453_vm1, %v5435_v30, %v1164_v47  ;;  %v4924_v30 = vld [vmem:[%s7617_s1 + $0x34] ss:$8 sps:$4 sm:$0xff]   ;;  %v4810_v47 = vld [vmem:[%s7617_s1 + $0x88] sm:$0xff]  ;;  %v4735_v16 = vcombine.low %v1862_v48, %v1862_v48 }
  0x8a   :  { %v4819_v39 = vcombine.low %v4810_v47, %v4810_v47 }
  0x8c   :  { %3780 = vrot.lane.b32.xlu1 %v3162_v54, %s5070_s6  ;;  %1463 = vrot.lane.b32.xlu0 %v962_v59, %s5071_s15  ;;  %v4727_v54 = vcombine.low %v1854_v49, %v1855_v27  ;;  %v3513_v59 = vrot.slane %v3511_v55, 1  ;;  %v1858_v49 = vld [vmem:[%s7617_s1 + $0x20] sm:$0xff] }
  0x8d   :  { %v4919_v27 = vld [vmem:[%s7617_s1 + $0x24] ss:$8 sps:$4 sm:$0xff]  }
  0x8e   :  { %1949 = vmatpush1.bf16.msra.mxu0 %v4727_v54  ;;  %v3514_v55 = vsel %vm453_vm1, %v5937_v20, %v3513_v59 }
  0x8f   :  { %1950 = vmatprep.subr.bf16.mxu0 %v4913_v40  ;;  %v4731_v40 = vcombine.low %v1858_v49, %v1859_v34  ;;  %v5978_v49 = vld [vmem:[#allocation2 + $0x50] sm:$0xff]  ;;  %v2817_v34 = vsel %vm453_vm1, %v5883_v58, %v2816_v25 }
  0x90   :  { %3812 = vrot.lane.b32.xlu1 %v3311_v31, %s5071_s15  ;;  %1511 = vrot.lane.b32.xlu0 %v5239_v12, %s5072_s24  ;;  %v2961_v31 = vshrl.u32 %v2918_v7, 16 }
  0x92   :  { %1951 = vmatpush1.bf16.msra.mxu0 %v4916_v21  ;;  %v2963_v7 = vrot.slane %v2961_v31, 7  ;;  %v3141_v21 = vld [vmem:[#allocation2 + $0x40] sm:$0x1]  ;;  %v4820_v31 = vcombine.high %v4810_v47, %v4810_v47  ;;  %v1943_v47 = vsel %vm1941_vm3, %v4735_v16, 0 }
  0x93   :  { %1952 = vmatprep.subr.bf16.mxu0 %v4919_v27  ;;  %v968_v27 = vshrl.u32 %v5522_v44, 16  ;;  %v3166_v25 = vshll.u32 %v3141_v21, 16  ;;  %v6005_v21 = vld [vmem:[#allocation2 + $0xc0] sm:$0x80] }
  0x94   :  { %3860 = vrot.lane.b32.xlu1 %v5859_v52, %s5072_s24  ;;  %1543 = vrot.lane.b32.xlu0 %v1165_v45, %s5073_s3  ;;  %v4927_v45 = vld [vmem:[%s7617_s1 + $0x30] ss:$8 sps:$4 sm:$0xff]   ;;  %v2971_v58 = vsel %vm244_vm2, %v2963_v7, %v5900_v15  ;;  %2389 = vst.msk [vmem:[#allocation2 + $0xc0] sm:$0xff] %vm12_vm0, %v7713_v1 }
  0x95   :  { %4821 = vmatprep.subr.msk.bf16.mxu1 %vm1941_vm3, %v4820_v31 }
  0x96   :  { %v5964_v54 = vpop.permute.xlu1 %1291  ;;  %v5975_v59 = vpop.permute.xlu0 %1289  ;;  %1953 = vmatpush1.bf16.msra.mxu0 %v4731_v40  ;;  %v3317_v40 = vshrl.u32 %v5978_v49, 16 }
  0x97   :  { %1954 = vmatprep.subr.bf16.mxu0 %v4924_v30  ;;  %v970_v30 = vrot.slane %v968_v27, 7 }
  0x98   :  { %3892 = vrot.lane.b32.xlu1 %v3514_v55, %s5073_s3  ;;  %3638 = vrot.lane.b32.xlu0 %v5801_v24, %s5066_s23  ;;  %v4736_v55 = vcombine.high %v1862_v48, %v1862_v48  ;;  %v3270_v24 = vld [vmem:[#allocation2 + $0x48] sm:$0x80]  ;;  %v4284_v48 = vsel %vm1941_vm3, %v4819_v39, 0 }
  0x99   :  { %v3313_v31 = vshrl.u32 %v3270_v24, 16  ;;  %4298 = vmatpush1.bf16.msra.mxu1 %v4284_v48 }
  0x9a   :  { %v5988_v5 = vpop.permute.xlu1 %1293  ;;  %v5994_v18 = vpop.permute.xlu0 %1295  ;;  %1955 = vmatpush1.bf16.msra.mxu0 %v4927_v45 }
  0x9b   :  { %7745 = vst [vmem:[#allocation33_spill] sm:$0xff] %v5988_v5  ;;  %7746 = vst [vmem:[#allocation34_spill] sm:$0xff] %v5994_v18  ;;  %v964_v5 = vshrl.u32 %v5720_v23, 16  ;;  %4737 = vmatprep.subr.msk.bf16.mxu0 %vm1941_vm3, %v4736_v55  ;;  %v3319_v18 = vrot.slane %v3317_v40, 7  ;;  %v3320_v23 = vshll.u32 %v5978_v49, 16  ;;  %v973_v55 = vor.u32 %v971_v38, %v970_v30 }
  0x9c   :  { %3670 = vrot.lane.b32.xlu1 %v2817_v34, %s5067_s29  ;;  %3702 = vrot.lane.b32.xlu0 %v2971_v58, %s5068_s16  ;;  %v3168_v34 = vrot.slane %v3166_v25, 1  ;;  %v3315_v25 = vrot.slane %v3313_v31, 7  ;;  %v1166_v30 = vrot.slane %v971_v38, 1  ;;  %v2790_v38 = vld [vmem:[#allocation2 + $0x40] sm:$0x1] }
  0x9d   :  { %v966_v45 = vrot.slane %v964_v5, 7  ;;  %v6020_v24 = vor.u32 %v3320_v23, %v3319_v18 }
  0x9e   :  { %v6001_v7 = vpop.permute.xlu1 %1297  ;;  %v6010_v39 = vpop.permute.xlu0 %1299  ;;  %1957 = vmatpush1.bf16.msra.mxu0 %v1943_v47  ;;  %v3169_v58 = vsel %vm453_vm1, %v5937_v20, %v3168_v34  ;;  %v1169_v47 = vshll.u32 %v5753_v53, 16  ;;  %v3515_v34 = vrot.slane %v3320_v23, 1  ;;  %v1167_v53 = vor.u32 %v1166_v30, %v968_v27 }
  0x9f   :  { %7747 = vst [vmem:[#allocation35_spill] sm:$0xff] %v6001_v7  ;;  %7748 = vst [vmem:[#allocation36_spill] sm:$0xff] %v6010_v39  ;;  %v974_v5 = vsel %vm244_vm2, %v966_v45, %v973_v55  ;;  %v6031_v39 = vld [vmem:[#allocation2 + $0xd0] sm:$0x1]  ;;  %v3323_v18 = vsel %vm244_vm2, %v3315_v25, %v6020_v24 }
  0xa0   :  { %1401 = vrot.lane.b32.xlu1 %v5239_v12, %s5069_s28  ;;  %3750 = vrot.lane.b32.xlu0 %v5859_v52, %s5069_s28  ;;  %v3493_v12 = vld [vmem:[#allocation2 + $0x58] sm:$0x1]  ;;  %v1171_v45 = vrot.slane %v1169_v47, 1  ;;  %v6045_v25 = vor.u32 %v3515_v34, %v3317_v40 }
  0xa1   :  { %v3518_v31 = vshll.u32 %v3493_v12, 16  ;;  %v2821_v12 = vshll.u32 %v2790_v38, 16  ;;  %v3142_v34 = vld [vmem:[#allocation2 + $0x58] sm:$0x1] }
  0xa2   :  { %v6016_v16 = vpop.permute.xlu1 %1301  ;;  %v6022_v48 = vpop.permute.xlu0 %1303 }
  0xa3   :  { %7749 = vst [vmem:[#allocation37_spill] sm:$0xff] %v6016_v16  ;;  %7750 = vst [vmem:[#allocation38_spill] sm:$0xff] %v6022_v48  ;;  %v6035_v48 = vld [vmem:[#allocation2 + $0xd0] sm:$0x1]  ;;  %v3520_v23 = vrot.slane %v3518_v31, 1  ;;  %v2823_v40 = vrot.slane %v2821_v12, 1 }
  0xa4   :  { %1433 = vrot.lane.b32.xlu1 %v5760_v57, %s5070_s6  ;;  %3782 = vrot.lane.b32.xlu0 %v3169_v58, %s5070_s6  ;;  %2391 = vst.msk [vmem:[#allocation2 + $0xd0] sm:$0xff] %vm12_vm0, %v7713_v1  ;;  %v2920_v58 = vld [vmem:[#allocation2 + $0x48] sm:$0x80] }
  0xa5   :  { %v3521_v30 = vsel %vm453_vm1, %v6045_v25, %v3520_v23  ;;  %v6064_v31 = vld [vmem:[#allocation2 + $0x68] sm:$0xff]  ;;  %v2824_v38 = vsel %vm453_vm1, %v5937_v20, %v2823_v40  ;;  %v3173_v23 = vshll.u32 %v3142_v34, 16  ;;  %v3272_v20 = vld [vmem:[#allocation2 + $0x60] sm:$0x80] }
  0xa6   :  { %v6029_v16 = vpop.permute.xlu1 %1305  ;;  %v6037_v57 = vpop.permute.xlu0 %1307  ;;  %v3329_v12 = vshrl.u32 %v6064_v31, 16 }
  0xa7   :  { %7751 = vst [vmem:[#allocation39_spill] sm:$0xff] %v6029_v16  ;;  %7752 = vst [vmem:[#allocation40_spill] sm:$0xff] %v6037_v57  ;;  %v2973_v57 = vshrl.u32 %v2920_v58, 16  ;;  %v3175_v34 = vrot.slane %v3173_v23, 1 }
  0xa8   :  { %1465 = vrot.lane.b32.xlu1 %v974_v5, %s5071_s15  ;;  %3814 = vrot.lane.b32.xlu0 %v3323_v18, %s5071_s15  ;;  %v1172_v5 = vsel %vm453_vm1, %v1167_v53, %v1171_v45  ;;  %v823_v53 = vshll.u32 %v5745_v60, 16  ;;  %v980_v45 = vshrl.u32 %v5605_v63, 16  ;;  %v976_v60 = vshrl.u32 %v5764_v8, 16 }
  0xa9   :  { %v2975_v18 = vrot.slane %v2973_v57, 7  ;;  %v3176_v23 = vsel %vm453_vm1, %v6045_v25, %v3175_v34 }
  0xaa   :  { %v6043_v55 = vpop.permute.xlu1 %1309  ;;  %v6047_v16 = vpop.permute.xlu0 %1311  ;;  %v982_v40 = vrot.slane %v980_v45, 7 }
  0xab   :  { %7753 = vst [vmem:[#allocation41_spill] sm:$0xff] %v6043_v55  ;;  %7754 = vst [vmem:[#allocation42_spill] sm:$0xff] %v6047_v16  ;;  %v2983_v57 = vsel %vm244_vm2, %v2975_v18, %v6020_v24  ;;  %v6087_v18 = vld [vmem:[#allocation2 + $0xd8] sm:$0x80]  ;;  %v3332_v16 = vshll.u32 %v6064_v31, 16  ;;  %v978_v55 = vrot.slane %v976_v60, 7 }
  0xac   :  { %1513 = vrot.lane.b32.xlu1 %v5522_v44, %s5072_s24  ;;  %3862 = vrot.lane.b32.xlu0 %v5978_v49, %s5072_s24  ;;  %v1176_v60 = vshll.u32 %v5794_v62, 16 }
  0xae   :  { %v6054_v27 = vpop.permute.xlu1 %1313  ;;  %v6058_v47 = vpop.permute.xlu0 %1315 }
  0xaf   :  { %7755 = vst [vmem:[#allocation43_spill] sm:$0xff] %v6054_v27  ;;  %7756 = vst [vmem:[#allocation44_spill] sm:$0xff] %v6058_v47  ;;  %v6082_v47 = vld [vmem:[#allocation2 + $0xd8] sm:$0x80]  ;;  %v3325_v27 = vshrl.u32 %v3272_v20, 16 }
  0xb0   :  { %1545 = vrot.lane.b32.xlu1 %v1172_v5, %s5073_s3  ;;  %3894 = vrot.lane.b32.xlu0 %v3521_v30, %s5073_s3  ;;  %v825_v30 = vrot.slane %v823_v53, 1  ;;  %7758 = vst [vmem:[#allocation46_spill] sm:$0xff] %v6082_v47  ;;  %2392 = vst.msk [vmem:[#allocation2 + $0xd8] sm:$0xff] %vm12_vm0, %v7713_v1 }
  0xb1   :  { %v3327_v20 = vrot.slane %v3325_v27, 7  ;;  %v3522_v27 = vrot.slane %v3332_v16, 1 }
  0xb2   :  { %v6062_v44 = vpop.permute.xlu1 %1317  ;;  %v6070_v58 = vpop.permute.xlu0 %1319  ;;  %v826_v53 = vsel %vm453_vm1, %v5453_v51, %v825_v30 }
  0xb3   :  { %7757 = vst [vmem:[#allocation45_spill] sm:$0xff] %v6062_v44  ;;  %v983_v44 = vshll.u32 %v5605_v63, 16 }
  0xb4   :  { %3640 = vrot.lane.b32.xlu1 %v5859_v52, %s5066_s23  ;;  %3672 = vrot.lane.b32.xlu0 %v2824_v38, %s5067_s29  ;;  %v3331_v38 = vrot.slane %v3329_v12, 7 }
  0xb5   :  { %v1173_v30 = vrot.slane %v983_v44, 1 }
  0xb6   :  { %v6078_v5 = vpop.permute.xlu1 %1321  ;;  %v6084_v52 = vpop.permute.xlu0 %1323  ;;  %v6104_v7 = vor.u32 %v3332_v16, %v3331_v38  ;;  %v2922_v16 = vld [vmem:[#allocation2 + $0x60] sm:$0x80] }
  0xb7   :  { %v1174_v62 = vor.u32 %v1173_v30, %v980_v45 }
  0xb8   :  { %3704 = vrot.lane.b32.xlu1 %v2983_v57, %s5068_s16  ;;  %1403 = vrot.lane.b32.xlu0 %v5264_v19, %s5069_s28  ;;  %v985_v57 = vor.u32 %v983_v44, %v982_v40  ;;  %v3335_v34 = vsel %vm244_vm2, %v3327_v20, %v6104_v7  ;;  %v1178_v44 = vrot.slane %v1176_v60, 1 }
  0xba   :  { %v6094_v8 = vpop.permute.xlu1 %1325  ;;  %v6098_v47 = vpop.permute.xlu0 %1327  ;;  %v986_v51 = vsel %vm244_vm2, %v978_v55, %v985_v57  ;;  %v2791_v55 = vld [vmem:[#allocation2 + $0x58] sm:$0x1] }
  0xbb   :  { %7759 = vst [vmem:[#allocation47_spill] sm:$0xff] %v6094_v8  ;;  %7760 = vst [vmem:[#allocation48_spill] sm:$0xff] %v6098_v47  ;;  %v3494_v8 = vld [vmem:[#allocation2 + $0x70] sm:$0x1]  ;;  %v6116_v47 = vld [vmem:[#allocation2 + $0xe8] sm:$0x1] }
  0xbc   :  { %3752 = vrot.lane.b32.xlu1 %v5978_v49, %s5069_s28  ;;  %1435 = vrot.lane.b32.xlu0 %v826_v53, %s5070_s6  ;;  %v3525_v38 = vshll.u32 %v3494_v8, 16  ;;  %7763 = vst [vmem:[#allocation51_spill] sm:$0xff] %v6116_v47  ;;  %v6118_v53 = vld [vmem:[#allocation2 + $0xe8] sm:$0x1]  ;;  %v6128_v8 = vor.u32 %v3522_v27, %v3329_v12  ;;  %v2828_v20 = vshll.u32 %v2791_v55, 16  ;;  %v6147_v27 = vld [vmem:[#allocation2 + $0x80] sm:$0xff] }
  0xbd   :  { %2394 = vst.msk [vmem:[#allocation2 + $0xe8] sm:$0xff] %vm12_vm0, %v7713_v1  ;;  %v830_v55 = vshll.u32 %v5786_v56, 16  ;;  %v988_v56 = vshrl.u32 %v5796_v41, 16 }
  0xbe   :  { %v6107_v19 = vpop.permute.xlu1 %1329  ;;  %v6111_v40 = vpop.permute.xlu0 %1331  ;;  %v2830_v12 = vrot.slane %v2828_v20, 1 }
  0xbf   :  { %7761 = vst [vmem:[#allocation49_spill] sm:$0xff] %v6107_v19  ;;  %7762 = vst [vmem:[#allocation50_spill] sm:$0xff] %v6111_v40  ;;  %v2985_v40 = vshrl.u32 %v2922_v16, 16  ;;  %v3341_v16 = vshrl.u32 %v6147_v27, 16  ;;  %v832_v20 = vrot.slane %v830_v55, 1 }
  0xc0   :  { %3784 = vrot.lane.b32.xlu1 %v3176_v23, %s5070_s6  ;;  %1467 = vrot.lane.b32.xlu0 %v986_v51, %s5071_s15  ;;  %v3527_v23 = vrot.slane %v3525_v38, 1  ;;  %v2831_v38 = vsel %vm453_vm1, %v6045_v25, %v2830_v12  ;;  %v3274_v25 = vld [vmem:[#allocation2 + $0x78] sm:$0x80]  ;;  %v995_v12 = vshll.u32 %v5637_v50, 16 }
  0xc1   :  { %v2987_v60 = vrot.slane %v2985_v40, 7  ;;  %v833_v55 = vsel %vm453_vm1, %v5465_v2, %v832_v20 }
  0xc2   :  { %v6121_v19 = vpop.permute.xlu1 %1333  ;;  %v6125_v57 = vpop.permute.xlu0 %1335  ;;  %v3528_v45 = vsel %vm453_vm1, %v6128_v8, %v3527_v23  ;;  %v1180_v20 = vrot.slane %v995_v12, 1 }
  0xc3   :  { %7764 = vst [vmem:[#allocation52_spill] sm:$0xff] %v6121_v19  ;;  %7765 = vst [vmem:[#allocation53_spill] sm:$0xff] %v6125_v57  ;;  %v1179_v19 = vsel %vm453_vm1, %v1174_v62, %v1178_v44  ;;  %v992_v62 = vshrl.u32 %v5637_v50, 16  ;;  %v2995_v40 = vsel %vm244_vm2, %v2987_v60, %v6104_v7  ;;  %v6170_v60 = vld [vmem:[#allocation2 + $0xf0] sm:$0x80] }
  0xc4   :  { %3816 = vrot.lane.b32.xlu1 %v3335_v34, %s5071_s15  ;;  %1515 = vrot.lane.b32.xlu0 %v5605_v63, %s5072_s24  ;;  %v3143_v34 = vld [vmem:[#allocation2 + $0x70] sm:$0x1]  ;;  %v6201_v57 = vld [vmem:[#allocation2 + $0x100] sm:$0x1] }
  0xc5   :  { %v3180_v44 = vshll.u32 %v3143_v34, 16 }
  0xc6   :  { %v6132_v51 = vpop.permute.xlu1 %1337  ;;  %v6135_v47 = vpop.permute.xlu0 %1339 }
  0xc7   :  { %7766 = vst [vmem:[#allocation54_spill] sm:$0xff] %v6132_v51  ;;  %7767 = vst [vmem:[#allocation55_spill] sm:$0xff] %v6135_v47  ;;  %v3182_v34 = vrot.slane %v3180_v44, 1  ;;  %v6199_v51 = vld [vmem:[#allocation2 + $0x100] sm:$0x1] }
  0xc8   :  { %3864 = vrot.lane.b32.xlu1 %v6064_v31, %s5072_s24  ;;  %1547 = vrot.lane.b32.xlu0 %v1179_v19, %s5073_s3  ;;  %7775 = vst [vmem:[#allocation63_spill] sm:$0xff] %v6199_v51  ;;  %2397 = vst.msk [vmem:[#allocation2 + $0x100] sm:$0xff] %vm12_vm0, %v7713_v1 }
  0xca   :  { %v6142_v30 = vpop.permute.xlu1 %1341  ;;  %v6144_v63 = vpop.permute.xlu0 %1343 }
  0xcb   :  { %7768 = vst [vmem:[#allocation56_spill] sm:$0xff] %v6142_v30  ;;  %7769 = vst [vmem:[#allocation57_spill] sm:$0xff] %v6144_v63  ;;  %v3337_v63 = vshrl.u32 %v3274_v25, 16  ;;  %v3183_v25 = vsel %vm453_vm1, %v6128_v8, %v3182_v34 }
  0xcc   :  { %3896 = vrot.lane.b32.xlu1 %v3528_v45, %s5073_s3  ;;  %3642 = vrot.lane.b32.xlu0 %v5978_v49, %s5066_s23  ;;  %v994_v45 = vrot.slane %v992_v62, 7  ;;  %v6165_v49 = vld [vmem:[#allocation2 + $0xf0] sm:$0x80] }
  0xcd   :  { %7772 = vst [vmem:[#allocation60_spill] sm:$0xff] %v6165_v49  ;;  %2395 = vst.msk [vmem:[#allocation2 + $0xf0] sm:$0xff] %vm12_vm0, %v7713_v1  ;;  %v3339_v30 = vrot.slane %v3337_v63, 7 }
  0xce   :  { %v6155_v19 = vpop.permute.xlu1 %1345  ;;  %v6160_v23 = vpop.permute.xlu0 %1347 }
  0xcf   :  { %7770 = vst [vmem:[#allocation58_spill] sm:$0xff] %v6155_v19  ;;  %7771 = vst [vmem:[#allocation59_spill] sm:$0xff] %v6160_v23  ;;  %v3343_v23 = vrot.slane %v3341_v16, 7 }
  0xd0   :  { %3674 = vrot.lane.b32.xlu1 %v2831_v38, %s5067_s29  ;;  %3706 = vrot.lane.b32.xlu0 %v2995_v40, %s5068_s16  ;;  %v3344_v38 = vshll.u32 %v6147_v27, 16  ;;  %v990_v40 = vrot.slane %v988_v56, 7  ;;  %v1183_v56 = vshll.u32 %v5828_v13, 16  ;;  %v1181_v13 = vor.u32 %v1180_v20, %v992_v62 }
  0xd2   :  { %v6168_v19 = vpop.permute.xlu1 %1349  ;;  %v6175_v41 = vpop.permute.xlu0 %1351  ;;  %v6187_v47 = vor.u32 %v3344_v38, %v3343_v23  ;;  %v3529_v63 = vrot.slane %v3344_v38, 1 }
  0xd3   :  { %7773 = vst [vmem:[#allocation61_spill] sm:$0xff] %v6168_v19  ;;  %v997_v19 = vor.u32 %v995_v12, %v994_v45  ;;  %v1185_v12 = vrot.slane %v1183_v56, 1 }
  0xd4   :  { %1405 = vrot.lane.b32.xlu1 %v5271_v22, %s5069_s28  ;;  %3754 = vrot.lane.b32.xlu0 %v6064_v31, %s5069_s28  ;;  %7774 = vst [vmem:[#allocation62_spill] sm:$0xff] %v6187_v47  ;;  %v3495_v22 = vld [vmem:[#allocation2 + $0x88] sm:$0x1]  ;;  %v3347_v34 = vsel %vm244_vm2, %v3339_v30, %v6187_v47  ;;  %v2924_v30 = vld [vmem:[#allocation2 + $0x78] sm:$0x80]  ;;  %v6211_v38 = vor.u32 %v3529_v63, %v3341_v16 }
  0xd5   :  { %v998_v2 = vsel %vm244_vm2, %v990_v40, %v997_v19  ;;  %v3532_v23 = vshll.u32 %v3495_v22, 16  ;;  %v2792_v19 = vld [vmem:[#allocation2 + $0x70] sm:$0x1]  ;;  %v3144_v63 = vld [vmem:[#allocation2 + $0x88] sm:$0x1] }
  0xd6   :  { %v6183_v44 = vpop.permute.xlu1 %1353  ;;  %v6189_v49 = vpop.permute.xlu0 %1355  ;;  %v2835_v22 = vshll.u32 %v2792_v19, 16 }
  0xd8   :  { %1437 = vrot.lane.b32.xlu1 %v833_v55, %s5070_s6  ;;  %3786 = vrot.lane.b32.xlu0 %v3183_v25, %s5070_s6  ;;  %v3534_v25 = vrot.slane %v3532_v23, 1  ;;  %v2837_v16 = vrot.slane %v2835_v22, 1  ;;  %v6230_v23 = vld [vmem:[#allocation2 + $0x98] sm:$0xff] }
  0xda   :  { %v6195_v45 = vpop.permute.xlu1 %1357  ;;  %v6203_v55 = vpop.permute.xlu0 %1359  ;;  %v3535_v20 = vsel %vm453_vm1, %v6211_v38, %v3534_v25  ;;  %v2838_v19 = vsel %vm453_vm1, %v6128_v8, %v2837_v16  ;;  %v3353_v25 = vshrl.u32 %v6230_v23, 16  ;;  %v1000_v8 = vshrl.u32 %v5849_v46, 16 }
  0xdb   :  { %7776 = vst [vmem:[#allocation64_spill] sm:$0xff] %v6203_v55  ;;  %v2997_v55 = vshrl.u32 %v2924_v30, 16  ;;  %v3187_v30 = vshll.u32 %v3144_v63, 16 }
  0xdc   :  { %1469 = vrot.lane.b32.xlu1 %v998_v2, %s5071_s15  ;;  %3818 = vrot.lane.b32.xlu0 %v3347_v34, %s5071_s15  ;;  %v1186_v2 = vsel %vm453_vm1, %v1181_v13, %v1185_v12  ;;  %v837_v13 = vshll.u32 %v5826_v26, 16  ;;  %v6246_v26 = vld [vmem:[#allocation2 + $0x108] sm:$0x80] }
  0xdd   :  { %v2999_v34 = vrot.slane %v2997_v55, 7  ;;  %7784 = vst [vmem:[#allocation72_spill] sm:$0xff] %v6246_v26 }
  0xde   :  { %v6209_v40 = vpop.permute.xlu1 %1361  ;;  %v6213_v51 = vpop.permute.xlu0 %1363 }
  0xdf   :  { %7777 = vst [vmem:[#allocation65_spill] sm:$0xff] %v6209_v40  ;;  %7778 = vst [vmem:[#allocation66_spill] sm:$0xff] %v6213_v51  ;;  %v3007_v55 = vsel %vm244_vm2, %v2999_v34, %v6187_v47  ;;  %v3189_v34 = vrot.slane %v3187_v30, 1  ;;  %v2564_v30 = vld [vmem:[#allocation2] sm:$0x80]  ;;  %v6300_v47 = vld [vmem:[#allocation2 + $0xb0] sm:$0xff] }
  0xe0   :  { %1517 = vrot.lane.b32.xlu1 %v5637_v50, %s5072_s24  ;;  %3866 = vrot.lane.b32.xlu0 %v6147_v27, %s5072_s24 }
  0xe2   :  { %v6220_v62 = vpop.permute.xlu1 %1365  ;;  %v6224_v56 = vpop.permute.xlu0 %1367 }
  0xe3   :  { %7779 = vst [vmem:[#allocation67_spill] sm:$0xff] %v6220_v62  ;;  %7780 = vst [vmem:[#allocation68_spill] sm:$0xff] %v6224_v56  ;;  %v6279_v56 = vld [vmem:[#allocation2 + $0x118] sm:$0x1]  ;;  %v2793_v62 = vld [vmem:[#allocation2 + $0x88] sm:$0x1] }
  0xe4   :  { %1549 = vrot.lane.b32.xlu1 %v1186_v2, %s5073_s3  ;;  %3898 = vrot.lane.b32.xlu0 %v3535_v20, %s5073_s3  ;;  %v3276_v2 = vld [vmem:[#allocation2 + $0x90] sm:$0x80]  ;;  %v839_v20 = vrot.slane %v837_v13, 1  ;;  %v1002_v13 = vrot.slane %v1000_v8, 7  ;;  %v2597_v8 = vshrl.u32 %v2564_v30, 16 }
  0xe5   :  { %v3349_v63 = vshrl.u32 %v3276_v2, 16  ;;  %v3190_v2 = vsel %vm453_vm1, %v6211_v38, %v3189_v34 }
  0xe6   :  { %v6228_v50 = vpop.permute.xlu1 %1369  ;;  %v6235_v12 = vpop.permute.xlu0 %1371  ;;  %v2599_v30 = vrot.slane %v2597_v8, 7 }
  0xe7   :  { %7781 = vst [vmem:[#allocation69_spill] sm:$0xff] %v6228_v50  ;;  %7782 = vst [vmem:[#allocation70_spill] sm:$0xff] %v6235_v12  ;;  %v3355_v12 = vrot.slane %v3353_v25, 7  ;;  %v3356_v50 = vshll.u32 %v6230_v23, 16 }
  0xe8   :  { %3644 = vrot.lane.b32.xlu1 %v6064_v31, %s5066_s23  ;;  %3676 = vrot.lane.b32.xlu0 %v2838_v19, %s5067_s29  ;;  %v6251_v31 = vld [vmem:[#allocation2 + $0x108] sm:$0x80]  ;;  %v840_v19 = vsel %vm453_vm1, %v5469_v10, %v839_v20  ;;  %v1010_v10 = vsel %vm244_vm2, %v1002_v13, %v5660_v11  ;;  %v1190_v20 = vshll.u32 %v5885_v37, 16  ;;  %v2926_v13 = vld [vmem:[#allocation2 + $0x90] sm:$0x80] }
  0xe9   :  { %2398 = vst.msk [vmem:[#allocation2 + $0x108] sm:$0xff] %vm12_vm0, %v7713_v1  ;;  %v3536_v34 = vrot.slane %v3356_v50, 1  ;;  %v3009_v40 = vshrl.u32 %v2926_v13, 16 }
  0xea   :  { %v6243_v22 = vpop.permute.xlu1 %1373  ;;  %v6248_v16 = vpop.permute.xlu0 %1375  ;;  %v1192_v11 = vrot.slane %v1190_v20, 1  ;;  %v7790_v20 = vld [vmem:[#allocation19_spill] sm:$0xff] }
  0xeb   :  { %7783 = vst [vmem:[#allocation71_spill] sm:$0xff] %v6243_v22  ;;  %7785 = vst [vmem:[#allocation73_spill] sm:$0xff] %v6248_v16  ;;  %v3351_v16 = vrot.slane %v3349_v63, 7  ;;  %v6268_v22 = vor.u32 %v3356_v50, %v3355_v12  ;;  %v6277_v12 = vld [vmem:[#allocation2 + $0x118] sm:$0x1] }
  0xec   :  { %3708 = vrot.lane.b32.xlu1 %v3007_v55, %s5068_s16  ;;  %1407 = vrot.lane.b32.xlu0 %v5286_v28, %s5069_s28  ;;  %7788 = vst [vmem:[#allocation76_spill] sm:$0xff] %v6277_v12  ;;  %2400 = vst.msk [vmem:[#allocation2 + $0x118] sm:$0xff] %vm12_vm0, %v7713_v1 }
  0xed   :  { %v3359_v26 = vsel %vm244_vm2, %v3351_v16, %v6268_v22  ;;  %v6285_v16 = vor.u32 %v3536_v34, %v3353_v25  ;;  %v3011_v34 = vrot.slane %v3009_v40, 7  ;;  %v1577_v40 = vsel %vm12_vm0, %v5677_v6, %v5957_v17 }
  0xee   :  { %v6258_v46 = vpop.permute.xlu1 %1377  ;;  %v6262_v55 = vpop.permute.xlu0 %1379 }
  0xef   :  { %7786 = vst [vmem:[#allocation74_spill] sm:$0xff] %v6258_v46  ;;  %7787 = vst [vmem:[#allocation75_spill] sm:$0xff] %v6262_v55  ;;  %v3496_v46 = vld [vmem:[#allocation2 + $0xa0] sm:$0x1] }
  0xf0   :  { %3756 = vrot.lane.b32.xlu1 %v6147_v27, %s5069_s28  ;;  %1439 = vrot.lane.b32.xlu0 %v840_v19, %s5070_s6  ;;  %v3539_v63 = vshll.u32 %v3496_v46, 16  ;;  %v2842_v46 = vshll.u32 %v2793_v62, 16 }
  0xf2   :  { %v3637_v28 = vpop.permute.xlu1 %3636  ;;  %v3669_v55 = vpop.permute.xlu0 %3668  ;;  %v3541_v50 = vrot.slane %v3539_v63, 1  ;;  %v2844_v8 = vrot.slane %v2842_v46, 1  ;;  %v3145_v63 = vld [vmem:[#allocation2 + $0xa0] sm:$0x1]  ;;  %v1625_v46 = vsel %vm1623_vm4, %v1577_v40, %v6070_v58  ;;  %v6326_v40 = vld [vmem:[#allocation2 + $0x120] sm:$0x80] }
  0xf3   :  { %v1658_v6 = vsel %vm1656_vm5, %v1625_v46, %v6175_v41 }
  0xf4   :  { %3788 = vrot.lane.b32.xlu1 %v3190_v2, %s5070_s6  ;;  %1471 = vrot.lane.b32.xlu0 %v1010_v10, %s5071_s15  ;;  %v7789_v10 = vld [vmem:[#allocation10_spill] sm:$0xff]  ;;  %v3542_v25 = vsel %vm453_vm1, %v6285_v16, %v3541_v50  ;;  %v3194_v50 = vshll.u32 %v3145_v63, 16 }
  0xf5   :  { %v1193_v51 = vsel %vm453_vm1, %v7789_v10, %v1192_v11 }
  0xf6   :  { %v3701_v19 = vpop.permute.xlu1 %3700  ;;  %v1400_v37 = vpop.permute.xlu0 %1399 }
  0xf8   :  { %3820 = vrot.lane.b32.xlu1 %v3359_v26, %s5071_s15  ;;  %1519 = vrot.lane.b32.xlu0 %v5288_v29, %s5072_s24  ;;  %v2607_v26 = vsel %vm244_vm2, %v2599_v30, %v7790_v20  ;;  %v2845_v30 = vsel %vm453_vm1, %v6211_v38, %v2844_v8  ;;  %v3019_v38 = vsel %vm244_vm2, %v3011_v34, %v6268_v22  ;;  %v6321_v8 = vld [vmem:[#allocation2 + $0x120] sm:$0x80] }
  0xf9   :  { %v3926_v11 = vsel %vm12_vm0, %v2607_v26, %v3637_v28  ;;  %v3365_v26 = vshrl.u32 %v6300_v47, 16  ;;  %2401 = vst.msk [vmem:[#allocation2 + $0x120] sm:$0xff] %vm12_vm0, %v7713_v1 }
  0xfa   :  { %v3749_v2 = vpop.permute.xlu1 %3748  ;;  %v1432_v12 = vpop.permute.xlu0 %1431  ;;  %v3973_v20 = vsel %vm1623_vm4, %v3926_v11, %v3669_v55  ;;  %v3196_v11 = vrot.slane %v3194_v50, 1 }
  0xfb   :  { %v4005_v55 = vsel %vm1656_vm5, %v3973_v20, %v3701_v19 }
  0xfc   :  { %3868 = vrot.lane.b32.xlu1 %v6230_v23, %s5072_s24  ;;  %1551 = vrot.lane.b32.xlu0 %v1193_v51, %s5073_s3  ;;  %v844_v51 = vshll.u32 %v5881_v43, 16  ;;  %v3278_v43 = vld [vmem:[#allocation2 + $0xa8] sm:$0x80] }
  0xfd   :  { %v3361_v41 = vshrl.u32 %v3278_v43, 16 }
  0xfe   :  { %v3781_v62 = vpop.permute.xlu1 %3780  ;;  %v1464_v13 = vpop.permute.xlu0 %1463  ;;  %v846_v58 = vrot.slane %v844_v51, 1  ;;  %v3368_v51 = vshll.u32 %v6300_v47, 16 }
 0x100   :  { %3900 = vrot.lane.b32.xlu1 %v3542_v25, %s5073_s3  ;;  %3646 = vrot.lane.b32.xlu0 %v6147_v27, %s5066_s23  ;;  %v1012_v27 = vshrl.u32 %v5928_v9, 16  ;;  %v1691_v25 = vsel %vm1689_vm6, %v1658_v6, %v1400_v37  ;;  %v3367_v37 = vrot.slane %v3365_v26, 7  ;;  %v847_v20 = vsel %vm453_vm1, %v7789_v10, %v846_v58  ;;  %v2566_v6 = vld [vmem:[#allocation2 + $0x18] sm:$0x80] }
 0x101   :  { %v1724_v34 = vsel %vm1722_vm7, %v1691_v25, %v1432_v12  ;;  %v1197_v58 = vshll.u32 %v5935_v36, 16 }
 0x102   :  { %v3813_v28 = vpop.permute.xlu1 %3812  ;;  %v1512_v17 = vpop.permute.xlu0 %1511  ;;  %v1757_v9 = vsel %vm1755_vm8, %v1724_v34, %v1464_v13  ;;  %v1014_v46 = vrot.slane %v1012_v27, 7  ;;  %v3497_v27 = vld [vmem:[#allocation2 + $0xb8] sm:$0x1] }
 0x103   :  { %v1790_v19 = vsel %vm1788_vm9, %v1757_v9, %v1512_v17  ;;  %v6350_v17 = vor.u32 %v3368_v51, %v3367_v37  ;;  %v6364_v9 = vld [vmem:[#allocation2 + $0x130] sm:$0x1]  ;;  %v1199_v36 = vrot.slane %v1197_v58, 1 }
 0x104   :  { %3678 = vrot.lane.b32.xlu1 %v2845_v30, %s5067_s29  ;;  %3710 = vrot.lane.b32.xlu0 %v3019_v38, %s5068_s16  ;;  %v4037_v30 = vsel %vm1689_vm6, %v4005_v55, %v3749_v2  ;;  %v1022_v25 = vsel %vm244_vm2, %v1014_v46, %v5689_v61  ;;  %v2609_v55 = vshrl.u32 %v2566_v6, 16  ;;  %v2794_v61 = vld [vmem:[#allocation2 + $0xa0] sm:$0x1] }
 0x105   :  { %v4069_v12 = vsel %vm1722_vm7, %v4037_v30, %v3781_v62  ;;  %v6362_v30 = vld [vmem:[#allocation2 + $0x130] sm:$0x1] }
 0x106   :  { %v3861_v63 = vpop.permute.xlu1 %3860  ;;  %v1544_v50 = vpop.permute.xlu0 %1543  ;;  %v4101_v2 = vsel %vm1755_vm8, %v4069_v12, %v3813_v28  ;;  %v3363_v28 = vrot.slane %v3361_v41, 7  ;;  %v3546_v41 = vshll.u32 %v3497_v27, 16  ;;  %2403 = vst.msk [vmem:[#allocation2 + $0x130] sm:$0xff] %vm12_vm0, %v7713_v1 }
 0x107   :  { %v1823_v13 = vsel %vm1821_vm10, %v1790_v19, %v1544_v50  ;;  %v4133_v38 = vsel %vm1788_vm9, %v4101_v2, %v3861_v63  ;;  %v2928_v19 = vld [vmem:[#allocation2 + $0xa8] sm:$0x80]  ;;  %v2611_v50 = vrot.slane %v2609_v55, 7  ;;  %v2849_v2 = vshll.u32 %v2794_v61, 16 }
 0x108   :  { %1409 = vrot.lane.b32.xlu1 %v5288_v29, %s5069_s28  ;;  %4738 = vmatmul.mubr.msk.bf16.vlgmr.msra.gmra.mrb[0].mxu0 %vm1908_vm11, %v1823_v13  ;;  %v3197_v29 = vsel %vm453_vm1, %v6285_v16, %v3196_v11  ;;  %v3371_v63 = vsel %vm244_vm2, %v3363_v28, %v6350_v17  ;;  %v3543_v11 = vrot.slane %v3368_v51, 1  ;;  %v3548_v46 = vrot.slane %v3546_v41, 1 }
 0x109   :  { %3758 = vrot.lane.b32.xlu0 %v6230_v23, %s5069_s28  ;;  %1990 = vmatprep.mubr.bf16.mxu0 %v7713_v1  ;;  %v2619_v6 = vsel %vm244_vm2, %v2611_v50, %v5851_v3  ;;  %v1580_v41 = vsel %vm12_vm0, %v5693_v42, %v5975_v59  ;;  %v3280_v50 = vld [vmem:[#allocation2 + $0xc0] sm:$0x80] }
 0x10a   :  { %v3893_v62 = vpop.permute.xlu1 %3892  ;;  %v3639_v10 = vpop.permute.xlu0 %3638  ;;  %v6372_v51 = vor.u32 %v3543_v11, %v3365_v26  ;;  %v6388_v11 = vld [vmem:[#allocation2 + $0xc8] sm:$0xff] }
 0x10b   :  { %v4165_v43 = vsel %vm1821_vm10, %v4133_v38, %v3893_v62  ;;  %v3021_v62 = vshrl.u32 %v2928_v19, 16  ;;  %v3929_v58 = vsel %vm12_vm0, %v2619_v6, %v3639_v10  ;;  %v1627_v10 = vsel %vm1623_vm4, %v1580_v41, %v6078_v5  ;;  %v6408_v5 = vld [vmem:[#allocation2 + $0x138] sm:$0x80] }
 0x10c   :  { %1441 = vrot.lane.b32.xlu1 %v847_v20, %s5070_s6  ;;  %4822 = vmatmul.mubr.msk.bf16.vlgmr.msra.gmra.mrb[0].mxu1 %vm1908_vm11, %v4165_v43  ;;  %v7791_v20 = vld [vmem:[#allocation11_spill] sm:$0xff]  ;;  %v3549_v26 = vsel %vm453_vm1, %v6372_v51, %v3548_v46  ;;  %v1660_v46 = vsel %vm1656_vm5, %v1627_v10, %v6183_v44  ;;  %v6413_v44 = vld [vmem:[#allocation2 + $0x138] sm:$0x80] }
 0x10d   :  { %4331 = vmatprep.mubr.bf16.mxu1 %v7713_v1  ;;  %3790 = vrot.lane.b32.xlu0 %v3197_v29, %s5070_s6  ;;  %v1200_v38 = vsel %vm453_vm1, %v7791_v20, %v1199_v36  ;;  %v2851_v29 = vrot.slane %v2849_v2, 1  ;;  %v3023_v27 = vrot.slane %v3021_v62, 7  ;;  %v1024_v2 = vshrl.u32 %v6005_v21, 16  ;;  %2404 = vst.msk [vmem:[#allocation2 + $0x138] sm:$0xff] %vm12_vm0, %v7713_v1 }
 0x10e   :  { %v3671_v34 = vpop.permute.xlu1 %3670  ;;  %v3703_v37 = vpop.permute.xlu0 %3702  ;;  %v3380_v21 = vshll.u32 %v6388_v11, 16 }
 0x10f   :  { %v2852_v3 = vsel %vm453_vm1, %v6285_v16, %v2851_v29  ;;  %v3975_v19 = vsel %vm1623_vm4, %v3929_v58, %v3671_v34  ;;  %v3377_v16 = vshrl.u32 %v6388_v11, 16 }
 0x110   :  { %1473 = vrot.lane.b32.xlu1 %v1022_v25, %s5071_s15  ;;  %v3146_v25 = vld [vmem:[#allocation2 + $0xb8] sm:$0x1]  ;;  %v4007_v34 = vsel %vm1656_vm5, %v3975_v19, %v3703_v37  ;;  %v3498_v19 = vld [vmem:[#allocation2 + $0xd0] sm:$0x1] }
 0x111   :  { %3822 = vrot.lane.b32.xlu0 %v3371_v63, %s5071_s15  ;;  %v851_v63 = vshll.u32 %v5933_v4, 16  ;;  %v3201_v36 = vshll.u32 %v3146_v25, 16  ;;  %v3031_v4 = vsel %vm244_vm2, %v3023_v27, %v6350_v17 }
 0x112   :  { %v1402_v12 = vpop.permute.xlu1 %1401  ;;  %v3751_v13 = vpop.permute.xlu0 %3750 }
 0x113   :  { %v853_v59 = vrot.slane %v851_v63, 1  ;;  %v3203_v6 = vrot.slane %v3201_v36, 1  ;;  %v4039_v29 = vsel %vm1689_vm6, %v4007_v34, %v3751_v13  ;;  %v1026_v63 = vrot.slane %v1024_v2, 7  ;;  %v6447_v34 = vld [vmem:[#allocation2 + $0x148] sm:$0x1] }
 0x114   :  { %1521 = vrot.lane.b32.xlu1 %v5302_v32, %s5072_s24  ;;  %v3553_v2 = vshll.u32 %v3498_v19, 16  ;;  %v6471_v19 = vld [vmem:[#allocation2 + $0xe0] sm:$0xff] }
 0x115   :  { %3870 = vrot.lane.b32.xlu0 %v6300_v47, %s5072_s24  ;;  %v854_v58 = vsel %vm453_vm1, %v7791_v20, %v853_v59  ;;  %v3204_v36 = vsel %vm453_vm1, %v6372_v51, %v3203_v6 }
 0x116   :  { %v1434_v43 = vpop.permute.xlu1 %1433  ;;  %v3783_v28 = vpop.permute.xlu0 %3782 }
 0x117   :  { %v4071_v37 = vsel %vm1722_vm7, %v4039_v29, %v3783_v28 }
 0x118   :  { %1553 = vrot.lane.b32.xlu1 %v1200_v38, %s5073_s3 }
 0x119   :  { %3902 = vrot.lane.b32.xlu0 %v3549_v26, %s5073_s3  ;;  %v3373_v26 = vshrl.u32 %v3280_v50, 16  ;;  %v1204_v50 = vshll.u32 %v6035_v48, 16 }
 0x11a   :  { %v1466_v55 = vpop.permute.xlu1 %1465  ;;  %v3815_v61 = vpop.permute.xlu0 %3814 }
 0x11b   :  { %v4103_v13 = vsel %vm1755_vm8, %v4071_v37, %v3815_v61  ;;  %v3375_v20 = vrot.slane %v3373_v26, 7  ;;  %v1206_v48 = vrot.slane %v1204_v50, 1  ;;  %v2930_v26 = vld [vmem:[#allocation2 + $0xc0] sm:$0x80] }
 0x11c   :  { %3648 = vrot.lane.b32.xlu1 %v6230_v23, %s5066_s23  ;;  %v1693_v23 = vsel %vm1689_vm6, %v1660_v46, %v1402_v12  ;;  %v3379_v12 = vrot.slane %v3377_v16, 7 }
 0x11d   :  { %3680 = vrot.lane.b32.xlu0 %v2852_v3, %s5067_s29  ;;  %v1726_v38 = vsel %vm1722_vm7, %v1693_v23, %v1434_v43  ;;  %v3550_v23 = vrot.slane %v3380_v21, 1 }
 0x11e   :  { %v1514_v42 = vpop.permute.xlu1 %1513  ;;  %v3863_v62 = vpop.permute.xlu0 %3862  ;;  %v1759_v27 = vsel %vm1755_vm8, %v1726_v38, %v1466_v55  ;;  %v6435_v10 = vor.u32 %v3380_v21, %v3379_v12  ;;  %v6449_v38 = vld [vmem:[#allocation2 + $0x148] sm:$0x1]  ;;  %v3555_v12 = vrot.slane %v3553_v2, 1 }
 0x11f   :  { %v1792_v43 = vsel %vm1788_vm9, %v1759_v27, %v1514_v42  ;;  %v4135_v3 = vsel %vm1788_vm9, %v4103_v13, %v3863_v62  ;;  %v2795_v62 = vld [vmem:[#allocation2 + $0xb8] sm:$0x1]  ;;  %2406 = vst.msk [vmem:[#allocation2 + $0x148] sm:$0xff] %vm12_vm0, %v7713_v1  ;;  %v6455_v27 = vor.u32 %v3550_v23, %v3377_v16  ;;  %v3282_v23 = vld [vmem:[#allocation2 + $0xd8] sm:$0x80] }
 0x120   :  { %3712 = vrot.lane.b32.xlu1 %v3031_v4, %s5068_s16  ;;  %v1034_v4 = vsel %vm244_vm2, %v1026_v63, %v5706_v35  ;;  %v3383_v59 = vsel %vm244_vm2, %v3375_v20, %v6435_v10  ;;  %v2856_v21 = vshll.u32 %v2795_v62, 16  ;;  %v858_v20 = vshll.u32 %v6031_v39, 16 }
 0x121   :  { %1411 = vrot.lane.b32.xlu0 %v5302_v32, %s5069_s28  ;;  %v2568_v32 = vld [vmem:[#allocation2 + $0x30] sm:$0x80]  ;;  %v3556_v16 = vsel %vm453_vm1, %v6455_v27, %v3555_v12  ;;  %v1036_v62 = vshrl.u32 %v6087_v18, 16  ;;  %v3385_v12 = vshrl.u32 %v3282_v23, 16  ;;  %v3392_v18 = vshll.u32 %v6471_v19, 16 }
 0x122   :  { %v1546_v25 = vpop.permute.xlu1 %1545  ;;  %v3895_v41 = vpop.permute.xlu0 %3894  ;;  %v2621_v46 = vshrl.u32 %v2568_v32, 16  ;;  %v2858_v63 = vrot.slane %v2856_v21, 1 }
 0x123   :  { %v1825_v55 = vsel %vm1821_vm10, %v1792_v43, %v1546_v25  ;;  %v4167_v28 = vsel %vm1821_vm10, %v4135_v3, %v3895_v41  ;;  %v7792_v43 = vld [vmem:[#allocation12_spill] sm:$0xff] }
 0x124   :  { %3760 = vrot.lane.b32.xlu1 %v6300_v47, %s5069_s28  ;;  %4739 = vmatmul.mubr.msk.bf16.gmra.mrb[4].mxu0 %vm1908_vm11, %v1825_v55  ;;  %v2623_v29 = vrot.slane %v2621_v46, 7  ;;  %v1207_v25 = vsel %vm453_vm1, %v7792_v43, %v1206_v48 }
 0x125   :  { %2000 = vmatprep.mubr.bf16.mxu0 %v7713_v1  ;;  %1443 = vrot.lane.b32.xlu0 %v854_v58, %s5070_s6  ;;  %v3033_v58 = vshrl.u32 %v2930_v26, 16 }
 0x126   :  { %4823 = vmatmul.mubr.msk.bf16.gmra.mrb[4].mxu1 %vm1908_vm11, %v4167_v28  ;;  %v3641_v61 = vpop.permute.xlu1 %3640  ;;  %v3673_v42 = vpop.permute.xlu0 %3672  ;;  %v2631_v55 = vsel %vm244_vm2, %v2623_v29, %v5900_v15  ;;  %v3147_v28 = vld [vmem:[#allocation2 + $0xd0] sm:$0x1]  ;;  %v2859_v15 = vsel %vm453_vm1, %v6372_v51, %v2858_v63  ;;  %v3389_v51 = vshrl.u32 %v6471_v19, 16  ;;  %v1038_v63 = vrot.slane %v1036_v62, 7 }
 0x127   :  { %4341 = vmatprep.mubr.bf16.mxu1 %v7713_v1  ;;  %v3035_v41 = vrot.slane %v3033_v58, 7  ;;  %v3932_v32 = vsel %vm12_vm0, %v2631_v55, %v3641_v61  ;;  %v3208_v46 = vshll.u32 %v3147_v28, 16 }
 0x128   :  { %3792 = vrot.lane.b32.xlu1 %v3204_v36, %s5070_s6 }
 0x129   :  { %1475 = vrot.lane.b32.xlu0 %v1034_v4, %s5071_s15  ;;  %v1583_v4 = vsel %vm12_vm0, %v5682_v0, %v5964_v54  ;;  %v3043_v39 = vsel %vm244_vm2, %v3035_v41, %v6435_v10  ;;  %v860_v54 = vrot.slane %v858_v20, 1  ;;  %v3210_v29 = vrot.slane %v3208_v46, 1 }
 0x12a   :  { %v3705_v35 = vpop.permute.xlu1 %3704  ;;  %v1404_v6 = vpop.permute.xlu0 %1403  ;;  %v1629_v61 = vsel %vm1623_vm4, %v1583_v4, %v6084_v52  ;;  %v6491_v52 = vld [vmem:[#allocation2 + $0x150] sm:$0x80]  ;;  %v1046_v4 = vsel %vm244_vm2, %v1038_v63, %v5739_v14  ;;  %v3148_v63 = vld [vmem:[#allocation2 + $0xe8] sm:$0x1] }
 0x12b   :  { %v1662_v2 = vsel %vm1656_vm5, %v1629_v61, %v6189_v49  ;;  %v6496_v49 = vld [vmem:[#allocation2 + $0x150] sm:$0x80]  ;;  %v861_v55 = vsel %vm453_vm1, %v7792_v43, %v860_v54  ;;  %v3387_v43 = vrot.slane %v3385_v12, 7 }
 0x12c   :  { %3824 = vrot.lane.b32.xlu1 %v3383_v59, %s5071_s15  ;;  %v3977_v59 = vsel %vm1623_vm4, %v3932_v32, %v3673_v42  ;;  %2407 = vst.msk [vmem:[#allocation2 + $0x150] sm:$0xff] %vm12_vm0, %v7713_v1  ;;  %v2570_v32 = vld [vmem:[#allocation2 + $0x48] sm:$0x80] }
 0x12d   :  { %1523 = vrot.lane.b32.xlu0 %v5304_v33, %s5072_s24  ;;  %v4009_v42 = vsel %vm1656_vm5, %v3977_v59, %v3705_v35  ;;  %v2633_v46 = vshrl.u32 %v2570_v32, 16 }
 0x12e   :  { %v3753_v37 = vpop.permute.xlu1 %3752  ;;  %v1436_v13 = vpop.permute.xlu0 %1435 }
 0x12f   :  { %v4041_v21 = vsel %vm1689_vm6, %v4009_v42, %v3753_v37  ;;  %v2932_v42 = vld [vmem:[#allocation2 + $0xd8] sm:$0x80] }
 0x130   :  { %3872 = vrot.lane.b32.xlu1 %v6388_v11, %s5072_s24 }
 0x131   :  { %1555 = vrot.lane.b32.xlu0 %v1207_v25, %s5073_s3 }
 0x132   :  { %v3785_v3 = vpop.permute.xlu1 %3784  ;;  %v1468_v36 = vpop.permute.xlu0 %1467 }
 0x133   :  { %v4073_v35 = vsel %vm1722_vm7, %v4041_v21, %v3785_v3 }
 0x134   :  { %3904 = vrot.lane.b32.xlu1 %v3556_v16, %s5073_s3 }
 0x135   :  { %3650 = vrot.lane.b32.xlu0 %v6300_v47, %s5066_s23  ;;  %v1695_v47 = vsel %vm1689_vm6, %v1662_v2, %v1404_v6  ;;  %v3391_v6 = vrot.slane %v3389_v51, 7  ;;  %v6530_v2 = vld [vmem:[#allocation2 + $0x160] sm:$0x1] }
 0x136   :  { %v3817_v50 = vpop.permute.xlu1 %3816  ;;  %v1516_v0 = vpop.permute.xlu0 %1515  ;;  %v1728_v48 = vsel %vm1722_vm7, %v1695_v47, %v1436_v13  ;;  %v2796_v47 = vld [vmem:[#allocation2 + $0xd0] sm:$0x1] }
 0x137   :  { %v1761_v25 = vsel %vm1755_vm8, %v1728_v48, %v1468_v36  ;;  %v4105_v37 = vsel %vm1755_vm8, %v4073_v35, %v3817_v50  ;;  %v6518_v36 = vor.u32 %v3392_v18, %v3391_v6  ;;  %v1211_v50 = vshll.u32 %v6118_v53, 16  ;;  %v7794_v6 = vld [vmem:[#allocation13_spill] sm:$0xff] }
 0x138   :  { %3682 = vrot.lane.b32.xlu1 %v2859_v15, %s5067_s29  ;;  %v1794_v58 = vsel %vm1788_vm9, %v1761_v25, %v1516_v0  ;;  %v3499_v15 = vld [vmem:[#allocation2 + $0xe8] sm:$0x1]  ;;  %v6532_v0 = vld [vmem:[#allocation2 + $0x160] sm:$0x1]  ;;  %v2635_v48 = vrot.slane %v2633_v46, 7  ;;  %v2863_v12 = vshll.u32 %v2796_v47, 16 }
 0x139   :  { %3714 = vrot.lane.b32.xlu0 %v3043_v39, %s5068_s16  ;;  %v3395_v59 = vsel %vm244_vm2, %v3387_v43, %v6518_v36  ;;  %v3557_v39 = vrot.slane %v3392_v18, 1  ;;  %v3560_v23 = vshll.u32 %v3499_v15, 16  ;;  %2409 = vst.msk [vmem:[#allocation2 + $0x160] sm:$0xff] %vm12_vm0, %v7713_v1  ;;  %v1213_v53 = vrot.slane %v1211_v50, 1  ;;  %v7793_v25 = vld [vmem:[#allocation3_spill] sm:$0xff]  ;;  %v7796_v43 = vld [vmem:[#allocation33_spill] sm:$0xff] }
 0x13a   :  { %v3865_v26 = vpop.permute.xlu1 %3864  ;;  %v1548_v13 = vpop.permute.xlu0 %1547  ;;  %v3045_v35 = vshrl.u32 %v2932_v42, 16  ;;  %v7797_v15 = vld [vmem:[#allocation21_spill] sm:$0xff]  ;;  %v3215_v46 = vshll.u32 %v3148_v63, 16  ;;  %v3284_v47 = vld [vmem:[#allocation2 + $0xf0] sm:$0x80] }
 0x13b   :  { %v1827_v16 = vsel %vm1821_vm10, %v1794_v58, %v1548_v13  ;;  %v4137_v41 = vsel %vm1788_vm9, %v4105_v37, %v3865_v26  ;;  %v6538_v26 = vor.u32 %v3557_v39, %v3389_v51  ;;  %v1214_v18 = vsel %vm453_vm1, %v7794_v6, %v1213_v53  ;;  %v6582_v63 = vld [vmem:[#allocation2 + $0x168] sm:$0x80] }
 0x13c   :  { %1413 = vrot.lane.b32.xlu1 %v5304_v33, %s5069_s28  ;;  %4740 = vmatmul.mubr.msk.bf16.gmra.mrb[8].mxu0 %vm1908_vm11, %v1827_v16  ;;  %v3211_v33 = vsel %vm453_vm1, %v6455_v27, %v3210_v29  ;;  %v3562_v29 = vrot.slane %v3560_v23, 1  ;;  %v2643_v13 = vsel %vm244_vm2, %v2635_v48, %v6020_v24  ;;  %v3047_v16 = vrot.slane %v3045_v35, 7 }
 0x13d   :  { %3762 = vrot.lane.b32.xlu0 %v6388_v11, %s5069_s28  ;;  %2010 = vmatprep.mubr.bf16.mxu0 %v7713_v1  ;;  %v3217_v35 = vrot.slane %v3215_v46, 1  ;;  %v7800_v46 = vld [vmem:[#allocation27_spill] sm:$0xff] }
 0x13e   :  { %v3897_v3 = vpop.permute.xlu1 %3896  ;;  %v3643_v20 = vpop.permute.xlu0 %3642  ;;  %v3563_v51 = vsel %vm453_vm1, %v6538_v26, %v3562_v29  ;;  %v3055_v23 = vsel %vm244_vm2, %v3047_v16, %v6518_v36  ;;  %v1048_v29 = vshrl.u32 %v6170_v60, 16 }
 0x13f   :  { %v4169_v28 = vsel %vm1821_vm10, %v4137_v41, %v3897_v3  ;;  %v3935_v41 = vsel %vm12_vm0, %v2643_v13, %v3643_v20  ;;  %v7798_v20 = vld [vmem:[#allocation47_spill] sm:$0xff]  ;;  %v3397_v13 = vshrl.u32 %v3284_v47, 16 }
 0x140   :  { %1445 = vrot.lane.b32.xlu1 %v861_v55, %s5070_s6  ;;  %4824 = vmatmul.mubr.msk.bf16.gmra.mrb[8].mxu1 %vm1908_vm11, %v4169_v28  ;;  %v2865_v55 = vrot.slane %v2863_v12, 1  ;;  %v7795_v28 = vld [vmem:[#allocation51_spill] sm:$0xff] }
 0x141   :  { %4351 = vmatprep.mubr.bf16.mxu1 %v7713_v1  ;;  %3794 = vrot.lane.b32.xlu0 %v3211_v33, %s5070_s6  ;;  %v865_v32 = vshll.u32 %v7795_v28, 16  ;;  %v6554_v33 = vld [vmem:[#allocation2 + $0xf8] sm:$0xff]  ;;  %v1050_v28 = vrot.slane %v1048_v29, 7  ;;  %v2797_v29 = vld [vmem:[#allocation2 + $0xe8] sm:$0x1] }
 0x142   :  { %v3675_v61 = vpop.permute.xlu1 %3674  ;;  %v3707_v54 = vpop.permute.xlu0 %3706  ;;  %v2866_v24 = vsel %vm453_vm1, %v6455_v27, %v2865_v55  ;;  %v3401_v27 = vshrl.u32 %v6554_v33, 16 }
 0x143   :  { %v3979_v39 = vsel %vm1623_vm4, %v3935_v41, %v3675_v61  ;;  %v867_v48 = vrot.slane %v865_v32, 1 }
 0x144   :  { %1477 = vrot.lane.b32.xlu1 %v1046_v4, %s5071_s15  ;;  %v1586_v4 = vsel %vm12_vm0, %v7797_v15, %v7796_v43  ;;  %v4011_v12 = vsel %vm1656_vm5, %v3979_v39, %v3707_v54  ;;  %v3403_v16 = vrot.slane %v3401_v27, 7  ;;  %v2572_v15 = vld [vmem:[#allocation2 + $0x60] sm:$0x80] }
 0x145   :  { %3826 = vrot.lane.b32.xlu0 %v3395_v59, %s5071_s15  ;;  %v1631_v59 = vsel %vm1623_vm4, %v1586_v4, %v7798_v20  ;;  %v868_v41 = vsel %vm453_vm1, %v7794_v6, %v867_v48  ;;  %v3218_v6 = vsel %vm453_vm1, %v6538_v26, %v3217_v35  ;;  %v1058_v20 = vsel %vm244_vm2, %v1050_v28, %v7800_v46  ;;  %v6613_v48 = vld [vmem:[#allocation2 + $0x178] sm:$0x1] }
 0x146   :  { %v1406_v62 = vpop.permute.xlu1 %1405  ;;  %v3755_v21 = vpop.permute.xlu0 %3754  ;;  %v1664_v53 = vsel %vm1656_vm5, %v1631_v59, %v6195_v45  ;;  %v1218_v59 = vshll.u32 %v6201_v57, 16 }
 0x147   :  { %v4043_v45 = vsel %vm1689_vm6, %v4011_v12, %v3755_v21  ;;  %v6616_v12 = vld [vmem:[#allocation2 + $0x178] sm:$0x1] }
 0x148   :  { %1525 = vrot.lane.b32.xlu1 %v7793_v25, %s5072_s24  ;;  %v1220_v57 = vrot.slane %v1218_v59, 1  ;;  %2412 = vst.msk [vmem:[#allocation2 + $0x178] sm:$0xff] %vm12_vm0, %v7713_v1  ;;  %v7804_v59 = vld [vmem:[#allocation34_spill] sm:$0xff] }
 0x149   :  { %3874 = vrot.lane.b32.xlu0 %v6471_v19, %s5072_s24 }
 0x14a   :  { %v1438_v58 = vpop.permute.xlu1 %1437  ;;  %v3787_v37 = vpop.permute.xlu0 %3786 }
 0x14b   :  { %v4075_v60 = vsel %vm1722_vm7, %v4043_v45, %v3787_v37 }
 0x14c   :  { %1557 = vrot.lane.b32.xlu1 %v1214_v18, %s5073_s3 }
 0x14d   :  { %3906 = vrot.lane.b32.xlu0 %v3563_v51, %s5073_s3  ;;  %v6577_v51 = vld [vmem:[#allocation2 + $0x168] sm:$0x80] }
 0x14e   :  { %v1470_v3 = vpop.permute.xlu1 %1469  ;;  %v3819_v50 = vpop.permute.xlu0 %3818  ;;  %7799 = vst [vmem:[#allocation10_spill] sm:$0xff] %v6577_v51  ;;  %2410 = vst.msk [vmem:[#allocation2 + $0x168] sm:$0xff] %vm12_vm0, %v7713_v1 }
 0x14f   :  { %v4107_v21 = vsel %vm1755_vm8, %v4075_v60, %v3819_v50  ;;  %v3500_v50 = vld [vmem:[#allocation2 + $0x100] sm:$0x1]  ;;  %v7802_v60 = vld [vmem:[#allocation14_spill] sm:$0xff] }
 0x150   :  { %3652 = vrot.lane.b32.xlu1 %v6388_v11, %s5066_s23  ;;  %v1697_v11 = vsel %vm1689_vm6, %v1664_v53, %v1406_v62  ;;  %v3404_v62 = vshll.u32 %v6554_v33, 16 }
 0x151   :  { %3684 = vrot.lane.b32.xlu0 %v2866_v24, %s5067_s29  ;;  %v1730_v61 = vsel %vm1722_vm7, %v1697_v11, %v1438_v58  ;;  %v3399_v24 = vrot.slane %v3397_v13, 7 }
 0x152   :  { %v1518_v42 = vpop.permute.xlu1 %1517  ;;  %v3867_v18 = vpop.permute.xlu0 %3866  ;;  %v1763_v55 = vsel %vm1755_vm8, %v1730_v61, %v1470_v3  ;;  %v6601_v43 = vor.u32 %v3404_v62, %v3403_v16  ;;  %v3564_v53 = vrot.slane %v3404_v62, 1  ;;  %v7801_v16 = vld [vmem:[#allocation4_spill] sm:$0xff] }
 0x153   :  { %v1796_v54 = vsel %vm1788_vm9, %v1763_v55, %v1518_v42  ;;  %v4139_v32 = vsel %vm1788_vm9, %v4107_v21, %v3867_v18  ;;  %v3567_v42 = vshll.u32 %v3500_v50, 16  ;;  %v2934_v18 = vld [vmem:[#allocation2 + $0xf0] sm:$0x80]  ;;  %v2870_v55 = vshll.u32 %v2797_v29, 16 }
 0x154   :  { %3716 = vrot.lane.b32.xlu1 %v3055_v23, %s5068_s16  ;;  %v2645_v23 = vshrl.u32 %v2572_v15, 16  ;;  %v3407_v47 = vsel %vm244_vm2, %v3399_v24, %v6601_v43  ;;  %v6621_v13 = vor.u32 %v3564_v53, %v3401_v27  ;;  %v7803_v15 = vld [vmem:[#allocation63_spill] sm:$0xff] }
 0x155   :  { %1415 = vrot.lane.b32.xlu0 %v7793_v25, %s5069_s28  ;;  %v3569_v45 = vrot.slane %v3567_v42, 1  ;;  %v2872_v28 = vrot.slane %v2870_v55, 1  ;;  %v872_v50 = vshll.u32 %v7803_v15, 16 }
 0x156   :  { %v1550_v58 = vpop.permute.xlu1 %1549  ;;  %v3899_v37 = vpop.permute.xlu0 %3898  ;;  %v2647_v35 = vrot.slane %v2645_v23, 7  ;;  %v7805_v23 = vld [vmem:[#allocation22_spill] sm:$0xff] }
 0x157   :  { %v1829_v3 = vsel %vm1821_vm10, %v1796_v54, %v1550_v58  ;;  %v4171_v25 = vsel %vm1821_vm10, %v4139_v32, %v3899_v37  ;;  %v1221_v54 = vsel %vm453_vm1, %v7802_v60, %v1220_v57  ;;  %v3057_v58 = vshrl.u32 %v2934_v18, 16 }
 0x158   :  { %3764 = vrot.lane.b32.xlu1 %v6471_v19, %s5069_s28  ;;  %4741 = vmatmul.mubr.msk.bf16.gmra.mrb[12].mxu0 %vm1908_vm11, %v1829_v3  ;;  %v2655_v27 = vsel %vm244_vm2, %v2647_v35, %v6104_v7  ;;  %v3570_v3 = vsel %vm453_vm1, %v6621_v13, %v3569_v45  ;;  %v2873_v7 = vsel %vm453_vm1, %v6538_v26, %v2872_v28  ;;  %v3286_v35 = vld [vmem:[#allocation2 + $0x108] sm:$0x80]  ;;  %v7807_v45 = vld [vmem:[#allocation64_spill] sm:$0xff] }
 0x159   :  { %2020 = vmatprep.mubr.bf16.mxu0 %v7713_v1  ;;  %1447 = vrot.lane.b32.xlu0 %v868_v41, %s5070_s6  ;;  %v4935_v41 = vld [vmem:[%s7616_s0 + $0x78] sm:$0xff]   ;;  %v3059_v37 = vrot.slane %v3057_v58, 7 }
 0x15a   :  { %4825 = vmatmul.mubr.msk.bf16.gmra.mrb[12].mxu1 %vm1908_vm11, %v4171_v25  ;;  %v3645_v4 = vpop.permute.xlu1 %3644  ;;  %v3677_v39 = vpop.permute.xlu0 %3676  ;;  %211 = vst.msk [vmem:[#allocation2 + $0x188] sm:$0xff] %vm12_vm0, %v4935_v41  ;;  %v3149_v25 = vld [vmem:[#allocation2 + $0x100] sm:$0x1]  ;;  %v4936_v41 = vld [vmem:[%s7616_s0 + $0xf8] sm:$0xff]  }
 0x15b   :  { %4361 = vmatprep.mubr.bf16.mxu1 %v7713_v1  ;;  %v3222_v42 = vshll.u32 %v3149_v25, 16  ;;  %v3067_v18 = vsel %vm244_vm2, %v3059_v37, %v6601_v43 }
 0x15c   :  { %3796 = vrot.lane.b32.xlu1 %v3218_v6, %s5070_s6  ;;  %v3938_v6 = vsel %vm12_vm0, %v2655_v27, %v3645_v4  ;;  %v7806_v4 = vld [vmem:[#allocation48_spill] sm:$0xff]  ;;  %v1060_v27 = vshrl.u32 %v6251_v31, 16 }
 0x15d   :  { %1479 = vrot.lane.b32.xlu0 %v1058_v20, %s5071_s15  ;;  %v6641_v20 = vld [vmem:[#allocation2 + $0x110] sm:$0xff]  ;;  %v3981_v57 = vsel %vm1623_vm4, %v3938_v6, %v3677_v39  ;;  %v3224_v25 = vrot.slane %v3222_v42, 1  ;;  %v3409_v6 = vshrl.u32 %v3286_v35, 16  ;;  %v3501_v35 = vld [vmem:[#allocation2 + $0x118] sm:$0x1] }
 0x15e   :  { %v3709_v11 = vpop.permute.xlu1 %3708  ;;  %v1408_v61 = vpop.permute.xlu0 %1407  ;;  %v3413_v26 = vshrl.u32 %v6641_v20, 16  ;;  %v1062_v42 = vrot.slane %v1060_v27, 7 }
 0x160   :  { %3828 = vrot.lane.b32.xlu1 %v3407_v47, %s5071_s15  ;;  %v1589_v47 = vsel %vm12_vm0, %v7805_v23, %v7804_v59  ;;  %v3415_v31 = vrot.slane %v3413_v26, 7 }
 0x161   :  { %1527 = vrot.lane.b32.xlu0 %v7801_v16, %s5072_s24  ;;  %v1633_v29 = vsel %vm1623_vm4, %v1589_v47, %v7806_v4  ;;  %v6659_v58 = vld [vmem:[#allocation2 + $0x188] sm:$0xff] }
 0x162   :  { %v3757_v62 = vpop.permute.xlu1 %3756  ;;  %v1440_v21 = vpop.permute.xlu0 %1439  ;;  %v1666_v55 = vsel %vm1656_vm5, %v1633_v29, %v7807_v45  ;;  %2414 = vst.msk [vmem:[#allocation2 + $0x188] sm:$0xff] %vm12_vm0, %v7713_v1  ;;  %v3411_v29 = vrot.slane %v3409_v6, 7  ;;  %v7808_v45 = vld [vmem:[#allocation28_spill] sm:$0xff]  ;;  %v6713_v6 = vld [vmem:[#allocation2 + $0x190] sm:$0x1] }
 0x163   :  { %v1699_v39 = vsel %vm1689_vm6, %v1666_v55, %v1408_v61  ;;  %2563 = vst.msk [vmem:[#allocation2 + $0x188] sm:$0xff] %vm12_vm0, %v4936_v41  ;;  %v1070_v55 = vsel %vm244_vm2, %v1062_v42, %v7808_v45 }
 0x164   :  { %3876 = vrot.lane.b32.xlu1 %v6554_v33, %s5072_s24  ;;  %v1732_v28 = vsel %vm1722_vm7, %v1699_v39, %v1440_v21 }
 0x165   :  { %1559 = vrot.lane.b32.xlu0 %v1221_v54, %s5073_s3 }
 0x166   :  { %v3789_v32 = vpop.permute.xlu1 %3788  ;;  %v1472_v24 = vpop.permute.xlu0 %1471 }
 0x167   :  { %v1765_v61 = vsel %vm1755_vm8, %v1732_v28, %v1472_v24  ;;  %v6710_v28 = vld [vmem:[#allocation2 + $0x190] sm:$0x1] }
 0x168   :  { %3908 = vrot.lane.b32.xlu1 %v3570_v3, %s5073_s3  ;;  %v4013_v3 = vsel %vm1656_vm5, %v3981_v57, %v3709_v11  ;;  %v6679_v11 = vld [vmem:[#allocation2 + $0x180] sm:$0x80]  ;;  %2415 = vst.msk [vmem:[#allocation2 + $0x190] sm:$0xff] %vm12_vm0, %v7713_v1 }
 0x169   :  { %3654 = vrot.lane.b32.xlu0 %v6471_v19, %s5066_s23  ;;  %v874_v19 = vrot.slane %v872_v50, 1  ;;  %v4045_v15 = vsel %vm1689_vm6, %v4013_v3, %v3757_v62  ;;  %v3416_v50 = vshll.u32 %v6641_v20, 16  ;;  %v3574_v3 = vshll.u32 %v3501_v35, 16  ;;  %v3150_v35 = vld [vmem:[#allocation2 + $0x118] sm:$0x1] }
 0x16a   :  { %v3821_v53 = vpop.permute.xlu1 %3820  ;;  %v1520_v54 = vpop.permute.xlu0 %1519  ;;  %v4077_v21 = vsel %vm1722_vm7, %v4045_v15, %v3789_v32 }
 0x16b   :  { %v1798_v59 = vsel %vm1788_vm9, %v1765_v61, %v1520_v54  ;;  %v875_v62 = vsel %vm453_vm1, %v7802_v60, %v874_v19  ;;  %v4109_v24 = vsel %vm1755_vm8, %v4077_v21, %v3821_v53  ;;  %v3225_v60 = vsel %vm453_vm1, %v6621_v13, %v3224_v25  ;;  %v2574_v53 = vld [vmem:[#allocation2 + $0x78] sm:$0x80]  ;;  %v2798_v25 = vld [vmem:[#allocation2 + $0x100] sm:$0x1]  ;;  %v2936_v61 = vld [vmem:[#allocation2 + $0x108] sm:$0x80] }
 0x16c   :  { %3686 = vrot.lane.b32.xlu1 %v2873_v7, %s5067_s29  ;;  %v6677_v7 = vld [vmem:[#allocation2 + $0x180] sm:$0x80]  ;;  %v6698_v57 = vor.u32 %v3416_v50, %v3415_v31  ;;  %v1225_v54 = vshll.u32 %v6279_v56, 16  ;;  %v2657_v41 = vshrl.u32 %v2574_v53, 16  ;;  %v3571_v27 = vrot.slane %v3416_v50, 1 }
 0x16d   :  { %3718 = vrot.lane.b32.xlu0 %v3067_v18, %s5068_s16  ;;  %2413 = vst.msk [vmem:[#allocation2 + $0x180] sm:$0xff] %vm12_vm0, %v7713_v1  ;;  %v3576_v21 = vrot.slane %v3574_v3, 1  ;;  %v3069_v42 = vshrl.u32 %v2936_v61, 16 }
 0x16e   :  { %v3869_v37 = vpop.permute.xlu1 %3868  ;;  %v1552_v23 = vpop.permute.xlu0 %1551  ;;  %v3419_v39 = vsel %vm244_vm2, %v3411_v29, %v6698_v57  ;;  %v1227_v56 = vrot.slane %v1225_v54, 1  ;;  %v2659_v31 = vrot.slane %v2657_v41, 7  ;;  %v6720_v50 = vor.u32 %v3571_v27, %v3413_v26  ;;  %v7812_v41 = vld [vmem:[#allocation76_spill] sm:$0xff]  ;;  %v6736_v27 = vld [vmem:[#allocation2 + $0x128] sm:$0xff] }
 0x16f   :  { %v1831_v47 = vsel %vm1821_vm10, %v1798_v59, %v1552_v23  ;;  %v4141_v4 = vsel %vm1788_vm9, %v4109_v24, %v3869_v37  ;;  %v2877_v59 = vshll.u32 %v2798_v25, 16  ;;  %v7810_v24 = vld [vmem:[#allocation15_spill] sm:$0xff]  ;;  %v3071_v53 = vrot.slane %v3069_v42, 7 }
 0x170   :  { %1417 = vrot.lane.b32.xlu1 %v7801_v16, %s5069_s28  ;;  %4742 = vmatmul.mubr.msk.bf16.gmra.mrb[16].mxu0 %vm1908_vm11, %v1831_v47  ;;  %v1228_v47 = vsel %vm453_vm1, %v7810_v24, %v1227_v56  ;;  %v3577_v26 = vsel %vm453_vm1, %v6720_v50, %v3576_v21  ;;  %v7813_v25 = vld [vmem:[#allocation35_spill] sm:$0xff]  ;;  %v3229_v21 = vshll.u32 %v3150_v35, 16  ;;  %v1072_v35 = vshrl.u32 %v6326_v40, 16 }
 0x171   :  { %3766 = vrot.lane.b32.xlu0 %v6554_v33, %s5069_s28  ;;  %2030 = vmatprep.mubr.bf16.mxu0 %v7713_v1  ;;  %v7814_v56 = vld [vmem:[#allocation23_spill] sm:$0xff]  ;;  %v3079_v42 = vsel %vm244_vm2, %v3071_v53, %v6698_v57 }
 0x172   :  { %v3901_v32 = vpop.permute.xlu1 %3900  ;;  %v3647_v18 = vpop.permute.xlu0 %3646  ;;  %v1592_v61 = vsel %vm12_vm0, %v7814_v56, %v7813_v25  ;;  %v3231_v53 = vrot.slane %v3229_v21, 1  ;;  %v1074_v21 = vrot.slane %v1072_v35, 7  ;;  %v1232_v35 = vshll.u32 %v6364_v9, 16  ;;  %v2938_v9 = vld [vmem:[#allocation2 + $0x120] sm:$0x80] }
 0x173   :  { %v4173_v16 = vsel %vm1821_vm10, %v4141_v4, %v3901_v32  ;;  %v7811_v32 = vld [vmem:[#allocation62_spill] sm:$0xff] }
 0x174   :  { %1449 = vrot.lane.b32.xlu1 %v875_v62, %s5070_s6  ;;  %4826 = vmatmul.mubr.msk.bf16.gmra.mrb[16].mxu1 %vm1908_vm11, %v4173_v16  ;;  %v7809_v62 = vld [vmem:[#allocation5_spill] sm:$0xff]  ;;  %v2667_v16 = vsel %vm244_vm2, %v2659_v31, %v7811_v32 }
 0x175   :  { %4371 = vmatprep.mubr.bf16.mxu1 %v7713_v1  ;;  %3798 = vrot.lane.b32.xlu0 %v3225_v60, %s5070_s6  ;;  %v2879_v60 = vrot.slane %v2877_v59, 1  ;;  %v3288_v32 = vld [vmem:[#allocation2 + $0x120] sm:$0x80] }
 0x176   :  { %v3679_v19 = vpop.permute.xlu1 %3678  ;;  %v3711_v37 = vpop.permute.xlu0 %3710  ;;  %v3421_v56 = vshrl.u32 %v3288_v32, 16 }
 0x177   :  { %v2880_v3 = vsel %vm453_vm1, %v6621_v13, %v2879_v60  ;;  %v3425_v13 = vshrl.u32 %v6736_v27, 16 }
 0x178   :  { %1481 = vrot.lane.b32.xlu1 %v1070_v55, %s5071_s15  ;;  %v3941_v55 = vsel %vm12_vm0, %v2667_v16, %v3647_v18  ;;  %v7815_v18 = vld [vmem:[#allocation49_spill] sm:$0xff] }
 0x179   :  { %3830 = vrot.lane.b32.xlu0 %v3419_v39, %s5071_s15  ;;  %v879_v39 = vshll.u32 %v7812_v41, 16  ;;  %v1635_v59 = vsel %vm1623_vm4, %v1592_v61, %v7815_v18  ;;  %v7816_v16 = vld [vmem:[#allocation65_spill] sm:$0xff] }
 0x17a   :  { %v1410_v15 = vpop.permute.xlu1 %1409 }
 0x17b   :  { %v3759_v23 = vpop.permute.xlu0 %3758  ;;  %v881_v41 = vrot.slane %v879_v39, 1  ;;  %v3428_v39 = vshll.u32 %v6736_v27, 16 }
 0x17c   :  { %1529 = vrot.lane.b32.xlu1 %v7809_v62, %s5072_s24 }
 0x17d   :  { %3878 = vrot.lane.b32.xlu0 %v6641_v20, %s5072_s24 }
 0x17e   :  { %v1442_v4 = vpop.permute.xlu1 %1441 }
 0x17f   :  { %v3791_v29 = vpop.permute.xlu0 %3790 }
 0x180   :  { %1561 = vrot.lane.b32.xlu1 %v1228_v47, %s5073_s3  ;;  %v3983_v47 = vsel %vm1623_vm4, %v3941_v55, %v3679_v19 }
 0x181   :  { %3910 = vrot.lane.b32.xlu0 %v3577_v26, %s5073_s3  ;;  %v1668_v26 = vsel %vm1656_vm5, %v1635_v59, %v7816_v16  ;;  %v4015_v25 = vsel %vm1656_vm5, %v3983_v47, %v3711_v37  ;;  %v6762_v59 = vld [vmem:[#allocation2 + $0x1a0] sm:$0xff]  ;;  %v6774_v47 = vld [vmem:[#allocation2 + $0x198] sm:$0x80]  ;;  %v2576_v16 = vld [vmem:[#allocation2 + $0x90] sm:$0x80] }
 0x182   :  { %v1474_v54 = vpop.permute.xlu1 %1473  ;;  %v4047_v61 = vsel %vm1689_vm6, %v4015_v25, %v3759_v23  ;;  %2417 = vst.msk [vmem:[#allocation2 + $0x1a0] sm:$0xff] %vm12_vm0, %v7713_v1  ;;  %2416 = vst.msk [vmem:[#allocation2 + $0x198] sm:$0xff] %vm12_vm0, %v7713_v1 }
 0x183   :  { %v3823_v31 = vpop.permute.xlu0 %3822  ;;  %v4079_v40 = vsel %vm1722_vm7, %v4047_v61, %v3791_v29 }
 0x184   :  { %3656 = vrot.lane.b32.xlu1 %v6554_v33, %s5066_s23  ;;  %v1701_v33 = vsel %vm1689_vm6, %v1668_v26, %v1410_v15  ;;  %v4111_v23 = vsel %vm1755_vm8, %v4079_v40, %v3823_v31  ;;  %v3423_v31 = vrot.slane %v3421_v56, 7 }
 0x185   :  { %3688 = vrot.lane.b32.xlu0 %v2880_v3, %s5067_s29  ;;  %v1734_v19 = vsel %vm1722_vm7, %v1701_v33, %v1442_v4  ;;  %v3427_v3 = vrot.slane %v3425_v13, 7  ;;  %v882_v4 = vsel %vm453_vm1, %v7810_v24, %v881_v41  ;;  %v3232_v24 = vsel %vm453_vm1, %v6720_v50, %v3231_v53  ;;  %v7817_v41 = vld [vmem:[#allocation29_spill] sm:$0xff] }
 0x186   :  { %v1522_v60 = vpop.permute.xlu1 %1521  ;;  %v1767_v18 = vsel %vm1755_vm8, %v1734_v19, %v1474_v54  ;;  %v1082_v33 = vsel %vm244_vm2, %v1074_v21, %v7817_v41  ;;  %v2669_v19 = vshrl.u32 %v2576_v16, 16  ;;  %v3578_v53 = vrot.slane %v3428_v39, 1 }
 0x187   :  { %v3871_v55 = vpop.permute.xlu0 %3870  ;;  %v1800_v37 = vsel %vm1788_vm9, %v1767_v18, %v1522_v60  ;;  %v6785_v32 = vor.u32 %v3428_v39, %v3427_v3  ;;  %v3502_v60 = vld [vmem:[#allocation2 + $0x130] sm:$0x1]  ;;  %v2799_v18 = vld [vmem:[#allocation2 + $0x118] sm:$0x1]  ;;  %v1234_v3 = vrot.slane %v1232_v35, 1  ;;  %v7818_v39 = vld [vmem:[#allocation6_spill] sm:$0xff] }
 0x188   :  { %3720 = vrot.lane.b32.xlu1 %v3079_v42, %s5068_s16  ;;  %v4143_v29 = vsel %vm1788_vm9, %v4111_v23, %v3871_v55  ;;  %v3581_v56 = vshll.u32 %v3502_v60, 16  ;;  %v3151_v35 = vld [vmem:[#allocation2 + $0x130] sm:$0x1] }
 0x189   :  { %1419 = vrot.lane.b32.xlu0 %v7809_v62, %s5069_s28  ;;  %v3431_v55 = vsel %vm244_vm2, %v3423_v31, %v6785_v32 }
 0x18a   :  { %v1554_v15 = vpop.permute.xlu1 %1553  ;;  %v3583_v23 = vrot.slane %v3581_v56, 1  ;;  %v6819_v56 = vld [vmem:[#allocation2 + $0x140] sm:$0xff] }
 0x18b   :  { %v1833_v54 = vsel %vm1821_vm10, %v1800_v37, %v1554_v15  ;;  %v3903_v42 = vpop.permute.xlu0 %3902  ;;  %v6799_v37 = vld [vmem:[#allocation2 + $0x1a8] sm:$0x1]  ;;  %v2671_v15 = vrot.slane %v2669_v19, 7 }
 0x18c   :  { %3768 = vrot.lane.b32.xlu1 %v6641_v20, %s5069_s28  ;;  %4743 = vmatmul.mubr.msk.bf16.gmra.mrb[20].mxu0 %vm1908_vm11, %v1833_v54  ;;  %v4175_v62 = vsel %vm1821_vm10, %v4143_v29, %v3903_v42  ;;  %v2884_v54 = vshll.u32 %v2799_v18, 16  ;;  %2418 = vst.msk [vmem:[#allocation2 + $0x1a8] sm:$0xff] %vm12_vm0, %v7713_v1  ;;  %v7819_v29 = vld [vmem:[#allocation16_spill] sm:$0xff] }
 0x18d   :  { %2040 = vmatprep.mubr.bf16.mxu0 %v7713_v1  ;;  %1451 = vrot.lane.b32.xlu0 %v882_v4, %s5070_s6  ;;  %v6801_v4 = vor.u32 %v3578_v53, %v3425_v13  ;;  %v1235_v42 = vsel %vm453_vm1, %v7819_v29, %v1234_v3  ;;  %v2679_v13 = vsel %vm244_vm2, %v2671_v15, %v6268_v22  ;;  %v886_v53 = vshll.u32 %v6362_v30, 16  ;;  %v7820_v18 = vld [vmem:[#allocation36_spill] sm:$0xff] }
 0x18e   :  { %4827 = vmatmul.mubr.msk.bf16.gmra.mrb[20].mxu1 %vm1908_vm11, %v4175_v62  ;;  %v3649_v26 = vpop.permute.xlu1 %3648  ;;  %v3081_v62 = vshrl.u32 %v2938_v9, 16  ;;  %v2886_v16 = vrot.slane %v2884_v54, 1  ;;  %v7821_v3 = vld [vmem:[#allocation24_spill] sm:$0xff] }
 0x18f   :  { %4381 = vmatprep.mubr.bf16.mxu1 %v7713_v1  ;;  %v3681_v25 = vpop.permute.xlu0 %3680  ;;  %v3584_v31 = vsel %vm453_vm1, %v6801_v4, %v3583_v23  ;;  %v3944_v19 = vsel %vm12_vm0, %v2679_v13, %v3649_v26  ;;  %v1595_v9 = vsel %vm12_vm0, %v7821_v3, %v7820_v18  ;;  %v3236_v23 = vshll.u32 %v3151_v35, 16  ;;  %v7822_v26 = vld [vmem:[#allocation50_spill] sm:$0xff] }
 0x190   :  { %3800 = vrot.lane.b32.xlu1 %v3232_v24, %s5070_s6  ;;  %v2887_v22 = vsel %vm453_vm1, %v6720_v50, %v2886_v16  ;;  %v1637_v54 = vsel %vm1623_vm4, %v1595_v9, %v7822_v26  ;;  %v3437_v50 = vshrl.u32 %v6819_v56, 16  ;;  %v7823_v13 = vld [vmem:[#allocation66_spill] sm:$0xff]  ;;  %v1084_v18 = vshrl.u32 %v6413_v44, 16 }
 0x191   :  { %1483 = vrot.lane.b32.xlu0 %v1082_v33, %s5071_s15  ;;  %v3083_v33 = vrot.slane %v3081_v62, 7  ;;  %v3290_v62 = vld [vmem:[#allocation2 + $0x138] sm:$0x80] }
 0x192   :  { %v3713_v61 = vpop.permute.xlu1 %3712  ;;  %v3433_v9 = vshrl.u32 %v3290_v62, 16 }
 0x193   :  { %v1412_v40 = vpop.permute.xlu0 %1411  ;;  %v3091_v30 = vsel %vm244_vm2, %v3083_v33, %v6785_v32 }
 0x194   :  { %3832 = vrot.lane.b32.xlu1 %v3431_v55, %s5071_s15 }
 0x195   :  { %1531 = vrot.lane.b32.xlu0 %v7818_v39, %s5072_s24 }
 0x196   :  { %v3761_v21 = vpop.permute.xlu1 %3760 }
 0x197   :  { %v1444_v24 = vpop.permute.xlu0 %1443 }
 0x198   :  { %3880 = vrot.lane.b32.xlu1 %v6736_v27, %s5072_s24 }
 0x199   :  { %1563 = vrot.lane.b32.xlu0 %v1235_v42, %s5073_s3  ;;  %v3985_v42 = vsel %vm1623_vm4, %v3944_v19, %v3681_v25  ;;  %v3238_v19 = vrot.slane %v3236_v23, 1  ;;  %v1086_v23 = vrot.slane %v1084_v18, 7 }
 0x19a   :  { %v3793_v60 = vpop.permute.xlu1 %3792  ;;  %v4017_v3 = vsel %vm1656_vm5, %v3985_v42, %v3713_v61 }
 0x19b   :  { %v1476_v55 = vpop.permute.xlu0 %1475  ;;  %v4049_v26 = vsel %vm1689_vm6, %v4017_v3, %v3761_v21 }
 0x19c   :  { %3912 = vrot.lane.b32.xlu1 %v3584_v31, %s5073_s3  ;;  %v1670_v31 = vsel %vm1656_vm5, %v1637_v54, %v7823_v13  ;;  %v3439_v13 = vrot.slane %v3437_v50, 7 }
 0x19d   :  { %3658 = vrot.lane.b32.xlu0 %v6641_v20, %s5066_s23  ;;  %v888_v20 = vrot.slane %v886_v53, 1  ;;  %v1703_v35 = vsel %vm1689_vm6, %v1670_v31, %v1412_v40  ;;  %v3440_v53 = vshll.u32 %v6819_v56, 16  ;;  %v4081_v40 = vsel %vm1722_vm7, %v4049_v26, %v3793_v60  ;;  %v3503_v31 = vld [vmem:[#allocation2 + $0x148] sm:$0x1]  ;;  %v2800_v26 = vld [vmem:[#allocation2 + $0x130] sm:$0x1] }
 0x19e   :  { %v3825_v15 = vpop.permute.xlu1 %3824  ;;  %v1736_v25 = vsel %vm1722_vm7, %v1703_v35, %v1444_v24  ;;  %v1239_v35 = vshll.u32 %v6449_v38, 16  ;;  %v2940_v38 = vld [vmem:[#allocation2 + $0x138] sm:$0x80] }
 0x19f   :  { %v1524_v16 = vpop.permute.xlu0 %1523  ;;  %v1769_v54 = vsel %vm1755_vm8, %v1736_v25, %v1476_v55  ;;  %v889_v61 = vsel %vm453_vm1, %v7819_v29, %v888_v20  ;;  %v4113_v24 = vsel %vm1755_vm8, %v4081_v40, %v3825_v15  ;;  %v6860_v29 = vor.u32 %v3440_v53, %v3439_v13  ;;  %v2578_v15 = vld [vmem:[#allocation2 + $0xa8] sm:$0x80] }
 0x1a0   :  { %3690 = vrot.lane.b32.xlu1 %v2887_v22, %s5067_s29  ;;  %v1802_v44 = vsel %vm1788_vm9, %v1769_v54, %v1524_v16  ;;  %v7824_v16 = vld [vmem:[#allocation30_spill] sm:$0xff]  ;;  %v2681_v3 = vshrl.u32 %v2578_v15, 16  ;;  %v1241_v54 = vrot.slane %v1239_v35, 1 }
 0x1a1   :  { %3722 = vrot.lane.b32.xlu0 %v3091_v30, %s5068_s16  ;;  %v3435_v30 = vrot.slane %v3433_v9, 7  ;;  %v1094_v20 = vsel %vm244_vm2, %v1086_v23, %v7824_v16 }
 0x1a2   :  { %v3873_v33 = vpop.permute.xlu1 %3872  ;;  %v2683_v40 = vrot.slane %v2681_v3, 7  ;;  %v893_v3 = vshll.u32 %v6447_v34, 16 }
 0x1a3   :  { %v1556_v22 = vpop.permute.xlu0 %1555  ;;  %v4145_v55 = vsel %vm1788_vm9, %v4113_v24, %v3873_v33  ;;  %v3443_v25 = vsel %vm244_vm2, %v3435_v30, %v6860_v29  ;;  %v3585_v33 = vrot.slane %v3440_v53, 1  ;;  %v7826_v53 = vld [vmem:[#allocation17_spill] sm:$0xff] }
 0x1a4   :  { %1421 = vrot.lane.b32.xlu1 %v7818_v39, %s5069_s28  ;;  %v1835_v21 = vsel %vm1821_vm10, %v1802_v44, %v1556_v22  ;;  %v3239_v39 = vsel %vm453_vm1, %v6801_v4, %v3238_v19  ;;  %v3588_v19 = vshll.u32 %v3503_v31, 16  ;;  %v1242_v23 = vsel %vm453_vm1, %v7826_v53, %v1241_v54  ;;  %v3152_v31 = vld [vmem:[#allocation2 + $0x148] sm:$0x1] }
 0x1a5   :  { %3770 = vrot.lane.b32.xlu0 %v6736_v27, %s5069_s28  ;;  %4744 = vmatmul.mubr.msk.bf16.gmra.mrb[24].mxu0 %vm1908_vm11, %v1835_v21  ;;  %v6874_v44 = vor.u32 %v3585_v33, %v3437_v50  ;;  %v7825_v21 = vld [vmem:[#allocation7_spill] sm:$0xff]  ;;  %v7827_v33 = vld [vmem:[#allocation37_spill] sm:$0xff] }
 0x1a6   :  { %v3905_v60 = vpop.permute.xlu1 %3904  ;;  %2050 = vmatprep.mubr.bf16.mxu0 %v7713_v1  ;;  %v3590_v22 = vrot.slane %v3588_v19, 1  ;;  %v7828_v19 = vld [vmem:[#allocation25_spill] sm:$0xff] }
 0x1a7   :  { %v4177_v42 = vsel %vm1821_vm10, %v4145_v55, %v3905_v60  ;;  %v3651_v62 = vpop.permute.xlu0 %3650  ;;  %v3093_v55 = vshrl.u32 %v2940_v38, 16  ;;  %v3243_v38 = vshll.u32 %v3152_v31, 16 }
 0x1a8   :  { %1453 = vrot.lane.b32.xlu1 %v889_v61, %s5070_s6  ;;  %4828 = vmatmul.mubr.msk.bf16.gmra.mrb[24].mxu1 %vm1908_vm11, %v4177_v42  ;;  %v2891_v61 = vshll.u32 %v2800_v26, 16  ;;  %v2691_v42 = vsel %vm244_vm2, %v2683_v40, %v6350_v17  ;;  %v3591_v50 = vsel %vm453_vm1, %v6874_v44, %v3590_v22  ;;  %v1598_v26 = vsel %vm12_vm0, %v7828_v19, %v7827_v33 }
 0x1a9   :  { %4391 = vmatprep.mubr.bf16.mxu1 %v7713_v1  ;;  %3802 = vrot.lane.b32.xlu0 %v3239_v39, %s5070_s6  ;;  %v3095_v15 = vrot.slane %v3093_v55, 7 }
 0x1aa   :  { %v3683_v18 = vpop.permute.xlu1 %3682  ;;  %v2893_v39 = vrot.slane %v2891_v61, 1  ;;  %v3292_v61 = vld [vmem:[#allocation2 + $0x150] sm:$0x80] }
 0x1ab   :  { %v3715_v9 = vpop.permute.xlu0 %3714  ;;  %v3103_v34 = vsel %vm244_vm2, %v3095_v15, %v6860_v29  ;;  %v3245_v15 = vrot.slane %v3243_v38, 1  ;;  %v3445_v33 = vshrl.u32 %v3292_v61, 16  ;;  %v3504_v61 = vld [vmem:[#allocation2 + $0x160] sm:$0x1] }
 0x1ac   :  { %1485 = vrot.lane.b32.xlu1 %v1094_v20, %s5071_s15  ;;  %v3947_v20 = vsel %vm12_vm0, %v2691_v42, %v3651_v62  ;;  %v2894_v17 = vsel %vm453_vm1, %v6801_v4, %v2893_v39  ;;  %v7829_v62 = vld [vmem:[#allocation52_spill] sm:$0xff]  ;;  %v1096_v39 = vshrl.u32 %v6496_v49, 16 }
 0x1ad   :  { %3834 = vrot.lane.b32.xlu0 %v3443_v25, %s5071_s15  ;;  %v6890_v25 = vld [vmem:[#allocation2 + $0x158] sm:$0xff]  ;;  %v1639_v40 = vsel %vm1623_vm4, %v1598_v26, %v7829_v62  ;;  %v3987_v22 = vsel %vm1623_vm4, %v3947_v20, %v3683_v18 }
 0x1ae   :  { %v1414_v13 = vpop.permute.xlu1 %1413  ;;  %v3449_v4 = vshrl.u32 %v6890_v25, 16  ;;  %v4019_v31 = vsel %vm1656_vm5, %v3987_v22, %v3715_v9  ;;  %v1098_v62 = vrot.slane %v1096_v39, 7  ;;  %v3447_v22 = vrot.slane %v3445_v33, 7 }
 0x1af   :  { %v3763_v24 = vpop.permute.xlu0 %3762 }
 0x1b0   :  { %1533 = vrot.lane.b32.xlu1 %v7825_v21, %s5072_s24  ;;  %v4051_v19 = vsel %vm1689_vm6, %v4019_v31, %v3763_v24 }
 0x1b1   :  { %3882 = vrot.lane.b32.xlu0 %v6819_v56, %s5072_s24 }
 0x1b2   :  { %v1446_v60 = vpop.permute.xlu1 %1445 }
 0x1b3   :  { %v3795_v30 = vpop.permute.xlu0 %3794 }
 0x1b4   :  { %1565 = vrot.lane.b32.xlu1 %v1242_v23, %s5073_s3  ;;  %v7830_v23 = vld [vmem:[#allocation67_spill] sm:$0xff] }
 0x1b5   :  { %3914 = vrot.lane.b32.xlu0 %v3591_v50, %s5073_s3  ;;  %v1672_v55 = vsel %vm1656_vm5, %v1639_v40, %v7830_v23  ;;  %v895_v50 = vrot.slane %v893_v3, 1  ;;  %v3452_v3 = vshll.u32 %v6890_v25, 16  ;;  %v7831_v23 = vld [vmem:[#allocation31_spill] sm:$0xff] }
 0x1b6   :  { %v1478_v35 = vpop.permute.xlu1 %1477 }
 0x1b7   :  { %v3827_v54 = vpop.permute.xlu0 %3826  ;;  %v3592_v31 = vrot.slane %v3452_v3, 1 }
 0x1b8   :  { %3660 = vrot.lane.b32.xlu1 %v6736_v27, %s5066_s23  ;;  %v1705_v27 = vsel %vm1689_vm6, %v1672_v55, %v1414_v13  ;;  %v4083_v13 = vsel %vm1722_vm7, %v4051_v19, %v3795_v30  ;;  %v1106_v55 = vsel %vm244_vm2, %v1098_v62, %v7831_v23 }
 0x1b9   :  { %3692 = vrot.lane.b32.xlu0 %v2894_v17, %s5067_s29  ;;  %v1738_v18 = vsel %vm1722_vm7, %v1705_v27, %v1446_v60  ;;  %v3451_v17 = vrot.slane %v3449_v4, 7  ;;  %v896_v60 = vsel %vm453_vm1, %v7826_v53, %v895_v50  ;;  %v4115_v38 = vsel %vm1755_vm8, %v4083_v13, %v3827_v54  ;;  %v2580_v54 = vld [vmem:[#allocation2 + $0xc0] sm:$0x80] }
 0x1ba   :  { %v1526_v42 = vpop.permute.xlu1 %1525  ;;  %v1771_v26 = vsel %vm1755_vm8, %v1738_v18, %v1478_v35  ;;  %v2693_v27 = vshrl.u32 %v2580_v54, 16  ;;  %v3595_v18 = vshll.u32 %v3504_v61, 16 }
 0x1bb   :  { %v3875_v20 = vpop.permute.xlu0 %3874  ;;  %v1804_v49 = vsel %vm1788_vm9, %v1771_v26, %v1526_v42  ;;  %v6931_v53 = vor.u32 %v3452_v3, %v3451_v17  ;;  %v1246_v42 = vshll.u32 %v6532_v0, 16  ;;  %v2942_v0 = vld [vmem:[#allocation2 + $0x150] sm:$0x80]  ;;  %v6945_v17 = vor.u32 %v3592_v31, %v3449_v4  ;;  %v7833_v3 = vld [vmem:[#allocation18_spill] sm:$0xff] }
 0x1bc   :  { %3724 = vrot.lane.b32.xlu1 %v3103_v34, %s5068_s16  ;;  %v4147_v35 = vsel %vm1788_vm9, %v4115_v38, %v3875_v20  ;;  %v2695_v26 = vrot.slane %v2693_v27, 7  ;;  %v3597_v13 = vrot.slane %v3595_v18, 1  ;;  %v7834_v27 = vld [vmem:[#allocation38_spill] sm:$0xff] }
 0x1bd   :  { %1423 = vrot.lane.b32.xlu0 %v7825_v21, %s5069_s28  ;;  %v3246_v21 = vsel %vm453_vm1, %v6874_v44, %v3245_v15  ;;  %v3455_v39 = vsel %vm244_vm2, %v3447_v22, %v6931_v53  ;;  %v2801_v15 = vld [vmem:[#allocation2 + $0x148] sm:$0x1]  ;;  %v1248_v33 = vrot.slane %v1246_v42, 1  ;;  %v3153_v22 = vld [vmem:[#allocation2 + $0x160] sm:$0x1]  ;;  %v6961_v42 = vld [vmem:[#allocation2 + $0x170] sm:$0xff] }
 0x1be   :  { %v1558_v9 = vpop.permute.xlu1 %1557  ;;  %v3598_v4 = vsel %vm453_vm1, %v6945_v17, %v3597_v13  ;;  %v7837_v13 = vld [vmem:[#allocation68_spill] sm:$0xff] }
 0x1bf   :  { %v1837_v24 = vsel %vm1821_vm10, %v1804_v49, %v1558_v9  ;;  %v3907_v40 = vpop.permute.xlu0 %3906  ;;  %v2898_v49 = vshll.u32 %v2801_v15, 16  ;;  %v7832_v9 = vld [vmem:[#allocation8_spill] sm:$0xff]  ;;  %v1249_v38 = vsel %vm453_vm1, %v7833_v3, %v1248_v33  ;;  %v3250_v15 = vshll.u32 %v3153_v22, 16 }
 0x1c0   :  { %3772 = vrot.lane.b32.xlu1 %v6819_v56, %s5069_s28  ;;  %4745 = vmatmul.mubr.msk.bf16.gmra.mrb[28].mxu0 %vm1908_vm11, %v1837_v24  ;;  %v4179_v30 = vsel %vm1821_vm10, %v4147_v35, %v3907_v40  ;;  %v3105_v24 = vshrl.u32 %v2942_v0, 16  ;;  %v2703_v35 = vsel %vm244_vm2, %v2695_v26, %v6435_v10  ;;  %v3294_v26 = vld [vmem:[#allocation2 + $0x168] sm:$0x80] }
 0x1c1   :  { %2060 = vmatprep.mubr.bf16.mxu0 %v7713_v1  ;;  %1455 = vrot.lane.b32.xlu0 %v896_v60, %s5070_s6  ;;  %v2900_v40 = vrot.slane %v2898_v49, 1  ;;  %v3457_v22 = vshrl.u32 %v3294_v26, 16 }
 0x1c2   :  { %4829 = vmatmul.mubr.msk.bf16.gmra.mrb[28].mxu1 %vm1908_vm11, %v4179_v30  ;;  %v3653_v34 = vpop.permute.xlu1 %3652 }
 0x1c3   :  { %4401 = vmatprep.mubr.bf16.mxu1 %v7713_v1  ;;  %v3685_v50 = vpop.permute.xlu0 %3684  ;;  %v3950_v54 = vsel %vm12_vm0, %v2703_v35, %v3653_v34  ;;  %v2901_v10 = vsel %vm453_vm1, %v6874_v44, %v2900_v40  ;;  %v7836_v34 = vld [vmem:[#allocation53_spill] sm:$0xff]  ;;  %v3461_v44 = vshrl.u32 %v6961_v42, 16  ;;  %v1108_v35 = vshrl.u32 %v6582_v63, 16 }
 0x1c4   :  { %3804 = vrot.lane.b32.xlu1 %v3246_v21, %s5070_s6  ;;  %v3107_v21 = vrot.slane %v3105_v24, 7  ;;  %v3989_v0 = vsel %vm1623_vm4, %v3950_v54, %v3685_v50 }
 0x1c5   :  { %1487 = vrot.lane.b32.xlu0 %v1106_v55, %s5071_s15  ;;  %v900_v55 = vshll.u32 %v6530_v2, 16 }
 0x1c6   :  { %v3717_v20 = vpop.permute.xlu1 %3716  ;;  %v3115_v2 = vsel %vm244_vm2, %v3107_v21, %v6931_v53  ;;  %v3252_v21 = vrot.slane %v3250_v15, 1 }
 0x1c7   :  { %v1416_v19 = vpop.permute.xlu0 %1415 }
 0x1c8   :  { %3836 = vrot.lane.b32.xlu1 %v3455_v39, %s5071_s15  ;;  %v7835_v39 = vld [vmem:[#allocation26_spill] sm:$0xff] }
 0x1c9   :  { %1535 = vrot.lane.b32.xlu0 %v7832_v9, %s5072_s24  ;;  %v1601_v31 = vsel %vm12_vm0, %v7835_v39, %v7834_v27  ;;  %v2582_v39 = vld [vmem:[#allocation2 + $0xd8] sm:$0x80] }
 0x1ca   :  { %v3765_v60 = vpop.permute.xlu1 %3764  ;;  %v1641_v33 = vsel %vm1623_vm4, %v1601_v31, %v7836_v34  ;;  %v1110_v31 = vrot.slane %v1108_v35, 7  ;;  %v2705_v26 = vshrl.u32 %v2582_v39, 16 }
 0x1cb   :  { %v1448_v62 = vpop.permute.xlu0 %1447  ;;  %v1674_v49 = vsel %vm1656_vm5, %v1641_v33, %v7837_v13 }
 0x1cc   :  { %3884 = vrot.lane.b32.xlu1 %v6890_v25, %s5072_s24  ;;  %v1707_v24 = vsel %vm1689_vm6, %v1674_v49, %v1416_v19  ;;  %v3464_v19 = vshll.u32 %v6961_v42, 16 }
 0x1cd   :  { %1567 = vrot.lane.b32.xlu0 %v1249_v38, %s5073_s3  ;;  %v1740_v50 = vsel %vm1722_vm7, %v1707_v24, %v1448_v62  ;;  %v1253_v24 = vshll.u32 %v6616_v12, 16  ;;  %v2802_v12 = vld [vmem:[#allocation2 + $0x160] sm:$0x1] }
 0x1ce   :  { %v3797_v30 = vpop.permute.xlu1 %3796  ;;  %v3599_v35 = vrot.slane %v3464_v19, 1 }
 0x1cf   :  { %v1480_v61 = vpop.permute.xlu0 %1479  ;;  %v1255_v39 = vrot.slane %v1253_v24, 1 }
 0x1d0   :  { %3916 = vrot.lane.b32.xlu1 %v3598_v4, %s5073_s3  ;;  %v4021_v4 = vsel %vm1656_vm5, %v3989_v0, %v3717_v20  ;;  %v1773_v27 = vsel %vm1755_vm8, %v1740_v50, %v1480_v61  ;;  %v7839_v0 = vld [vmem:[#allocation46_spill] sm:$0xff] }
 0x1d1   :  { %3662 = vrot.lane.b32.xlu0 %v6819_v56, %s5066_s23  ;;  %v902_v56 = vrot.slane %v900_v55, 1  ;;  %v4053_v54 = vsel %vm1689_vm6, %v4021_v4, %v3765_v60  ;;  %v3463_v55 = vrot.slane %v3461_v44, 7 }
 0x1d2   :  { %v3829_v18 = vpop.permute.xlu1 %3828  ;;  %v4085_v63 = vsel %vm1722_vm7, %v4053_v54, %v3797_v30 }
 0x1d3   :  { %v1528_v38 = vpop.permute.xlu0 %1527  ;;  %v903_v62 = vsel %vm453_vm1, %v7833_v3, %v902_v56  ;;  %v4117_v60 = vsel %vm1755_vm8, %v4085_v63, %v3829_v18  ;;  %v3459_v3 = vrot.slane %v3457_v22, 7  ;;  %v7004_v33 = vor.u32 %v3464_v19, %v3463_v55  ;;  %v3505_v18 = vld [vmem:[#allocation2 + $0x178] sm:$0x1]  ;;  %v2944_v55 = vld [vmem:[#allocation2 + $0x168] sm:$0x80] }
 0x1d4   :  { %3694 = vrot.lane.b32.xlu1 %v2901_v10, %s5067_s29  ;;  %v1806_v20 = vsel %vm1788_vm9, %v1773_v27, %v1528_v38  ;;  %v7840_v38 = vld [vmem:[#allocation32_spill] sm:$0xff]  ;;  %v2707_v63 = vrot.slane %v2705_v26, 7 }
 0x1d5   :  { %3726 = vrot.lane.b32.xlu0 %v3115_v2, %s5068_s16  ;;  %7838 = vst [vmem:[#allocation19_spill] sm:$0xff] %v7004_v33  ;;  %v354_v2 = vshrl.u32 %v7839_v0, 16  ;;  %v1118_v56 = vsel %vm244_vm2, %v1110_v31, %v7840_v38  ;;  %v3467_v27 = vsel %vm244_vm2, %v3459_v3, %v7004_v33  ;;  %v7039_v31 = vor.u32 %v3599_v35, %v3461_v44  ;;  %v7841_v44 = vld [vmem:[#allocation9_spill] sm:$0xff]  ;;  %v7842_v35 = vld [vmem:[#allocation20_spill] sm:$0xff]  ;;  %v7843_v38 = vld [vmem:[#allocation39_spill] sm:$0xff] }
 0x1d6   :  { %v3877_v40 = vpop.permute.xlu1 %3876  ;;  %v3117_v3 = vshrl.u32 %v2944_v55, 16 }
 0x1d7   :  { %v1560_v10 = vpop.permute.xlu0 %1559  ;;  %v4149_v15 = vsel %vm1788_vm9, %v4117_v60, %v3877_v40  ;;  %v356_v19 = vrot.slane %v354_v2, 7  ;;  %v907_v2 = vshll.u32 %v6613_v48, 16 }
 0x1d8   :  { %1425 = vrot.lane.b32.xlu1 %v7832_v9, %s5069_s28  ;;  %v1839_v61 = vsel %vm1821_vm10, %v1806_v20, %v1560_v10  ;;  %v3253_v9 = vsel %vm453_vm1, %v6945_v17, %v3252_v21  ;;  %v3602_v21 = vshll.u32 %v3505_v18, 16 }
 0x1d9   :  { %3774 = vrot.lane.b32.xlu0 %v6890_v25, %s5069_s28  ;;  %4746 = vmatmul.mubr.msk.bf16.gmra.mrb[32].mxu0 %vm1908_vm11, %v1839_v61  ;;  %v364_v24 = vsel %vm244_vm2, %v356_v19, %v5739_v14 }
 0x1da   :  { %v3909_v30 = vpop.permute.xlu1 %3908  ;;  %2070 = vmatprep.mubr.bf16.mxu0 %v7713_v1  ;;  %v1604_v14 = vsel %vm12_vm0, %v364_v24, %v7843_v38 }
 0x1db   :  { %v4181_v34 = vsel %vm1821_vm10, %v4149_v15, %v3909_v30  ;;  %v3655_v13 = vpop.permute.xlu0 %3654  ;;  %v7010_v49 = vpop.f32.mrb[0].mxu0 }
 0x1dc   :  { %1457 = vrot.lane.b32.xlu1 %v903_v62, %s5070_s6  ;;  %4830 = vmatmul.mubr.msk.bf16.gmra.mrb[32].mxu1 %vm1908_vm11, %v4181_v34  ;;  %v2173_v4 = vmul.f32 0.70710677, %v7010_v49  ;;  %v7017_v50 = vpop.f32.mrb[1].mxu0  ;;  %v3604_v34 = vrot.slane %v3602_v21, 1  ;;  %v2715_v21 = vsel %vm244_vm2, %v2707_v63, %v6518_v36  ;;  %v7844_v36 = vld [vmem:[#allocation54_spill] sm:$0xff]  ;;  %v2141_v24 = vmul.f32 0.5, %v7010_v49 }
 0x1dd   :  { %4411 = vmatprep.mubr.bf16.mxu1 %v7713_v1  ;;  %3806 = vrot.lane.b32.xlu0 %v3253_v9, %s5070_s6  ;;  %v7022_v22 = vpop.f32.mrb[2].mxu0  ;;  %v2905_v9 = vshll.u32 %v2802_v12, 16  ;;  %v3119_v12 = vrot.slane %v3117_v3, 7  ;;  %v1643_v63 = vsel %vm1623_vm4, %v1604_v14, %v7844_v36  ;;  %v7845_v3 = vld [vmem:[#allocation69_spill] sm:$0xff]  ;;  %v1127_v49 = vshll.u32 %v6659_v58, 16 }
 0x1de   :  { %v7020_v40 = vpop.permute.xlu1 %3686  ;;  %4937 = verf.f32 %v2173_v4  ;;  %v2174_v20 = vmul.f32 0.70710677, %v7022_v22  ;;  %v7029_v10 = vpop.f32.mrb[3].mxu0  ;;  %v1256_v4 = vsel %vm453_vm1, %v7842_v35, %v1255_v39  ;;  %v3605_v55 = vsel %vm453_vm1, %v7039_v31, %v3604_v34  ;;  %v3296_v14 = vld [vmem:[#allocation2 + $0x180] sm:$0x80] }
 0x1df   :  { %v7024_v54 = vpop.f32.mrb[0].mxu1  ;;  %v7031_v62 = vpop.permute.xlu0 %3718  ;;  %v7690_v39 = vshrl.u32 %v6659_v58, 16  ;;  %v1676_v51 = vsel %vm1656_vm5, %v1643_v63, %v7845_v3  ;;  %v3469_v3 = vshrl.u32 %v3296_v14, 16  ;;  %v2584_v14 = vld [vmem:[#allocation2 + $0xf0] sm:$0x80] }
 0x1e0   :  { %1489 = vrot.lane.b32.xlu1 %v1118_v56, %s5071_s15  ;;  %v4514_v60 = vmul.f32 0.70710677, %v7024_v54  ;;  %v7035_v61 = vpop.f32.mrb[1].mxu1  ;;  %4939 = verf.f32 %v2174_v20  ;;  %v3154_v56 = vld [vmem:[#allocation2 + $0x178] sm:$0x1]  ;;  %v909_v20 = vrot.slane %v907_v2, 1  ;;  %v3127_v2 = vsel %vm244_vm2, %v3119_v12, %v7004_v33 }
 0x1e1   :  { %3838 = vrot.lane.b32.xlu0 %v3467_v27, %s5071_s15  ;;  %v7042_v15 = vpop.f32.mrb[2].mxu1  ;;  %v2907_v27 = vrot.slane %v2905_v9, 1 }
 0x1e2   :  { %v7044_v30 = vpop.permute.xlu1 %1417  ;;  %4941 = verf.f32 %v4514_v60  ;;  %v4515_v18 = vmul.f32 0.70710677, %v7042_v15  ;;  %v7047_v0 = vpop.f32.mrb[3].mxu1  ;;  %v3257_v60 = vshll.u32 %v3154_v56, 16  ;;  %v7078_v56 = vld [vmem:[#allocation2 + $0x188] sm:$0xff] }
 0x1e3   :  { %v7050_v26 = vpop.permute.xlu0 %3766  ;;  %v2908_v38 = vsel %vm453_vm1, %v6945_v17, %v2907_v27  ;;  %v1120_v17 = vshrl.u32 %v6679_v11, 16  ;;  %v1126_v27 = vrot.slane %v7690_v39, 7  ;;  %v3476_v11 = vshll.u32 %v7078_v56, 16 }
 0x1e4   :  { %1537 = vrot.lane.b32.xlu1 %v7841_v44, %s5072_s24  ;;  %4943 = verf.f32 %v4515_v18  ;;  %v3953_v18 = vsel %vm12_vm0, %v2715_v21, %v3655_v13  ;;  %v910_v13 = vsel %vm453_vm1, %v7842_v35, %v909_v20  ;;  %v3259_v21 = vrot.slane %v3257_v60, 1 }
 0x1e5   :  { %3886 = vrot.lane.b32.xlu0 %v6961_v42, %s5072_s24  ;;  %v2142_v35 = vmul.f32 0.5, %v7022_v22  ;;  %v3473_v60 = vshrl.u32 %v7078_v56, 16  ;;  %v1709_v22 = vsel %vm1689_vm6, %v1676_v51, %v7044_v30 }
 0x1e6   :  { %v1450_v48 = vpop.permute.xlu1 %1449 }
 0x1e7   :  { %v3799_v19 = vpop.permute.xlu0 %3798 }
 0x1e8   :  { %1569 = vrot.lane.b32.xlu1 %v1256_v4, %s5073_s3  ;;  %v4938_v9 = vpop.eup %4937 }
 0x1e9   :  { %3918 = vrot.lane.b32.xlu0 %v3605_v55, %s5073_s3  ;;  %v2237_v4 = vadd.f32 1.0, %v4938_v9  ;;  %v3991_v55 = vsel %vm1623_vm4, %v3953_v18, %v7020_v40  ;;  %v4482_v40 = vmul.f32 0.5, %v7024_v54  ;;  %v4483_v54 = vmul.f32 0.5, %v7042_v15 }
 0x1ea   :  { %v1482_v34 = vpop.permute.xlu1 %1481  ;;  %v4940_v36 = vpop.eup %4939  ;;  %v3475_v15 = vrot.slane %v3473_v60, 7 }
 0x1eb   :  { %v3831_v63 = vpop.permute.xlu0 %3830  ;;  %v2269_v9 = vmul.f32 %v2237_v4, %v2141_v24  ;;  %v2238_v20 = vadd.f32 1.0, %v4940_v36  ;;  %v4023_v24 = vsel %vm1656_vm5, %v3991_v55, %v7031_v62 }
 0x1ec   :  { %3664 = vrot.lane.b32.xlu1 %v6890_v25, %s5066_s23  ;;  %v4942_v12 = vpop.eup %4941  ;;  %v4055_v62 = vsel %vm1689_vm6, %v4023_v24, %v7050_v26  ;;  %v1122_v26 = vrot.slane %v1120_v17, 7  ;;  %v3471_v17 = vrot.slane %v3469_v3, 7  ;;  %v1260_v3 = vshll.u32 %v6713_v6, 16  ;;  %v2803_v6 = vld [vmem:[#allocation2 + $0x178] sm:$0x1] }
 0x1ed   :  { %v4578_v18 = vadd.f32 1.0, %v4942_v12  ;;  %3696 = vrot.lane.b32.xlu0 %v2908_v38, %s5067_s29  ;;  %v2301_v39 = vmul.f32 %v2269_v9, %v7017_v50  ;;  %v2270_v23 = vmul.f32 %v2238_v20, %v2142_v35  ;;  %v1742_v38 = vsel %vm1722_vm7, %v1709_v22, %v1450_v48  ;;  %v3506_v20 = vld [vmem:[#allocation2 + $0x190] sm:$0x1] }
 0x1ee   :  { %v1530_v25 = vpop.permute.xlu1 %1529  ;;  %v4944_v33 = vpop.eup %4943  ;;  %v1775_v51 = vsel %vm1755_vm8, %v1742_v38, %v1482_v34  ;;  %v4087_v48 = vsel %vm1722_vm7, %v4055_v62, %v3799_v19  ;;  %v7123_v34 = vor.u32 %v1127_v49, %v1126_v27  ;;  %v7136_v27 = vor.u32 %v3476_v11, %v3475_v15  ;;  %v2946_v15 = vld [vmem:[#allocation2 + $0x180] sm:$0x80] }
 0x1ef   :  { %v4610_v4 = vmul.f32 %v4578_v18, %v4482_v40  ;;  %v4579_v36 = vadd.f32 1.0, %v4944_v33  ;;  %v3879_v12 = vpop.permute.xlu0 %3878  ;;  %2333 = vst [vmem:[%s7618_s2] sm:$0xff] %v2301_v39  ;;  %v2302_v50 = vmul.f32 %v2270_v23, %v7029_v10  ;;  %v4119_v23 = vsel %vm1755_vm8, %v4087_v48, %v3831_v63 }
 0x1f0   :  { %3728 = vrot.lane.b32.xlu1 %v3127_v2, %s5068_s16  ;;  %v1808_v2 = vsel %vm1788_vm9, %v1775_v51, %v1530_v25  ;;  %v3260_v63 = vsel %vm453_vm1, %v7039_v31, %v3259_v21  ;;  %v2717_v40 = vshrl.u32 %v2584_v14, 16  ;;  %v1130_v18 = vsel %vm244_vm2, %v1122_v26, %v7123_v34 }
 0x1f1   :  { %v4642_v33 = vmul.f32 %v4610_v4, %v7035_v61  ;;  %v4611_v30 = vmul.f32 %v4579_v36, %v4483_v54  ;;  %1427 = vrot.lane.b32.xlu0 %v7841_v44, %s5069_s28  ;;  %2334 = vst [vmem:[%s7618_s2 + $0x8] sm:$0xff] %v2302_v50  ;;  %v4151_v44 = vsel %vm1788_vm9, %v4119_v23, %v3879_v12  ;;  %v1257_v25 = vrot.slane %v1127_v49, 1 }
 0x1f2   :  { %v1562_v39 = vpop.permute.xlu1 %1561  ;;  %v3479_v36 = vsel %vm244_vm2, %v3471_v17, %v7136_v27  ;;  %v3606_v49 = vrot.slane %v3476_v11, 1  ;;  %v3609_v38 = vshll.u32 %v3506_v20, 16  ;;  %v7847_v11 = vshrl.u32 %v6659_v58, 16 }
 0x1f3   :  { %v1841_v10 = vsel %vm1821_vm10, %v1808_v2, %v1562_v39  ;;  %4838 = vst [vmem:[%s7618_s2 + $0x100] sm:$0xff] %v4642_v33  ;;  %v4643_v61 = vmul.f32 %v4611_v30, %v7047_v0  ;;  %v3911_v19 = vpop.permute.xlu0 %3910  ;;  %v7846_v0 = vld [vmem:[#allocation60_spill] sm:$0xff]  ;;  %v2719_v33 = vrot.slane %v2717_v40, 7  ;;  %v1262_v23 = vrot.slane %v1260_v3, 1 }
 0x1f4   :  { %3776 = vrot.lane.b32.xlu1 %v6961_v42, %s5069_s28  ;;  %4747 = vmatmul.mubr.msk.bf16.gmra.mrb[36].mxu0 %vm1908_vm11, %v1841_v10  ;;  %v4183_v55 = vsel %vm1821_vm10, %v4151_v44, %v3911_v19  ;;  %v366_v9 = vshrl.u32 %v7846_v0, 16  ;;  %v7176_v39 = vor.u32 %v1257_v25, %v7847_v11  ;;  %v2912_v44 = vshll.u32 %v2803_v6, 16 }
 0x1f5   :  { %2080 = vmatprep.mubr.bf16.mxu0 %v7713_v1  ;;  %4839 = vst [vmem:[%s7618_s2 + $0x108] sm:$0xff] %v4643_v61  ;;  %1459 = vrot.lane.b32.xlu0 %v910_v13, %s5070_s6  ;;  %v779_v19 = vshrl.u32 %v6677_v7, 16  ;;  %v7186_v14 = vor.u32 %v3606_v49, %v3473_v60  ;;  %v3155_v7 = vld [vmem:[#allocation2 + $0x190] sm:$0x1]  ;;  %v1136_v6 = vshrl.u32 %v6762_v59, 16 }
 0x1f6   :  { %4831 = vmatmul.mubr.msk.bf16.gmra.mrb[36].mxu1 %vm1908_vm11, %v4183_v55  ;;  %v7145_v35 = vpop.permute.xlu1 %3656  ;;  %v368_v12 = vrot.slane %v366_v9, 7  ;;  %v3611_v55 = vrot.slane %v3609_v38, 1  ;;  %v1263_v9 = vsel %vm453_vm1, %v7176_v39, %v1262_v23  ;;  %v2914_v60 = vrot.slane %v2912_v44, 1 }
 0x1f7   :  { %v7147_v21 = vpop.f32.mrb[4].mxu0  ;;  %4421 = vmatprep.mubr.bf16.mxu1 %v7713_v1  ;;  %v7153_v24 = vpop.permute.xlu0 %3688  ;;  %v781_v40 = vrot.slane %v779_v19, 7  ;;  %v3264_v38 = vshll.u32 %v3155_v7, 16 }
 0x1f8   :  { %v2175_v13 = vmul.f32 0.70710677, %v7147_v21  ;;  %3808 = vrot.lane.b32.xlu1 %v3260_v63, %s5070_s6  ;;  %v7157_v22 = vpop.f32.mrb[5].mxu0  ;;  %v3129_v63 = vshrl.u32 %v2946_v15, 16  ;;  %v376_v0 = vsel %vm244_vm2, %v368_v12, %v7800_v46  ;;  %v3612_v25 = vsel %vm453_vm1, %v7186_v14, %v3611_v55  ;;  %v7848_v46 = vld [vmem:[#allocation40_spill] sm:$0xff]  ;;  %v7849_v12 = vld [vmem:[#allocation55_spill] sm:$0xff] }
 0x1f9   :  { %v7159_v4 = vpop.f32.mrb[4].mxu1  ;;  %v7161_v54 = vpop.f32.mrb[6].mxu0  ;;  %1491 = vrot.lane.b32.xlu0 %v1130_v18, %s5071_s15  ;;  %v2727_v18 = vsel %vm244_vm2, %v2719_v33, %v6601_v43  ;;  %v7850_v43 = vld [vmem:[#allocation70_spill] sm:$0xff]  ;;  %v2915_v11 = vsel %vm453_vm1, %v7039_v31, %v2914_v60  ;;  %v789_v23 = vsel %vm244_vm2, %v781_v40, %v7123_v34  ;;  %v1132_v31 = vshrl.u32 %v6774_v47, 16 }
 0x1fa   :  { %4945 = verf.f32 %v2175_v13  ;;  %v4516_v50 = vmul.f32 0.70710677, %v7159_v4  ;;  %v7167_v62 = vpop.f32.mrb[5].mxu1  ;;  %v7169_v51 = vpop.permute.xlu1 %3720  ;;  %v2176_v30 = vmul.f32 0.70710677, %v7161_v54  ;;  %v3131_v3 = vrot.slane %v3129_v63, 7 }
 0x1fb   :  { %v4337_v48 = vpop.f32.mrb[6].mxu1  ;;  %v7172_v2 = vpop.f32.mrb[7].mxu0  ;;  %v914_v13 = vshll.u32 %v6710_v28, 16  ;;  %v7221_v63 = vld [vmem:[#allocation2 + $0x1a0] sm:$0xff]  ;;  %v1138_v34 = vrot.slane %v1136_v6, 7  ;;  %v4484_v60 = vmul.f32 0.5, %v7159_v4 }
 0x1fc   :  { %4947 = verf.f32 %v4516_v50  ;;  %v4517_v10 = vmul.f32 0.70710677, %v4337_v48  ;;  %v7178_v26 = vpop.permute.xlu0 %1419  ;;  %v7180_v61 = vpop.f32.mrb[7].mxu1  ;;  %3840 = vrot.lane.b32.xlu1 %v3479_v36, %s5071_s15  ;;  %v1607_v36 = vsel %vm12_vm0, %v376_v0, %v7848_v46  ;;  %v3139_v19 = vsel %vm244_vm2, %v3131_v3, %v7136_v27 }
 0x1fd   :  { %4949 = verf.f32 %v2176_v30  ;;  %1539 = vrot.lane.b32.xlu0 %v6659_v58, %s5072_s24  ;;  %v1645_v50 = vsel %vm1623_vm4, %v1607_v36, %v7849_v12  ;;  %v3956_v30 = vsel %vm12_vm0, %v2727_v18, %v7145_v35  ;;  %v916_v55 = vrot.slane %v914_v13, 1 }
 0x1fe   :  { %4951 = verf.f32 %v4517_v10  ;;  %v7190_v17 = vpop.permute.xlu1 %3768  ;;  %v1678_v33 = vsel %vm1656_vm5, %v1645_v50, %v7850_v43  ;;  %v2143_v10 = vmul.f32 0.5, %v7147_v21  ;;  %v1139_v21 = vshll.u32 %v6762_v59, 16 }
 0x1ff   :  { %v3993_v27 = vsel %vm1623_vm4, %v3956_v30, %v7153_v24  ;;  %v4485_v13 = vmul.f32 0.5, %v4337_v48  ;;  %v3485_v36 = vshrl.u32 %v7221_v63, 16  ;;  %v1711_v24 = vsel %vm1689_vm6, %v1678_v33, %v7178_v26 }
 0x200   :  { %v1452_v20 = vpop.permute.xlu0 %1451  ;;  %3888 = vrot.lane.b32.xlu1 %v7078_v56, %s5072_s24  ;;  %v4025_v50 = vsel %vm1656_vm5, %v3993_v27, %v7169_v51 }
 0x201   :  { %1571 = vrot.lane.b32.xlu0 %v1263_v9, %s5073_s3  ;;  %v3266_v9 = vrot.slane %v3264_v38, 1  ;;  %v4057_v26 = vsel %vm1689_vm6, %v4025_v50, %v7190_v17 }
 0x202   :  { %v3801_v49 = vpop.permute.xlu1 %3800 }
 0x204   :  { %v4946_v15 = vpop.eup %4945  ;;  %v1484_v28 = vpop.permute.xlu0 %1483  ;;  %3920 = vrot.lane.b32.xlu1 %v3612_v25, %s5073_s3  ;;  %v3298_v25 = vld [vmem:[#allocation2 + $0x198] sm:$0x80] }
 0x205   :  { %v2239_v44 = vadd.f32 1.0, %v4946_v15  ;;  %3666 = vrot.lane.b32.xlu0 %v6961_v42, %s5066_s23  ;;  %v2144_v42 = vmul.f32 0.5, %v7161_v54  ;;  %v1744_v54 = vsel %vm1722_vm7, %v1711_v24, %v1452_v20  ;;  %v3481_v43 = vshrl.u32 %v3298_v25, 16  ;;  %v3507_v25 = vld [vmem:[#allocation2 + $0x1a8] sm:$0x1] }
 0x206   :  { %v4948_v0 = vpop.eup %4947  ;;  %v3833_v35 = vpop.permute.xlu1 %3832  ;;  %v1777_v33 = vsel %vm1755_vm8, %v1744_v54, %v1484_v28  ;;  %v4089_v20 = vsel %vm1722_vm7, %v4057_v26, %v3801_v49  ;;  %v3616_v54 = vshll.u32 %v3507_v25, 16 }
 0x207   :  { %v4950_v7 = vpop.eup %4949  ;;  %v2271_v40 = vmul.f32 %v2239_v44, %v2143_v10  ;;  %v4580_v18 = vadd.f32 1.0, %v4948_v0  ;;  %v3488_v10 = vshll.u32 %v7221_v63, 16  ;;  %v4121_v17 = vsel %vm1755_vm8, %v4089_v20, %v3833_v35 }
 0x208   :  { %v4952_v3 = vpop.eup %4951  ;;  %v2240_v46 = vadd.f32 1.0, %v4950_v7  ;;  %v1532_v47 = vpop.permute.xlu0 %1531  ;;  %3698 = vrot.lane.b32.xlu1 %v2915_v11, %s5067_s29  ;;  %v917_v0 = vsel %vm453_vm1, %v7176_v39, %v916_v55  ;;  %v1134_v35 = vrot.slane %v1132_v31, 7  ;;  %v1141_v7 = vor.u32 %v1139_v21, %v1138_v34 }
 0x209   :  { %v2303_v38 = vmul.f32 %v2271_v40, %v7157_v22  ;;  %v4612_v12 = vmul.f32 %v4580_v18, %v4484_v60  ;;  %v4581_v4 = vadd.f32 1.0, %v4952_v3  ;;  %1381 = vrot.lane.b32.xlu0 %v789_v23, %s5068_s16  ;;  %v1810_v11 = vsel %vm1788_vm9, %v1777_v33, %v1532_v47 }
 0x20a   :  { %v2272_v15 = vmul.f32 %v2240_v46, %v2144_v42  ;;  %v3881_v48 = vpop.permute.xlu1 %3880  ;;  %v3267_v60 = vsel %vm453_vm1, %v7186_v14, %v3266_v9  ;;  %v3483_v40 = vrot.slane %v3481_v43, 7  ;;  %v1142_v42 = vsel %vm244_vm2, %v1134_v35, %v1141_v7  ;;  %v7851_v9 = vld [vmem:[#allocation72_spill] sm:$0xff] }
 0x20b   :  { %2335 = vst [vmem:[%s7618_s2 + $0x10] sm:$0xff] %v2303_v38  ;;  %v4644_v22 = vmul.f32 %v4612_v12, %v7167_v62  ;;  %v4613_v30 = vmul.f32 %v4581_v4, %v4485_v13  ;;  %v4153_v49 = vsel %vm1788_vm9, %v4121_v17, %v3881_v48  ;;  %v1264_v13 = vrot.slane %v1139_v21, 1  ;;  %v7853_v35 = vld [vmem:[#allocation56_spill] sm:$0xff] }
 0x20c   :  { %v2304_v51 = vmul.f32 %v2272_v15, %v7172_v2  ;;  %v1564_v23 = vpop.permute.xlu0 %1563  ;;  %3730 = vrot.lane.b32.xlu1 %v3139_v19, %s5068_s16  ;;  %v3487_v2 = vrot.slane %v3485_v36, 7  ;;  %v2586_v19 = vld [vmem:[#allocation2 + $0x108] sm:$0x80]  ;;  %v1267_v14 = vshll.u32 %v6799_v37, 16  ;;  %v378_v46 = vshrl.u32 %v7851_v9, 16 }
 0x20d   :  { %4840 = vst [vmem:[%s7618_s2 + $0x110] sm:$0xff] %v4644_v22  ;;  %v4645_v62 = vmul.f32 %v4613_v30, %v7180_v61  ;;  %v1843_v28 = vsel %vm1821_vm10, %v1810_v11, %v1564_v23  ;;  %1429 = vrot.lane.b32.xlu0 %v6659_v58, %s5069_s28  ;;  %v2729_v39 = vshrl.u32 %v2586_v19, 16  ;;  %v3613_v15 = vrot.slane %v3488_v10, 1 }
 0x20e   :  { %2336 = vst [vmem:[%s7618_s2 + $0x18] sm:$0xff] %v2304_v51  ;;  %4748 = vmatmul.mubr.msk.bf16.gmra.mrb[40].mxu0 %vm1908_vm11, %v1843_v28  ;;  %v3913_v44 = vpop.permute.xlu1 %3912  ;;  %v3490_v18 = vor.u32 %v3488_v10, %v3487_v2  ;;  %v1265_v30 = vor.u32 %v1264_v13, %v1136_v6  ;;  %v1269_v26 = vrot.slane %v1267_v14, 1  ;;  %v380_v51 = vrot.slane %v378_v46, 7 }
 0x20f   :  { %4841 = vst [vmem:[%s7618_s2 + $0x118] sm:$0xff] %v4645_v62  ;;  %v4185_v61 = vsel %vm1821_vm10, %v4153_v49, %v3913_v44  ;;  %2090 = vmatprep.mubr.bf16.mxu0 %v7713_v1  ;;  %v2002_v27 = vpop.f32.mrb[8].mxu0  ;;  %v2731_v48 = vrot.slane %v2729_v39, 7  ;;  %v3614_v20 = vor.u32 %v3613_v15, %v3485_v36  ;;  %v3618_v11 = vrot.slane %v3616_v54, 1 }
 0x210   :  { %v3659_v58 = vpop.permute.xlu0 %3658  ;;  %3778 = vrot.lane.b32.xlu1 %v7078_v56, %s5069_s28  ;;  %4832 = vmatmul.mubr.msk.bf16.gmra.mrb[40].mxu1 %vm1908_vm11, %v4185_v61  ;;  %v2177_v55 = vmul.f32 0.70710677, %v2002_v27  ;;  %v7285_v31 = vpop.f32.mrb[9].mxu0  ;;  %v3491_v50 = vsel %vm244_vm2, %v3483_v40, %v3490_v18  ;;  %v1270_v62 = vsel %vm453_vm1, %v1265_v30, %v1269_v26  ;;  %v388_v17 = vsel %vm244_vm2, %v380_v51, %v7808_v45  ;;  %v7852_v61 = vld [vmem:[#allocation41_spill] sm:$0xff]  ;;  %v7854_v18 = vld [vmem:[#allocation71_spill] sm:$0xff] }
 0x211   :  { %4431 = vmatprep.mubr.bf16.mxu1 %v7713_v1  ;;  %1461 = vrot.lane.b32.xlu0 %v917_v0, %s5070_s6  ;;  %v2006_v3 = vpop.f32.mrb[10].mxu0  ;;  %v2739_v23 = vsel %vm244_vm2, %v2731_v48, %v6698_v57  ;;  %v3619_v36 = vsel %vm453_vm1, %v3614_v20, %v3618_v11  ;;  %v2145_v49 = vmul.f32 0.5, %v2002_v27  ;;  %v1610_v19 = vsel %vm12_vm0, %v388_v17, %v7852_v61  ;;  %v2588_v51 = vld [vmem:[#allocation2 + $0x120] sm:$0x80] }
 0x212   :  { %v3691_v34 = vpop.permute.xlu1 %3690  ;;  %4953 = verf.f32 %v2177_v55  ;;  %v2178_v47 = vmul.f32 0.70710677, %v2006_v3  ;;  %v2008_v12 = vpop.f32.mrb[11].mxu0  ;;  %v3959_v28 = vsel %vm12_vm0, %v2739_v23, %v3659_v58  ;;  %v1647_v7 = vsel %vm1623_vm4, %v1610_v19, %v7853_v35 }
 0x213   :  { %v4343_v56 = vpop.f32.mrb[8].mxu1  ;;  %v3995_v0 = vsel %vm1623_vm4, %v3959_v28, %v3691_v34  ;;  %v1680_v27 = vsel %vm1656_vm5, %v1647_v7, %v7854_v18  ;;  %v390_v28 = vshrl.u32 %v6321_v8, 16 }
 0x214   :  { %v3723_v38 = vpop.permute.xlu0 %3722  ;;  %3810 = vrot.lane.b32.xlu1 %v3267_v60, %s5070_s6  ;;  %v4518_v24 = vmul.f32 0.70710677, %v4343_v56  ;;  %v7293_v4 = vpop.f32.mrb[9].mxu1  ;;  %4955 = verf.f32 %v2178_v47  ;;  %v2146_v60 = vmul.f32 0.5, %v2006_v3  ;;  %v4486_v39 = vmul.f32 0.5, %v4343_v56 }
 0x215   :  { %1493 = vrot.lane.b32.xlu0 %v1142_v42, %s5071_s15  ;;  %v4347_v37 = vpop.f32.mrb[10].mxu1  ;;  %v4027_v34 = vsel %vm1656_vm5, %v3995_v0, %v3723_v38 }
 0x216   :  { %v1422_v21 = vpop.permute.xlu1 %1421  ;;  %4957 = verf.f32 %v4518_v24  ;;  %v4519_v43 = vmul.f32 0.70710677, %v4347_v37  ;;  %v4349_v22 = vpop.f32.mrb[11].mxu1  ;;  %v4487_v47 = vmul.f32 0.5, %v4347_v37 }
 0x217   :  { %v1713_v9 = vsel %vm1689_vm6, %v1680_v27, %v1422_v21 }
 0x218   :  { %v3771_v33 = vpop.permute.xlu0 %3770  ;;  %3842 = vrot.lane.b32.xlu1 %v3491_v50, %s5071_s15  ;;  %4959 = verf.f32 %v4519_v43 }
 0x219   :  { %1541 = vrot.lane.b32.xlu0 %v6762_v59, %s5072_s24  ;;  %v4059_v15 = vsel %vm1689_vm6, %v4027_v34, %v3771_v33  ;;  %v7856_v34 = vld [vmem:[#allocation57_spill] sm:$0xff] }
 0x21a   :  { %v1454_v10 = vpop.permute.xlu1 %1453 }
 0x21b   :  { %v1746_v3 = vsel %vm1722_vm7, %v1713_v9, %v1454_v10 }
 0x21c   :  { %v3803_v6 = vpop.permute.xlu0 %3802  ;;  %3890 = vrot.lane.b32.xlu1 %v7221_v63, %s5072_s24  ;;  %v4954_v2 = vpop.eup %4953 }
 0x21d   :  { %1573 = vrot.lane.b32.xlu0 %v1270_v62, %s5073_s3  ;;  %v2241_v59 = vadd.f32 1.0, %v4954_v2  ;;  %v4091_v48 = vsel %vm1722_vm7, %v4059_v15, %v3803_v6  ;;  %v2741_v62 = vshrl.u32 %v2588_v51, 16 }
 0x21e   :  { %v1486_v57 = vpop.permute.xlu1 %1485  ;;  %v4956_v44 = vpop.eup %4955 }
 0x21f   :  { %v2273_v58 = vmul.f32 %v2241_v59, %v2145_v49  ;;  %v2242_v40 = vadd.f32 1.0, %v4956_v44 }
 0x220   :  { %v3835_v63 = vpop.permute.xlu0 %3834  ;;  %3922 = vrot.lane.b32.xlu1 %v3619_v36, %s5073_s3  ;;  %v4958_v45 = vpop.eup %4957 }
 0x221   :  { %v4582_v55 = vadd.f32 1.0, %v4958_v45  ;;  %v2305_v13 = vmul.f32 %v2273_v58, %v7285_v31  ;;  %v2274_v14 = vmul.f32 %v2242_v40, %v2146_v60  ;;  %v1779_v31 = vsel %vm1755_vm8, %v1746_v3, %v1486_v57 }
 0x222   :  { %v1534_v25 = vpop.permute.xlu1 %1533  ;;  %v4960_v42 = vpop.eup %4959  ;;  %v4123_v43 = vsel %vm1755_vm8, %v4091_v48, %v3835_v63  ;;  %v2743_v63 = vrot.slane %v2741_v62, 7  ;;  %v392_v45 = vrot.slane %v390_v28, 7 }
 0x223   :  { %v4614_v46 = vmul.f32 %v4582_v55, %v4486_v39  ;;  %v4583_v24 = vadd.f32 1.0, %v4960_v42  ;;  %2337 = vst [vmem:[%s7618_s2 + $0x20] sm:$0xff] %v2305_v13  ;;  %v2306_v56 = vmul.f32 %v2274_v14, %v2008_v12  ;;  %v1812_v37 = vsel %vm1788_vm9, %v1779_v31, %v1534_v25  ;;  %v7855_v39 = vld [vmem:[#allocation42_spill] sm:$0xff] }
 0x224   :  { %v3883_v50 = vpop.permute.xlu0 %3882  ;;  %v2751_v8 = vsel %vm244_vm2, %v2743_v63, %v6785_v32  ;;  %v400_v58 = vsel %vm244_vm2, %v392_v45, %v7817_v41 }
 0x225   :  { %v4646_v38 = vmul.f32 %v4614_v46, %v7293_v4  ;;  %v4615_v54 = vmul.f32 %v4583_v24, %v4487_v47  ;;  %2338 = vst [vmem:[%s7618_s2 + $0x28] sm:$0xff] %v2306_v56  ;;  %v4155_v4 = vsel %vm1788_vm9, %v4123_v43, %v3883_v50  ;;  %v1613_v55 = vsel %vm12_vm0, %v400_v58, %v7855_v39  ;;  %v7857_v50 = vld [vmem:[#allocation73_spill] sm:$0xff] }
 0x226   :  { %v1566_v21 = vpop.permute.xlu1 %1565  ;;  %v1649_v14 = vsel %vm1623_vm4, %v1613_v55, %v7856_v34 }
 0x227   :  { %v1845_v12 = vsel %vm1821_vm10, %v1812_v37, %v1566_v21  ;;  %4842 = vst [vmem:[%s7618_s2 + $0x120] sm:$0xff] %v4646_v38  ;;  %v4647_v30 = vmul.f32 %v4615_v54, %v4349_v22  ;;  %v1682_v56 = vsel %vm1656_vm5, %v1649_v14, %v7857_v50 }
 0x228   :  { %v3915_v26 = vpop.permute.xlu0 %3914  ;;  %4749 = vmatmul.mubr.msk.bf16.gmra.mrb[44].mxu0 %vm1908_vm11, %v1845_v12 }
 0x229   :  { %v4187_v33 = vsel %vm1821_vm10, %v4155_v4, %v3915_v26  ;;  %2100 = vmatprep.mubr.bf16.mxu0 %v7713_v1  ;;  %4843 = vst [vmem:[%s7618_s2 + $0x128] sm:$0xff] %v4647_v30 }
 0x22a   :  { %4833 = vmatmul.mubr.msk.bf16.gmra.mrb[44].mxu1 %vm1908_vm11, %v4187_v33  ;;  %v3661_v20 = vpop.permute.xlu1 %3660 }
 0x22b   :  { %v2012_v11 = vpop.f32.mrb[12].mxu0  ;;  %4441 = vmatprep.mubr.bf16.mxu1 %v7713_v1  ;;  %v3962_v18 = vsel %vm12_vm0, %v2751_v8, %v3661_v20 }
 0x22c   :  { %v3693_v22 = vpop.permute.xlu0 %3692  ;;  %v2179_v23 = vmul.f32 0.70710677, %v2012_v11  ;;  %v2014_v10 = vpop.f32.mrb[13].mxu0  ;;  %v2147_v25 = vmul.f32 0.5, %v2012_v11 }
 0x22d   :  { %v4353_v6 = vpop.f32.mrb[12].mxu1  ;;  %v2016_v17 = vpop.f32.mrb[14].mxu0  ;;  %v3997_v32 = vsel %vm1623_vm4, %v3962_v18, %v3693_v22 }
 0x22e   :  { %4961 = verf.f32 %v2179_v23  ;;  %v4520_v36 = vmul.f32 0.70710677, %v4353_v6  ;;  %v4355_v2 = vpop.f32.mrb[13].mxu1  ;;  %v3725_v57 = vpop.permute.xlu1 %3724  ;;  %v2180_v49 = vmul.f32 0.70710677, %v2016_v17  ;;  %v4488_v41 = vmul.f32 0.5, %v4353_v6 }
 0x22f   :  { %v4357_v59 = vpop.f32.mrb[14].mxu1  ;;  %v2018_v44 = vpop.f32.mrb[15].mxu0  ;;  %v2148_v15 = vmul.f32 0.5, %v2016_v17  ;;  %v4029_v12 = vsel %vm1656_vm5, %v3997_v32, %v3725_v57 }
 0x230   :  { %4963 = verf.f32 %v4520_v36  ;;  %v4521_v61 = vmul.f32 0.70710677, %v4357_v59  ;;  %v1424_v19 = vpop.permute.xlu0 %1423  ;;  %v4359_v0 = vpop.f32.mrb[15].mxu1  ;;  %v4489_v31 = vmul.f32 0.5, %v4357_v59 }
 0x231   :  { %4965 = verf.f32 %v2180_v49  ;;  %v1715_v21 = vsel %vm1689_vm6, %v1682_v56, %v1424_v19  ;;  %v2590_v49 = vld [vmem:[#allocation2 + $0x138] sm:$0x80]  ;;  %v7858_v56 = vld [vmem:[#allocation43_spill] sm:$0xff] }
 0x232   :  { %4967 = verf.f32 %v4521_v61  ;;  %v3773_v35 = vpop.permute.xlu1 %3772  ;;  %v2753_v61 = vshrl.u32 %v2590_v49, 16 }
 0x233   :  { %v4061_v20 = vsel %vm1689_vm6, %v4029_v12, %v3773_v35 }
 0x234   :  { %v1456_v7 = vpop.permute.xlu0 %1455 }
 0x235   :  { %v1748_v4 = vsel %vm1722_vm7, %v1715_v21, %v1456_v7 }
 0x236   :  { %v3805_v60 = vpop.permute.xlu1 %3804 }
 0x237   :  { %v4093_v23 = vsel %vm1722_vm7, %v4061_v20, %v3805_v60  ;;  %v402_v60 = vshrl.u32 %v6408_v5, 16 }
 0x238   :  { %v4962_v40 = vpop.eup %4961  ;;  %v1488_v27 = vpop.permute.xlu0 %1487 }
 0x239   :  { %v2243_v42 = vadd.f32 1.0, %v4962_v40  ;;  %v1781_v11 = vsel %vm1755_vm8, %v1748_v4, %v1488_v27  ;;  %v2755_v27 = vrot.slane %v2753_v61, 7  ;;  %v404_v34 = vrot.slane %v402_v60, 7 }
 0x23a   :  { %v4964_v13 = vpop.eup %4963  ;;  %v3837_v9 = vpop.permute.xlu1 %3836 }
 0x23b   :  { %v4966_v46 = vpop.eup %4965  ;;  %v2275_v47 = vmul.f32 %v2243_v42, %v2147_v25  ;;  %v4584_v24 = vadd.f32 1.0, %v4964_v13  ;;  %v4125_v17 = vsel %vm1755_vm8, %v4093_v23, %v3837_v9  ;;  %v2763_v14 = vsel %vm244_vm2, %v2755_v27, %v6860_v29  ;;  %v7859_v29 = vld [vmem:[#allocation58_spill] sm:$0xff] }
 0x23c   :  { %v4968_v3 = vpop.eup %4967  ;;  %v2244_v38 = vadd.f32 1.0, %v4966_v46  ;;  %v1536_v54 = vpop.permute.xlu0 %1535  ;;  %v412_v5 = vsel %vm244_vm2, %v404_v34, %v7824_v16 }
 0x23d   :  { %v2307_v48 = vmul.f32 %v2275_v47, %v2014_v10  ;;  %v4616_v37 = vmul.f32 %v4584_v24, %v4488_v41  ;;  %v4585_v43 = vadd.f32 1.0, %v4968_v3  ;;  %v1814_v10 = vsel %vm1788_vm9, %v1781_v11, %v1536_v54 }
 0x23e   :  { %v2276_v30 = vmul.f32 %v2244_v38, %v2148_v15  ;;  %v3885_v26 = vpop.permute.xlu1 %3884  ;;  %v1616_v15 = vsel %vm12_vm0, %v412_v5, %v7858_v56 }
 0x23f   :  { %2339 = vst [vmem:[%s7618_s2 + $0x30] sm:$0xff] %v2307_v48  ;;  %v4648_v33 = vmul.f32 %v4616_v37, %v4355_v2  ;;  %v4617_v51 = vmul.f32 %v4585_v43, %v4489_v31  ;;  %v4157_v36 = vsel %vm1788_vm9, %v4125_v17, %v3885_v26  ;;  %v1651_v48 = vsel %vm1623_vm4, %v1616_v15, %v7859_v29  ;;  %v7860_v43 = vld [vmem:[#allocation74_spill] sm:$0xff]  ;;  %v7861_v15 = vld [vmem:[#allocation31_spill] sm:$0xff] }
 0x240   :  { %v2308_v22 = vmul.f32 %v2276_v30, %v2018_v44  ;;  %v1568_v62 = vpop.permute.xlu0 %1567  ;;  %v1684_v12 = vsel %vm1656_vm5, %v1651_v48, %v7860_v43 }
 0x241   :  { %4844 = vst [vmem:[%s7618_s2 + $0x130] sm:$0xff] %v4648_v33  ;;  %v4649_v6 = vmul.f32 %v4617_v51, %v4359_v0  ;;  %v1847_v28 = vsel %vm1821_vm10, %v1814_v10, %v1568_v62 }
 0x242   :  { %2340 = vst [vmem:[%s7618_s2 + $0x38] sm:$0xff] %v2308_v22  ;;  %4750 = vmatmul.mubr.msk.bf16.gmra.mrb[48].mxu0 %vm1908_vm11, %v1847_v28  ;;  %v3917_v2 = vpop.permute.xlu1 %3916 }
 0x243   :  { %4845 = vst [vmem:[%s7618_s2 + $0x138] sm:$0xff] %v4649_v6  ;;  %v4189_v57 = vsel %vm1821_vm10, %v4157_v36, %v3917_v2  ;;  %2110 = vmatprep.mubr.bf16.mxu0 %v7713_v1  ;;  %v2022_v44 = vpop.f32.mrb[16].mxu0 }
 0x244   :  { %v3663_v59 = vpop.permute.xlu0 %3662  ;;  %4834 = vmatmul.mubr.msk.bf16.gmra.mrb[48].mxu1 %vm1908_vm11, %v4189_v57  ;;  %v2181_v19 = vmul.f32 0.70710677, %v2022_v44  ;;  %v2024_v0 = vpop.f32.mrb[17].mxu0  ;;  %v2149_v24 = vmul.f32 0.5, %v2022_v44 }
 0x245   :  { %4451 = vmatprep.mubr.bf16.mxu1 %v7713_v1  ;;  %v2026_v45 = vpop.f32.mrb[18].mxu0  ;;  %v3965_v32 = vsel %vm12_vm0, %v2763_v14, %v3663_v59 }
 0x246   :  { %v3695_v63 = vpop.permute.xlu1 %3694  ;;  %4969 = verf.f32 %v2181_v19  ;;  %v2182_v7 = vmul.f32 0.70710677, %v2026_v45  ;;  %v2028_v58 = vpop.f32.mrb[19].mxu0  ;;  %v2150_v21 = vmul.f32 0.5, %v2026_v45 }
 0x247   :  { %v4363_v35 = vpop.f32.mrb[16].mxu1  ;;  %v3999_v31 = vsel %vm1623_vm4, %v3965_v32, %v3695_v63 }
 0x248   :  { %v3727_v8 = vpop.permute.xlu0 %3726  ;;  %v4522_v40 = vmul.f32 0.70710677, %v4363_v35  ;;  %v4365_v18 = vpop.f32.mrb[17].mxu1  ;;  %4971 = verf.f32 %v2182_v7  ;;  %v4490_v30 = vmul.f32 0.5, %v4363_v35 }
 0x249   :  { %v4367_v39 = vpop.f32.mrb[18].mxu1  ;;  %v4031_v20 = vsel %vm1656_vm5, %v3999_v31, %v3727_v8  ;;  %v2592_v8 = vld [vmem:[#allocation2 + $0x150] sm:$0x80] }
 0x24a   :  { %v1426_v55 = vpop.permute.xlu1 %1425  ;;  %4973 = verf.f32 %v4522_v40  ;;  %v4523_v25 = vmul.f32 0.70710677, %v4367_v39  ;;  %v4369_v42 = vpop.f32.mrb[19].mxu1  ;;  %v4491_v10 = vmul.f32 0.5, %v4367_v39  ;;  %v2765_v39 = vshrl.u32 %v2592_v8, 16 }
 0x24b   :  { %v1717_v22 = vsel %vm1689_vm6, %v1684_v12, %v1426_v55 }
 0x24c   :  { %v3775_v13 = vpop.permute.xlu0 %3774  ;;  %4975 = verf.f32 %v4523_v25 }
 0x24d   :  { %v4063_v36 = vsel %vm1689_vm6, %v4031_v20, %v3775_v13 }
 0x24e   :  { %v1458_v9 = vpop.permute.xlu1 %1457 }
 0x24f   :  { %v1750_v6 = vsel %vm1722_vm7, %v1717_v22, %v1458_v9 }
 0x250   :  { %v3807_v46 = vpop.permute.xlu0 %3806  ;;  %v4970_v47 = vpop.eup %4969 }
 0x251   :  { %v2245_v3 = vadd.f32 1.0, %v4970_v47  ;;  %v4095_v59 = vsel %vm1722_vm7, %v4063_v36, %v3807_v46 }
 0x252   :  { %v1490_v41 = vpop.permute.xlu1 %1489  ;;  %v4972_v50 = vpop.eup %4971 }
 0x253   :  { %v2277_v37 = vmul.f32 %v2245_v3, %v2149_v24  ;;  %v2246_v16 = vadd.f32 1.0, %v4972_v50  ;;  %v1783_v2 = vsel %vm1755_vm8, %v1750_v6, %v1490_v41  ;;  %v2767_v24 = vrot.slane %v2765_v39, 7 }
 0x254   :  { %v3839_v38 = vpop.permute.xlu0 %3838  ;;  %v4974_v54 = vpop.eup %4973 }
 0x255   :  { %v4586_v4 = vadd.f32 1.0, %v4974_v54  ;;  %v2309_v51 = vmul.f32 %v2277_v37, %v2024_v0  ;;  %v2278_v11 = vmul.f32 %v2246_v16, %v2150_v21  ;;  %v4127_v19 = vsel %vm1755_vm8, %v4095_v59, %v3839_v38  ;;  %v7862_v37 = vld [vmem:[#allocation44_spill] sm:$0xff] }
 0x256   :  { %v1538_v26 = vpop.permute.xlu1 %1537  ;;  %v4976_v33 = vpop.eup %4975 }
 0x257   :  { %v4618_v23 = vmul.f32 %v4586_v4, %v4490_v30  ;;  %v4587_v62 = vadd.f32 1.0, %v4976_v33  ;;  %2341 = vst [vmem:[%s7618_s2 + $0x40] sm:$0xff] %v2309_v51  ;;  %v2310_v28 = vmul.f32 %v2278_v11, %v2028_v58  ;;  %v1816_v44 = vsel %vm1788_vm9, %v1783_v2, %v1538_v26  ;;  %v7863_v30 = vld [vmem:[#allocation59_spill] sm:$0xff] }
 0x258   :  { %v3887_v17 = vpop.permute.xlu0 %3886 }
 0x259   :  { %v4650_v57 = vmul.f32 %v4618_v23, %v4365_v18  ;;  %v4619_v49 = vmul.f32 %v4587_v62, %v4491_v10  ;;  %2342 = vst [vmem:[%s7618_s2 + $0x48] sm:$0xff] %v2310_v28  ;;  %v4159_v45 = vsel %vm1788_vm9, %v4127_v19, %v3887_v17  ;;  %v7864_v23 = vld [vmem:[#allocation75_spill] sm:$0xff] }
 0x25a   :  { %v1570_v61 = vpop.permute.xlu1 %1569 }
 0x25b   :  { %v1849_v0 = vsel %vm1821_vm10, %v1816_v44, %v1570_v61  ;;  %4846 = vst [vmem:[%s7618_s2 + $0x140] sm:$0xff] %v4650_v57  ;;  %v4651_v63 = vmul.f32 %v4619_v49, %v4369_v42  ;;  %v414_v42 = vshrl.u32 %v6491_v52, 16  ;;  %v2775_v52 = vsel %vm244_vm2, %v2767_v24, %v6931_v53 }
 0x25c   :  { %v3919_v35 = vpop.permute.xlu0 %3918  ;;  %4751 = vmatmul.mubr.msk.bf16.gmra.mrb[52].mxu0 %vm1908_vm11, %v1849_v0 }
 0x25d   :  { %v4191_v7 = vsel %vm1821_vm10, %v4159_v45, %v3919_v35  ;;  %2120 = vmatprep.mubr.bf16.mxu0 %v7713_v1  ;;  %4847 = vst [vmem:[%s7618_s2 + $0x148] sm:$0xff] %v4651_v63  ;;  %v416_v3 = vrot.slane %v414_v42, 7 }
 0x25e   :  { %4835 = vmatmul.mubr.msk.bf16.gmra.mrb[52].mxu1 %vm1908_vm11, %v4191_v7  ;;  %v3665_v58 = vpop.permute.xlu1 %3664 }
 0x25f   :  { %v2032_v60 = vpop.f32.mrb[20].mxu0  ;;  %4461 = vmatprep.mubr.bf16.mxu1 %v7713_v1  ;;  %v424_v31 = vsel %vm244_vm2, %v416_v3, %v7861_v15  ;;  %v3968_v29 = vsel %vm12_vm0, %v2775_v52, %v3665_v58  ;;  %v7865_v15 = vld [vmem:[#allocation10_spill] sm:$0xff] }
 0x260   :  { %v3697_v40 = vpop.permute.xlu0 %3696  ;;  %v2183_v18 = vmul.f32 0.70710677, %v2032_v60  ;;  %v2034_v27 = vpop.f32.mrb[21].mxu0  ;;  %v1619_v21 = vsel %vm12_vm0, %v424_v31, %v7862_v37  ;;  %v2151_v16 = vmul.f32 0.5, %v2032_v60  ;;  %v426_v31 = vshrl.u32 %v7865_v15, 16 }
 0x261   :  { %v4373_v55 = vpop.f32.mrb[20].mxu1  ;;  %v2036_v25 = vpop.f32.mrb[22].mxu0  ;;  %v1653_v4 = vsel %vm1623_vm4, %v1619_v21, %v7863_v30  ;;  %v4001_v53 = vsel %vm1623_vm4, %v3968_v29, %v3697_v40  ;;  %v7866_v30 = vld [vmem:[#allocation32_spill] sm:$0xff] }
 0x262   :  { %4977 = verf.f32 %v2183_v18  ;;  %v4524_v13 = vmul.f32 0.70710677, %v4373_v55  ;;  %v4375_v34 = vpop.f32.mrb[21].mxu1  ;;  %v3729_v14 = vpop.permute.xlu1 %3728  ;;  %v2184_v9 = vmul.f32 0.70710677, %v2036_v25  ;;  %v4492_v20 = vmul.f32 0.5, %v4373_v55 }
 0x263   :  { %v4377_v46 = vpop.f32.mrb[22].mxu1  ;;  %v2038_v5 = vpop.f32.mrb[23].mxu0  ;;  %v1686_v10 = vsel %vm1656_vm5, %v1653_v4, %v7864_v23  ;;  %v2152_v62 = vmul.f32 0.5, %v2036_v25  ;;  %v4033_v59 = vsel %vm1656_vm5, %v4001_v53, %v3729_v14  ;;  %v428_v37 = vrot.slane %v426_v31, 7 }
 0x264   :  { %4979 = verf.f32 %v4524_v13  ;;  %v4525_v32 = vmul.f32 0.70710677, %v4377_v46  ;;  %v1428_v47 = vpop.permute.xlu0 %1427  ;;  %v4379_v41 = vpop.f32.mrb[23].mxu1  ;;  %v4493_v6 = vmul.f32 0.5, %v4377_v46 }
 0x265   :  { %4981 = verf.f32 %v2184_v9  ;;  %v1719_v57 = vsel %vm1689_vm6, %v1686_v10, %v1428_v47  ;;  %v436_v4 = vsel %vm244_vm2, %v428_v37, %v7866_v30 }
 0x266   :  { %4983 = verf.f32 %v4525_v32  ;;  %v3777_v50 = vpop.permute.xlu1 %3776  ;;  %v2594_v32 = vld [vmem:[#allocation2 + $0x168] sm:$0x80] }
 0x267   :  { %v4065_v45 = vsel %vm1689_vm6, %v4033_v59, %v3777_v50  ;;  %v7869_v59 = vld [vmem:[#allocation61_spill] sm:$0xff] }
 0x268   :  { %v1460_v56 = vpop.permute.xlu0 %1459 }
 0x269   :  { %v1752_v61 = vsel %vm1722_vm7, %v1719_v57, %v1460_v56 }
 0x26a   :  { %v3809_v38 = vpop.permute.xlu1 %3808 }
 0x26b   :  { %v4097_v8 = vsel %vm1722_vm7, %v4065_v45, %v3809_v38  ;;  %v2777_v38 = vshrl.u32 %v2594_v32, 16 }
 0x26c   :  { %v4978_v54 = vpop.eup %4977  ;;  %v1492_v48 = vpop.permute.xlu0 %1491 }
 0x26d   :  { %v2247_v43 = vadd.f32 1.0, %v4978_v54  ;;  %v1785_v35 = vsel %vm1755_vm8, %v1752_v61, %v1492_v48  ;;  %v2779_v21 = vrot.slane %v2777_v38, 7 }
 0x26e   :  { %v4980_v12 = vpop.eup %4979  ;;  %v3841_v26 = vpop.permute.xlu1 %3840 }
 0x26f   :  { %v4982_v33 = vpop.eup %4981  ;;  %v2279_v51 = vmul.f32 %v2247_v43, %v2151_v16  ;;  %v4588_v11 = vadd.f32 1.0, %v4980_v12  ;;  %v4129_v18 = vsel %vm1755_vm8, %v4097_v8, %v3841_v26  ;;  %v7867_v26 = vld [vmem:[#allocation19_spill] sm:$0xff] }
 0x270   :  { %v4984_v22 = vpop.eup %4983  ;;  %v2248_v17 = vadd.f32 1.0, %v4982_v33  ;;  %v1540_v28 = vpop.permute.xlu0 %1539  ;;  %v2787_v33 = vsel %vm244_vm2, %v2779_v21, %v7867_v26 }
 0x271   :  { %v2311_v36 = vmul.f32 %v2279_v51, %v2034_v27  ;;  %v4620_v2 = vmul.f32 %v4588_v11, %v4492_v20  ;;  %v4589_v49 = vadd.f32 1.0, %v4984_v22  ;;  %v1818_v58 = vsel %vm1788_vm9, %v1785_v35, %v1540_v28 }
 0x272   :  { %v2280_v44 = vmul.f32 %v2248_v17, %v2152_v62  ;;  %v3889_v19 = vpop.permute.xlu1 %3888 }
 0x273   :  { %2343 = vst [vmem:[%s7618_s2 + $0x50] sm:$0xff] %v2311_v36  ;;  %v4652_v0 = vmul.f32 %v4620_v2, %v4375_v34  ;;  %v4621_v63 = vmul.f32 %v4589_v49, %v4493_v6  ;;  %v4161_v39 = vsel %vm1788_vm9, %v4129_v18, %v3889_v19  ;;  %v7868_v6 = vld [vmem:[#allocation45_spill] sm:$0xff] }
 0x274   :  { %v2312_v7 = vmul.f32 %v2280_v44, %v2038_v5  ;;  %v1572_v60 = vpop.permute.xlu0 %1571  ;;  %v1622_v17 = vsel %vm12_vm0, %v436_v4, %v7868_v6 }
 0x275   :  { %4848 = vst [vmem:[%s7618_s2 + $0x150] sm:$0xff] %v4652_v0  ;;  %v4653_v40 = vmul.f32 %v4621_v63, %v4379_v41  ;;  %v1851_v27 = vsel %vm1821_vm10, %v1818_v58, %v1572_v60  ;;  %v1655_v44 = vsel %vm1623_vm4, %v1622_v17, %v7869_v59 }
 0x276   :  { %2344 = vst [vmem:[%s7618_s2 + $0x58] sm:$0xff] %v2312_v7  ;;  %4752 = vmatmul.mubr.msk.bf16.gmra.mrb[56].mxu0 %vm1908_vm11, %v1851_v27  ;;  %v3921_v55 = vpop.permute.xlu1 %3920 }
 0x277   :  { %4849 = vst [vmem:[%s7618_s2 + $0x158] sm:$0xff] %v4653_v40  ;;  %v4193_v25 = vsel %vm1821_vm10, %v4161_v39, %v3921_v55  ;;  %2130 = vmatprep.mubr.bf16.mxu0 %v7713_v1 }
 0x278   :  { %v3667_v42 = vpop.permute.xlu0 %3666  ;;  %4836 = vmatmul.mubr.msk.bf16.gmra.mrb[56].mxu1 %vm1908_vm11, %v4193_v25  ;;  %v2042_v13 = vpop.f32.mrb[24].mxu0 }
 0x279   :  { %4471 = vmatprep.mubr.bf16.mxu1 %v7713_v1  ;;  %v2185_v34 = vmul.f32 0.70710677, %v2042_v13  ;;  %v2044_v14 = vpop.f32.mrb[25].mxu0  ;;  %v2153_v53 = vmul.f32 0.5, %v2042_v13  ;;  %v3971_v28 = vsel %vm12_vm0, %v2787_v33, %v3667_v42 }
 0x27a   :  { %v3699_v9 = vpop.permute.xlu1 %3698  ;;  %v2046_v46 = vpop.f32.mrb[26].mxu0 }
 0x27b   :  { %v4383_v5 = vpop.f32.mrb[24].mxu1  ;;  %4985 = verf.f32 %v2185_v34  ;;  %v2186_v47 = vmul.f32 0.70710677, %v2046_v46  ;;  %v2048_v24 = vpop.f32.mrb[27].mxu0  ;;  %v2154_v10 = vmul.f32 0.5, %v2046_v46  ;;  %v4003_v8 = vsel %vm1623_vm4, %v3971_v28, %v3699_v9 }
 0x27c   :  { %v1382_v41 = vpop.permute.xlu0 %1381  ;;  %v4526_v3 = vmul.f32 0.70710677, %v4383_v5  ;;  %v4385_v50 = vpop.f32.mrb[25].mxu1  ;;  %v4494_v36 = vmul.f32 0.5, %v4383_v5 }
 0x27d   :  { %4987 = verf.f32 %v2186_v47  ;;  %v4387_v56 = vpop.f32.mrb[26].mxu1  ;;  %v1688_v0 = vsel %vm1656_vm5, %v1655_v44, %v1382_v41 }
 0x27e   :  { %v3731_v52 = vpop.permute.xlu1 %3730  ;;  %4989 = verf.f32 %v4526_v3  ;;  %v4527_v1 = vmul.f32 0.70710677, %v4387_v56  ;;  %v4389_v54 = vpop.f32.mrb[27].mxu1  ;;  %v4495_v45 = vmul.f32 0.5, %v4387_v56 }
 0x27f   :  { %v4035_v27 = vsel %vm1656_vm5, %v4003_v8, %v3731_v52 }
 0x280   :  { %v1430_v29 = vpop.permute.xlu0 %1429  ;;  %4991 = verf.f32 %v4527_v1 }
 0x281   :  { %v1721_v60 = vsel %vm1689_vm6, %v1688_v0, %v1430_v29 }
 0x282   :  { %v3779_v48 = vpop.permute.xlu1 %3778 }
 0x283   :  { %v4067_v25 = vsel %vm1689_vm6, %v4035_v27, %v3779_v48 }
 0x284   :  { %v1462_v16 = vpop.permute.xlu0 %1461 }
 0x285   :  { %v4986_v43 = vpop.eup %4985  ;;  %v1754_v39 = vsel %vm1722_vm7, %v1721_v60, %v1462_v16 }
 0x286   :  { %v3811_v12 = vpop.permute.xlu1 %3810  ;;  %v2249_v51 = vadd.f32 1.0, %v4986_v43 }
 0x287   :  { %v4988_v20 = vpop.eup %4987  ;;  %v4099_v34 = vsel %vm1722_vm7, %v4067_v25, %v3811_v12 }
 0x288   :  { %v1494_v11 = vpop.permute.xlu0 %1493  ;;  %v4990_v22 = vpop.eup %4989  ;;  %v2281_v23 = vmul.f32 %v2249_v51, %v2153_v53  ;;  %v2250_v62 = vadd.f32 1.0, %v4988_v20 }
 0x289   :  { %v4590_v2 = vadd.f32 1.0, %v4990_v22  ;;  %v1787_v42 = vsel %vm1755_vm8, %v1754_v39, %v1494_v11 }
 0x28a   :  { %v3843_v57 = vpop.permute.xlu1 %3842  ;;  %v4992_v49 = vpop.eup %4991  ;;  %v2313_v61 = vmul.f32 %v2281_v23, %v2044_v14  ;;  %v2282_v19 = vmul.f32 %v2250_v62, %v2154_v10 }
 0x28b   :  { %v4622_v63 = vmul.f32 %v4590_v2, %v4494_v36  ;;  %v4591_v35 = vadd.f32 1.0, %v4992_v49  ;;  %v4131_v46 = vsel %vm1755_vm8, %v4099_v34, %v3843_v57 }
 0x28c   :  { %v1542_v7 = vpop.permute.xlu0 %1541  ;;  %2345 = vst [vmem:[%s7618_s2 + $0x60] sm:$0xff] %v2313_v61  ;;  %v2314_v58 = vmul.f32 %v2282_v19, %v2048_v24 }
 0x28d   :  { %v4654_v40 = vmul.f32 %v4622_v63, %v4385_v50  ;;  %v4623_v18 = vmul.f32 %v4591_v35, %v4495_v45  ;;  %v1820_v14 = vsel %vm1788_vm9, %v1787_v42, %v1542_v7 }
 0x28e   :  { %v3891_v55 = vpop.permute.xlu1 %3890  ;;  %2346 = vst [vmem:[%s7618_s2 + $0x68] sm:$0xff] %v2314_v58 }
 0x28f   :  { %4850 = vst [vmem:[%s7618_s2 + $0x160] sm:$0xff] %v4654_v40  ;;  %v4655_v13 = vmul.f32 %v4623_v18, %v4389_v54  ;;  %v4163_v32 = vsel %vm1788_vm9, %v4131_v46, %v3891_v55 }
 0x290   :  { %v1574_v9 = vpop.permute.xlu0 %1573 }
 0x291   :  { %v1853_v5 = vsel %vm1821_vm10, %v1820_v14, %v1574_v9  ;;  %4851 = vst [vmem:[%s7618_s2 + $0x168] sm:$0xff] %v4655_v13 }
 0x292   :  { %4753 = vmatmul.mubr.msk.bf16.gmra.mrb[60].mxu0 %vm1908_vm11, %v1853_v5  ;;  %v3923_v47 = vpop.permute.xlu1 %3922 }
 0x293   :  { %v4195_v41 = vsel %vm1821_vm10, %v4163_v32, %v3923_v47  ;;  %v2052_v24 = vpop.f32.mrb[28].mxu0 }
 0x294   :  { %v2187_v3 = vmul.f32 0.70710677, %v2052_v24  ;;  %v2054_v50 = vpop.f32.mrb[29].mxu0  ;;  %4837 = vmatmul.mubr.msk.bf16.gmra.mrb[60].mxu1 %vm1908_vm11, %v4195_v41  ;;  %v2155_v21 = vmul.f32 0.5, %v2052_v24 }
 0x295   :  { %v4393_v56 = vpop.f32.mrb[28].mxu1  ;;  %v2056_v52 = vpop.f32.mrb[30].mxu0 }
 0x296   :  { %4993 = verf.f32 %v2187_v3  ;;  %v4528_v15 = vmul.f32 0.70710677, %v4393_v56  ;;  %v4395_v31 = vpop.f32.mrb[29].mxu1  ;;  %v2058_v38 = vpop.f32.mrb[31].mxu0  ;;  %v2188_v1 = vmul.f32 0.70710677, %v2056_v52 }
 0x297   :  { %v4397_v54 = vpop.f32.mrb[30].mxu1  ;;  %v4496_v4 = vmul.f32 0.5, %v4393_v56  ;;  %v2156_v53 = vmul.f32 0.5, %v2056_v52 }
 0x298   :  { %4995 = verf.f32 %v4528_v15  ;;  %v4529_v29 = vmul.f32 0.70710677, %v4397_v54  ;;  %v4399_v48 = vpop.f32.mrb[31].mxu1  ;;  %v4497_v22 = vmul.f32 0.5, %v4397_v54 }
 0x299   :  { %4997 = verf.f32 %v2188_v1 }
 0x29a   :  { %4999 = verf.f32 %v4529_v29 }
 0x2a0   :  { %v4994_v37 = vpop.eup %4993 }
 0x2a1   :  { %v2251_v16 = vadd.f32 1.0, %v4994_v37 }
 0x2a2   :  { %v4996_v43 = vpop.eup %4995 }
 0x2a3   :  { %v4998_v12 = vpop.eup %4997  ;;  %v2283_v30 = vmul.f32 %v2251_v16, %v2155_v21  ;;  %v4592_v26 = vadd.f32 1.0, %v4996_v43 }
 0x2a4   :  { %v5000_v33 = vpop.eup %4999  ;;  %v2252_v51 = vadd.f32 1.0, %v4998_v12 }
 0x2a5   :  { %v2315_v20 = vmul.f32 %v2283_v30, %v2054_v50  ;;  %v4624_v11 = vmul.f32 %v4592_v26, %v4496_v4  ;;  %v4593_v23 = vadd.f32 1.0, %v5000_v33 }
 0x2a6   :  { %v2284_v10 = vmul.f32 %v2252_v51, %v2156_v53 }
 0x2a7   :  { %2347 = vst [vmem:[%s7618_s2 + $0x70] sm:$0xff] %v2315_v20  ;;  %v4656_v62 = vmul.f32 %v4624_v11, %v4395_v31  ;;  %v4625_v6 = vmul.f32 %v4593_v23, %v4497_v22 }
 0x2a8   :  { %v2316_v17 = vmul.f32 %v2284_v10, %v2058_v38 }
 0x2a9   :  { %4852 = vst [vmem:[%s7618_s2 + $0x170] sm:$0xff] %v4656_v62  ;;  %v4657_v28 = vmul.f32 %v4625_v6, %v4399_v48 }
 0x2aa   :  { %2348 = vst [vmem:[%s7618_s2 + $0x78] sm:$0xff] %v2316_v17 }
 0x2ab   :  { %4853 = vst [vmem:[%s7618_s2 + $0x178] sm:$0xff] %v4657_v28 }
 0x2ac   :  { %v2062_v36 = vpop.f32.mrb[32].mxu0 }
 0x2ad   :  { %v2189_v2 = vmul.f32 0.70710677, %v2062_v36  ;;  %v2064_v57 = vpop.f32.mrb[33].mxu0  ;;  %v2157_v8 = vmul.f32 0.5, %v2062_v36 }
 0x2ae   :  { %v2066_v49 = vpop.f32.mrb[34].mxu0 }
 0x2af   :  { %v4403_v59 = vpop.f32.mrb[32].mxu1  ;;  %5001 = verf.f32 %v2189_v2  ;;  %v2190_v44 = vmul.f32 0.70710677, %v2066_v49  ;;  %v2068_v61 = vpop.f32.mrb[35].mxu0  ;;  %v2158_v27 = vmul.f32 0.5, %v2066_v49 }
 0x2b0   :  { %v4405_v19 = vpop.f32.mrb[33].mxu1  ;;  %v4530_v0 = vmul.f32 0.70710677, %v4403_v59  ;;  %v4498_v25 = vmul.f32 0.5, %v4403_v59 }
 0x2b1   :  { %v4407_v63 = vpop.f32.mrb[34].mxu1  ;;  %5003 = verf.f32 %v2190_v44 }
 0x2b2   :  { %v4531_v45 = vmul.f32 0.70710677, %v4407_v63  ;;  %v4409_v35 = vpop.f32.mrb[35].mxu1  ;;  %5005 = verf.f32 %v4530_v0  ;;  %v4499_v14 = vmul.f32 0.5, %v4407_v63 }
 0x2b4   :  { %5007 = verf.f32 %v4531_v45 }
 0x2b9   :  { %v5002_v7 = vpop.eup %5001 }
 0x2ba   :  { %v2253_v58 = vadd.f32 1.0, %v5002_v7 }
 0x2bb   :  { %v5004_v60 = vpop.eup %5003 }
 0x2bc   :  { %v5006_v40 = vpop.eup %5005  ;;  %v2285_v18 = vmul.f32 %v2253_v58, %v2157_v8  ;;  %v2254_v39 = vadd.f32 1.0, %v5004_v60 }
 0x2bd   :  { %v4594_v42 = vadd.f32 1.0, %v5006_v40 }
 0x2be   :  { %v5008_v55 = vpop.eup %5007  ;;  %v2317_v13 = vmul.f32 %v2285_v18, %v2064_v57  ;;  %v2286_v34 = vmul.f32 %v2254_v39, %v2158_v27 }
 0x2bf   :  { %v4595_v9 = vadd.f32 1.0, %v5008_v55  ;;  %v4626_v46 = vmul.f32 %v4594_v42, %v4498_v25 }
 0x2c0   :  { %2349 = vst [vmem:[%s7618_s2 + $0x80] sm:$0xff] %v2317_v13  ;;  %v2318_v5 = vmul.f32 %v2286_v34, %v2068_v61 }
 0x2c1   :  { %v4627_v32 = vmul.f32 %v4595_v9, %v4499_v14  ;;  %v4658_v47 = vmul.f32 %v4626_v46, %v4405_v19 }
 0x2c2   :  { %2350 = vst [vmem:[%s7618_s2 + $0x88] sm:$0xff] %v2318_v5 }
 0x2c3   :  { %v4659_v41 = vmul.f32 %v4627_v32, %v4409_v35  ;;  %4854 = vst [vmem:[%s7618_s2 + $0x180] sm:$0xff] %v4658_v47 }
 0x2c5   :  { %4855 = vst [vmem:[%s7618_s2 + $0x188] sm:$0xff] %v4659_v41 }
 0x2c7   :  { %v2072_v24 = vpop.f32.mrb[36].mxu0 }
 0x2c8   :  { %v2191_v3 = vmul.f32 0.70710677, %v2072_v24  ;;  %v2074_v50 = vpop.f32.mrb[37].mxu0  ;;  %v2159_v21 = vmul.f32 0.5, %v2072_v24 }
 0x2c9   :  { %v4413_v56 = vpop.f32.mrb[36].mxu1  ;;  %v2076_v52 = vpop.f32.mrb[38].mxu0 }
 0x2ca   :  { %5009 = verf.f32 %v2191_v3  ;;  %v4532_v15 = vmul.f32 0.70710677, %v4413_v56  ;;  %v4415_v31 = vpop.f32.mrb[37].mxu1  ;;  %v2078_v38 = vpop.f32.mrb[39].mxu0  ;;  %v2192_v1 = vmul.f32 0.70710677, %v2076_v52 }
 0x2cb   :  { %v4417_v54 = vpop.f32.mrb[38].mxu1  ;;  %v4500_v4 = vmul.f32 0.5, %v4413_v56  ;;  %v2160_v53 = vmul.f32 0.5, %v2076_v52 }
 0x2cc   :  { %5011 = verf.f32 %v4532_v15  ;;  %v4533_v29 = vmul.f32 0.70710677, %v4417_v54  ;;  %v4419_v48 = vpop.f32.mrb[39].mxu1  ;;  %v4501_v22 = vmul.f32 0.5, %v4417_v54 }
 0x2cd   :  { %5013 = verf.f32 %v2192_v1 }
 0x2ce   :  { %5015 = verf.f32 %v4533_v29 }
 0x2d4   :  { %v5010_v37 = vpop.eup %5009 }
 0x2d5   :  { %v2255_v16 = vadd.f32 1.0, %v5010_v37 }
 0x2d6   :  { %v5012_v43 = vpop.eup %5011 }
 0x2d7   :  { %v5014_v12 = vpop.eup %5013  ;;  %v2287_v30 = vmul.f32 %v2255_v16, %v2159_v21  ;;  %v4596_v26 = vadd.f32 1.0, %v5012_v43 }
 0x2d8   :  { %v5016_v33 = vpop.eup %5015  ;;  %v2256_v51 = vadd.f32 1.0, %v5014_v12 }
 0x2d9   :  { %v2319_v20 = vmul.f32 %v2287_v30, %v2074_v50  ;;  %v4628_v11 = vmul.f32 %v4596_v26, %v4500_v4  ;;  %v4597_v23 = vadd.f32 1.0, %v5016_v33 }
 0x2da   :  { %v2288_v10 = vmul.f32 %v2256_v51, %v2160_v53 }
 0x2db   :  { %2351 = vst [vmem:[%s7618_s2 + $0x90] sm:$0xff] %v2319_v20  ;;  %v4660_v62 = vmul.f32 %v4628_v11, %v4415_v31  ;;  %v4629_v6 = vmul.f32 %v4597_v23, %v4501_v22 }
 0x2dc   :  { %v2320_v17 = vmul.f32 %v2288_v10, %v2078_v38 }
 0x2dd   :  { %4856 = vst [vmem:[%s7618_s2 + $0x190] sm:$0xff] %v4660_v62  ;;  %v4661_v28 = vmul.f32 %v4629_v6, %v4419_v48 }
 0x2de   :  { %2352 = vst [vmem:[%s7618_s2 + $0x98] sm:$0xff] %v2320_v17 }
 0x2df   :  { %4857 = vst [vmem:[%s7618_s2 + $0x198] sm:$0xff] %v4661_v28 }
 0x2e1   :  { %v2082_v36 = vpop.f32.mrb[40].mxu0 }
 0x2e2   :  { %v2193_v2 = vmul.f32 0.70710677, %v2082_v36  ;;  %v2084_v57 = vpop.f32.mrb[41].mxu0  ;;  %v2161_v8 = vmul.f32 0.5, %v2082_v36 }
 0x2e3   :  { %v2086_v49 = vpop.f32.mrb[42].mxu0  ;;  %v4423_v59 = vpop.f32.mrb[40].mxu1 }
 0x2e4   :  { %5017 = verf.f32 %v2193_v2  ;;  %v2194_v44 = vmul.f32 0.70710677, %v2086_v49  ;;  %v2088_v61 = vpop.f32.mrb[43].mxu0  ;;  %v4425_v19 = vpop.f32.mrb[41].mxu1  ;;  %v4534_v0 = vmul.f32 0.70710677, %v4423_v59 }
 0x2e5   :  { %v4427_v63 = vpop.f32.mrb[42].mxu1  ;;  %v2162_v27 = vmul.f32 0.5, %v2086_v49  ;;  %v4502_v25 = vmul.f32 0.5, %v4423_v59 }
 0x2e6   :  { %5019 = verf.f32 %v2194_v44  ;;  %v4535_v45 = vmul.f32 0.70710677, %v4427_v63  ;;  %v4429_v35 = vpop.f32.mrb[43].mxu1  ;;  %v4503_v14 = vmul.f32 0.5, %v4427_v63 }
 0x2e7   :  { %5021 = verf.f32 %v4534_v0 }
 0x2e8   :  { %5023 = verf.f32 %v4535_v45 }
 0x2ee   :  { %v5018_v7 = vpop.eup %5017 }
 0x2ef   :  { %v2257_v58 = vadd.f32 1.0, %v5018_v7 }
 0x2f0   :  { %v5020_v60 = vpop.eup %5019 }
 0x2f1   :  { %v5022_v40 = vpop.eup %5021  ;;  %v2289_v18 = vmul.f32 %v2257_v58, %v2161_v8  ;;  %v2258_v39 = vadd.f32 1.0, %v5020_v60 }
 0x2f2   :  { %v5024_v55 = vpop.eup %5023  ;;  %v4598_v42 = vadd.f32 1.0, %v5022_v40 }
 0x2f3   :  { %v2321_v13 = vmul.f32 %v2289_v18, %v2084_v57  ;;  %v2290_v34 = vmul.f32 %v2258_v39, %v2162_v27  ;;  %v4599_v9 = vadd.f32 1.0, %v5024_v55 }
 0x2f4   :  { %v4630_v46 = vmul.f32 %v4598_v42, %v4502_v25 }
 0x2f5   :  { %2353 = vst [vmem:[%s7618_s2 + $0xa0] sm:$0xff] %v2321_v13  ;;  %v2322_v5 = vmul.f32 %v2290_v34, %v2088_v61  ;;  %v4631_v32 = vmul.f32 %v4599_v9, %v4503_v14 }
 0x2f6   :  { %v4662_v47 = vmul.f32 %v4630_v46, %v4425_v19 }
 0x2f7   :  { %2354 = vst [vmem:[%s7618_s2 + $0xa8] sm:$0xff] %v2322_v5  ;;  %v4663_v41 = vmul.f32 %v4631_v32, %v4429_v35 }
 0x2f8   :  { %4858 = vst [vmem:[%s7618_s2 + $0x1a0] sm:$0xff] %v4662_v47 }
 0x2f9   :  { %4859 = vst [vmem:[%s7618_s2 + $0x1a8] sm:$0xff] %v4663_v41 }
 0x2fb   :  { %v2092_v24 = vpop.f32.mrb[44].mxu0 }
 0x2fc   :  { %v2195_v3 = vmul.f32 0.70710677, %v2092_v24  ;;  %v2094_v50 = vpop.f32.mrb[45].mxu0  ;;  %v2163_v21 = vmul.f32 0.5, %v2092_v24 }
 0x2fd   :  { %v4433_v56 = vpop.f32.mrb[44].mxu1  ;;  %v2096_v52 = vpop.f32.mrb[46].mxu0 }
 0x2fe   :  { %5025 = verf.f32 %v2195_v3  ;;  %v4536_v15 = vmul.f32 0.70710677, %v4433_v56  ;;  %v4435_v31 = vpop.f32.mrb[45].mxu1  ;;  %v2098_v38 = vpop.f32.mrb[47].mxu0  ;;  %v2196_v1 = vmul.f32 0.70710677, %v2096_v52 }
 0x2ff   :  { %v4437_v54 = vpop.f32.mrb[46].mxu1  ;;  %v4504_v4 = vmul.f32 0.5, %v4433_v56  ;;  %v2164_v53 = vmul.f32 0.5, %v2096_v52 }
 0x300   :  { %5027 = verf.f32 %v4536_v15  ;;  %v4537_v29 = vmul.f32 0.70710677, %v4437_v54  ;;  %v4439_v48 = vpop.f32.mrb[47].mxu1  ;;  %v4505_v22 = vmul.f32 0.5, %v4437_v54 }
 0x301   :  { %5029 = verf.f32 %v2196_v1 }
 0x302   :  { %5031 = verf.f32 %v4537_v29 }
 0x308   :  { %v5026_v37 = vpop.eup %5025 }
 0x309   :  { %v2259_v16 = vadd.f32 1.0, %v5026_v37 }
 0x30a   :  { %v5028_v43 = vpop.eup %5027 }
 0x30b   :  { %v5030_v12 = vpop.eup %5029  ;;  %v2291_v30 = vmul.f32 %v2259_v16, %v2163_v21  ;;  %v4600_v26 = vadd.f32 1.0, %v5028_v43 }
 0x30c   :  { %v5032_v33 = vpop.eup %5031  ;;  %v2260_v51 = vadd.f32 1.0, %v5030_v12 }
 0x30d   :  { %v2323_v20 = vmul.f32 %v2291_v30, %v2094_v50  ;;  %v4632_v11 = vmul.f32 %v4600_v26, %v4504_v4  ;;  %v4601_v23 = vadd.f32 1.0, %v5032_v33 }
 0x30e   :  { %v2292_v10 = vmul.f32 %v2260_v51, %v2164_v53 }
 0x30f   :  { %2355 = vst [vmem:[%s7618_s2 + $0xb0] sm:$0xff] %v2323_v20  ;;  %v4664_v62 = vmul.f32 %v4632_v11, %v4435_v31  ;;  %v4633_v6 = vmul.f32 %v4601_v23, %v4505_v22 }
 0x310   :  { %v2324_v17 = vmul.f32 %v2292_v10, %v2098_v38 }
 0x311   :  { %4860 = vst [vmem:[%s7618_s2 + $0x1b0] sm:$0xff] %v4664_v62  ;;  %v4665_v28 = vmul.f32 %v4633_v6, %v4439_v48 }
 0x312   :  { %2356 = vst [vmem:[%s7618_s2 + $0xb8] sm:$0xff] %v2324_v17 }
 0x313   :  { %4861 = vst [vmem:[%s7618_s2 + $0x1b8] sm:$0xff] %v4665_v28 }
 0x315   :  { %v2102_v36 = vpop.f32.mrb[48].mxu0 }
 0x316   :  { %v2197_v2 = vmul.f32 0.70710677, %v2102_v36  ;;  %v2104_v57 = vpop.f32.mrb[49].mxu0  ;;  %v2165_v8 = vmul.f32 0.5, %v2102_v36 }
 0x317   :  { %v2106_v49 = vpop.f32.mrb[50].mxu0  ;;  %v4443_v59 = vpop.f32.mrb[48].mxu1 }
 0x318   :  { %5033 = verf.f32 %v2197_v2  ;;  %v2198_v44 = vmul.f32 0.70710677, %v2106_v49  ;;  %v2108_v61 = vpop.f32.mrb[51].mxu0  ;;  %v4445_v19 = vpop.f32.mrb[49].mxu1  ;;  %v4538_v0 = vmul.f32 0.70710677, %v4443_v59 }
 0x319   :  { %v4447_v63 = vpop.f32.mrb[50].mxu1  ;;  %v2166_v27 = vmul.f32 0.5, %v2106_v49  ;;  %v4506_v25 = vmul.f32 0.5, %v4443_v59 }
 0x31a   :  { %5035 = verf.f32 %v2198_v44  ;;  %v4539_v45 = vmul.f32 0.70710677, %v4447_v63  ;;  %v4449_v35 = vpop.f32.mrb[51].mxu1  ;;  %v4507_v14 = vmul.f32 0.5, %v4447_v63 }
 0x31b   :  { %5037 = verf.f32 %v4538_v0 }
 0x31c   :  { %5039 = verf.f32 %v4539_v45 }
 0x322   :  { %v5034_v7 = vpop.eup %5033 }
 0x323   :  { %v2261_v58 = vadd.f32 1.0, %v5034_v7 }
 0x324   :  { %v5036_v60 = vpop.eup %5035 }
 0x325   :  { %v5038_v40 = vpop.eup %5037  ;;  %v2293_v18 = vmul.f32 %v2261_v58, %v2165_v8  ;;  %v2262_v39 = vadd.f32 1.0, %v5036_v60 }
 0x326   :  { %v5040_v55 = vpop.eup %5039  ;;  %v4602_v42 = vadd.f32 1.0, %v5038_v40 }
 0x327   :  { %v2325_v13 = vmul.f32 %v2293_v18, %v2104_v57  ;;  %v2294_v34 = vmul.f32 %v2262_v39, %v2166_v27  ;;  %v4603_v9 = vadd.f32 1.0, %v5040_v55 }
 0x328   :  { %v4634_v46 = vmul.f32 %v4602_v42, %v4506_v25 }
 0x329   :  { %2357 = vst [vmem:[%s7618_s2 + $0xc0] sm:$0xff] %v2325_v13  ;;  %v2326_v5 = vmul.f32 %v2294_v34, %v2108_v61  ;;  %v4635_v32 = vmul.f32 %v4603_v9, %v4507_v14 }
 0x32a   :  { %v4666_v47 = vmul.f32 %v4634_v46, %v4445_v19 }
 0x32b   :  { %2358 = vst [vmem:[%s7618_s2 + $0xc8] sm:$0xff] %v2326_v5  ;;  %v4667_v41 = vmul.f32 %v4635_v32, %v4449_v35 }
 0x32c   :  { %4862 = vst [vmem:[%s7618_s2 + $0x1c0] sm:$0xff] %v4666_v47 }
 0x32d   :  { %4863 = vst [vmem:[%s7618_s2 + $0x1c8] sm:$0xff] %v4667_v41 }
 0x32f   :  { %v2112_v24 = vpop.f32.mrb[52].mxu0 }
 0x330   :  { %v2199_v3 = vmul.f32 0.70710677, %v2112_v24  ;;  %v2114_v50 = vpop.f32.mrb[53].mxu0  ;;  %v2167_v21 = vmul.f32 0.5, %v2112_v24 }
 0x331   :  { %v4453_v56 = vpop.f32.mrb[52].mxu1  ;;  %v2116_v52 = vpop.f32.mrb[54].mxu0 }
 0x332   :  { %5041 = verf.f32 %v2199_v3  ;;  %v4540_v15 = vmul.f32 0.70710677, %v4453_v56  ;;  %v4455_v31 = vpop.f32.mrb[53].mxu1  ;;  %v2118_v38 = vpop.f32.mrb[55].mxu0  ;;  %v2200_v1 = vmul.f32 0.70710677, %v2116_v52 }
 0x333   :  { %v4457_v54 = vpop.f32.mrb[54].mxu1  ;;  %v4508_v4 = vmul.f32 0.5, %v4453_v56  ;;  %v2168_v53 = vmul.f32 0.5, %v2116_v52 }
 0x334   :  { %5043 = verf.f32 %v4540_v15  ;;  %v4541_v29 = vmul.f32 0.70710677, %v4457_v54  ;;  %v4459_v48 = vpop.f32.mrb[55].mxu1  ;;  %v4509_v22 = vmul.f32 0.5, %v4457_v54 }
 0x335   :  { %5045 = verf.f32 %v2200_v1 }
 0x336   :  { %5047 = verf.f32 %v4541_v29 }
 0x33c   :  { %v5042_v37 = vpop.eup %5041 }
 0x33d   :  { %v2263_v16 = vadd.f32 1.0, %v5042_v37 }
 0x33e   :  { %v5044_v43 = vpop.eup %5043 }
 0x33f   :  { %v5046_v12 = vpop.eup %5045  ;;  %v2295_v30 = vmul.f32 %v2263_v16, %v2167_v21  ;;  %v4604_v26 = vadd.f32 1.0, %v5044_v43 }
 0x340   :  { %v5048_v33 = vpop.eup %5047  ;;  %v2264_v51 = vadd.f32 1.0, %v5046_v12 }
 0x341   :  { %v2327_v20 = vmul.f32 %v2295_v30, %v2114_v50  ;;  %v4636_v11 = vmul.f32 %v4604_v26, %v4508_v4  ;;  %v4605_v23 = vadd.f32 1.0, %v5048_v33 }
 0x342   :  { %v2296_v10 = vmul.f32 %v2264_v51, %v2168_v53 }
 0x343   :  { %2359 = vst [vmem:[%s7618_s2 + $0xd0] sm:$0xff] %v2327_v20  ;;  %v4668_v62 = vmul.f32 %v4636_v11, %v4455_v31  ;;  %v4637_v6 = vmul.f32 %v4605_v23, %v4509_v22 }
 0x344   :  { %v2328_v17 = vmul.f32 %v2296_v10, %v2118_v38 }
 0x345   :  { %4864 = vst [vmem:[%s7618_s2 + $0x1d0] sm:$0xff] %v4668_v62  ;;  %v4669_v28 = vmul.f32 %v4637_v6, %v4459_v48 }
 0x346   :  { %2360 = vst [vmem:[%s7618_s2 + $0xd8] sm:$0xff] %v2328_v17 }
 0x347   :  { %4865 = vst [vmem:[%s7618_s2 + $0x1d8] sm:$0xff] %v4669_v28 }
 0x349   :  { %v2122_v36 = vpop.f32.mrb[56].mxu0 }
 0x34a   :  { %v2201_v2 = vmul.f32 0.70710677, %v2122_v36  ;;  %v2124_v57 = vpop.f32.mrb[57].mxu0  ;;  %v2169_v8 = vmul.f32 0.5, %v2122_v36 }
 0x34b   :  { %v2126_v49 = vpop.f32.mrb[58].mxu0  ;;  %v4463_v59 = vpop.f32.mrb[56].mxu1 }
 0x34c   :  { %5049 = verf.f32 %v2201_v2  ;;  %v2202_v44 = vmul.f32 0.70710677, %v2126_v49  ;;  %v2128_v61 = vpop.f32.mrb[59].mxu0  ;;  %v4465_v19 = vpop.f32.mrb[57].mxu1  ;;  %v4542_v0 = vmul.f32 0.70710677, %v4463_v59 }
 0x34d   :  { %v4467_v63 = vpop.f32.mrb[58].mxu1  ;;  %v2170_v27 = vmul.f32 0.5, %v2126_v49  ;;  %v4510_v25 = vmul.f32 0.5, %v4463_v59 }
 0x34e   :  { %5051 = verf.f32 %v2202_v44  ;;  %v4543_v45 = vmul.f32 0.70710677, %v4467_v63  ;;  %v4469_v35 = vpop.f32.mrb[59].mxu1  ;;  %v4511_v14 = vmul.f32 0.5, %v4467_v63 }
 0x34f   :  { %5053 = verf.f32 %v4542_v0 }
 0x350   :  { %5055 = verf.f32 %v4543_v45 }
 0x356   :  { %v5050_v7 = vpop.eup %5049 }
 0x357   :  { %v2265_v58 = vadd.f32 1.0, %v5050_v7 }
 0x358   :  { %v5052_v60 = vpop.eup %5051 }
 0x359   :  { %v5054_v40 = vpop.eup %5053  ;;  %v2297_v18 = vmul.f32 %v2265_v58, %v2169_v8  ;;  %v2266_v39 = vadd.f32 1.0, %v5052_v60 }
 0x35a   :  { %v5056_v55 = vpop.eup %5055  ;;  %v4606_v42 = vadd.f32 1.0, %v5054_v40 }
 0x35b   :  { %v2329_v13 = vmul.f32 %v2297_v18, %v2124_v57  ;;  %v2298_v34 = vmul.f32 %v2266_v39, %v2170_v27  ;;  %v4607_v9 = vadd.f32 1.0, %v5056_v55 }
 0x35c   :  { %v4638_v46 = vmul.f32 %v4606_v42, %v4510_v25 }
 0x35d   :  { %2361 = vst [vmem:[%s7618_s2 + $0xe0] sm:$0xff] %v2329_v13  ;;  %v2330_v5 = vmul.f32 %v2298_v34, %v2128_v61  ;;  %v4639_v32 = vmul.f32 %v4607_v9, %v4511_v14 }
 0x35e   :  { %v4670_v47 = vmul.f32 %v4638_v46, %v4465_v19 }
 0x35f   :  { %2362 = vst [vmem:[%s7618_s2 + $0xe8] sm:$0xff] %v2330_v5  ;;  %v4671_v41 = vmul.f32 %v4639_v32, %v4469_v35 }
 0x360   :  { %4866 = vst [vmem:[%s7618_s2 + $0x1e0] sm:$0xff] %v4670_v47 }
 0x361   :  { %4867 = vst [vmem:[%s7618_s2 + $0x1e8] sm:$0xff] %v4671_v41 }
 0x365   :  { %v2132_v24 = vpop.f32.mrb[60].mxu0 }
 0x366   :  { %v2203_v3 = vmul.f32 0.70710677, %v2132_v24  ;;  %v2134_v50 = vpop.f32.mrb[61].mxu0  ;;  %v2171_v21 = vmul.f32 0.5, %v2132_v24 }
 0x367   :  { %v2136_v56 = vpop.f32.mrb[62].mxu0  ;;  %v4473_v52 = vpop.f32.mrb[60].mxu1 }
 0x368   :  { %5057 = verf.f32 %v2203_v3  ;;  %v2204_v15 = vmul.f32 0.70710677, %v2136_v56  ;;  %v2138_v31 = vpop.f32.mrb[63].mxu0  ;;  %v4475_v38 = vpop.f32.mrb[61].mxu1  ;;  %v4544_v1 = vmul.f32 0.70710677, %v4473_v52 }
 0x369   :  { %v4477_v54 = vpop.f32.mrb[62].mxu1  ;;  %v2172_v4 = vmul.f32 0.5, %v2136_v56  ;;  %v4512_v53 = vmul.f32 0.5, %v4473_v52 }
 0x36a   :  { %5059 = verf.f32 %v2204_v15  ;;  %v4545_v29 = vmul.f32 0.70710677, %v4477_v54  ;;  %v4479_v48 = vpop.f32.mrb[63].mxu1  ;;  %v4513_v22 = vmul.f32 0.5, %v4477_v54 }
 0x36b   :  { %5061 = verf.f32 %v4544_v1 }
 0x36c   :  { %5063 = verf.f32 %v4545_v29 }
 0x372   :  { %v5058_v37 = vpop.eup %5057 }
 0x373   :  { %v2267_v16 = vadd.f32 1.0, %v5058_v37 }
 0x374   :  { %v5060_v43 = vpop.eup %5059 }
 0x375   :  { %v5062_v12 = vpop.eup %5061  ;;  %v2299_v30 = vmul.f32 %v2267_v16, %v2171_v21  ;;  %v2268_v26 = vadd.f32 1.0, %v5060_v43 }
 0x376   :  { %v5064_v33 = vpop.eup %5063  ;;  %v4608_v51 = vadd.f32 1.0, %v5062_v12 }
 0x377   :  { %v2331_v20 = vmul.f32 %v2299_v30, %v2134_v50  ;;  %v2300_v11 = vmul.f32 %v2268_v26, %v2172_v4  ;;  %v4609_v23 = vadd.f32 1.0, %v5064_v33 }
 0x378   :  { %v4640_v10 = vmul.f32 %v4608_v51, %v4512_v53 }
 0x379   :  { %2363 = vst [vmem:[%s7618_s2 + $0xf0] sm:$0xff] %v2331_v20  ;;  %v2332_v62 = vmul.f32 %v2300_v11, %v2138_v31  ;;  %v4641_v6 = vmul.f32 %v4609_v23, %v4513_v22 }
 0x37a   :  { %v4672_v17 = vmul.f32 %v4640_v10, %v4475_v38 }
 0x37b   :  { %2364 = vst [vmem:[%s7618_s2 + $0xf8] sm:$0xff] %v2332_v62  ;;  %v4673_v28 = vmul.f32 %v4641_v6, %v4479_v48 }
 0x37c   :  { %4868 = vst [vmem:[%s7618_s2 + $0x1f0] sm:$0xff] %v4672_v17 }
 0x37d   :  { %4869 = vst [vmem:[%s7618_s2 + $0x1f8] sm:$0xff] %v4673_v28 }

</bundles_post_ra>
